<compile_context>
chip_gen: v7x
topology: tpu7x:2x2x1
jax: 0.10.0
libtpu: 0.0.40
codegen_flags: <defaults>
</compile_context>

<pallas_src>
import functools
import math

import numpy as np
import jax
import jax.numpy as jnp
from jax import lax
from jax.experimental import pallas as pl
from jax.experimental.pallas import tpu as pltpu


def _attention_kernel(
    x_ref,        # (1, C, HW)   input image (flattened spatial)
    w_qkv_ref,    # (3C, C)      1x1 qkv conv weight
    w_dw_ref,     # (9, 3C, 1)   depthwise 3x3 weights, tap-major
    valid_ref,    # (9, 1, HW)   per-tap boundary masks (1.0 / 0.0)
    w_proj_ref,   # (C, C)       1x1 projection weight
    temp_ref,     # (C, 1)       per-channel temperature (head value repeated)
    o_ref,        # (1, C, HW)   output
    attn_out_ref,  # scratch VMEM (C, HW) f32
    *,
    num_heads: int,
    spatial_w: int,
):
    C = x_ref.shape[1]
    HW = x_ref.shape[2]
    C3 = w_qkv_ref.shape[0]
    ch = C // num_heads

    x = x_ref[0]                                              # (C, HW)

    # ---- 1x1 pointwise conv: (3C, C) @ (C, HW) -> (3C, HW) --------------
    qkv = jnp.dot(w_qkv_ref[...], x, preferred_element_type=jnp.float32)

    # ---- depthwise 3x3 conv (stride 1, padding 1) ------------------------
    # tap t = 3*ky + kx, spatial offset (sy, sx) = (ky-1, kx-1).
    # shifted[ch, d] = qkv[ch, d + sy*W + sx] when (y+sy, x+sx) is in bounds,
    # realized as qkv @ S_t with a one-hot S_t built from iota + the tap mask.
    src = lax.broadcasted_iota(jnp.int32, (HW, HW), 0)
    dst = lax.broadcasted_iota(jnp.int32, (HW, HW), 1)
    delta = src - dst                                          # (HW, HW)

    dw = jnp.zeros((C3, HW), dtype=jnp.float32)
    for t in range(9):
        sy = t // 3 - 1
        sx = t % 3 - 1
        s = sy * spatial_w + sx
        valid_row = valid_ref[t]                               # (1, HW) f32
        sel = jnp.where(delta == s, valid_row, 0.0)            # (HW, HW) f32
        tap = jnp.dot(qkv, sel, preferred_element_type=jnp.float32)  # (3C, HW)
        w_t = w_dw_ref[t]                                      # (3C, 1)
        dw = dw + w_t * tap

    # ---- per-head channel attention --------------------------------------
    temps = temp_ref[...]                                      # (C, 1)
    eps = 1e-12
    for h in range(num_heads):
        lo = h * ch
        q_h = dw[lo:lo + ch, :]                                # (ch, HW)
        k_h = dw[C + lo:C + lo + ch, :]
        v_h = dw[2 * C + lo:2 * C + lo + ch, :]

        q_n = q_h / jnp.maximum(
            jnp.sqrt(jnp.sum(q_h * q_h, axis=-1, keepdims=True)), eps)
        k_n = k_h / jnp.maximum(
            jnp.sqrt(jnp.sum(k_h * k_h, axis=-1, keepdims=True)), eps)

        # Fold the per-head temperature into q (constant within the head).
        q_n = q_n * temps[lo:lo + ch, :]

        attn = lax.dot_general(
            q_n, k_n, (((1,), (1,)), ((), ())),
            preferred_element_type=jnp.float32)                # (ch, ch)
        attn = attn - jnp.max(attn, axis=-1, keepdims=True)
        attn = jnp.exp(attn)
        attn = attn / jnp.sum(attn, axis=-1, keepdims=True)

        out_h = jnp.dot(attn, v_h, preferred_element_type=jnp.float32)
        attn_out_ref[lo:lo + ch, :] = out_h

    # ---- 1x1 output projection -------------------------------------------
    o_ref[0] = jnp.dot(
        w_proj_ref[...], attn_out_ref[...],
        preferred_element_type=jnp.float32).astype(o_ref.dtype)


def attention_forward(x_nchw, w_qkv, w_dw, w_proj, temperature, *, num_heads):
    """Forward pass of the PyTorch `Attention` module (bias=False).

    x_nchw:      [B, C, H, W]  float32
    w_qkv:       [3C, C, 1, 1]
    w_dw:        [3C, 1, 3, 3]  (depthwise, groups = 3C)
    w_proj:      [C, C, 1, 1]
    temperature: [num_heads, 1, 1]
    returns:     [B, C, H, W]
    """
    b, C, H, W = x_nchw.shape
    HW = H * W
    C3 = 3 * C
    assert C % num_heads == 0
    ch = C // num_heads

    # ---- free reshapes / tiny constant prep (no big HBM passes) ----------
    x = x_nchw.reshape(b, C, HW)

    w_qkv2 = w_qkv.reshape(C3, C)
    w_dw_taps = jnp.transpose(w_dw.reshape(C3, 9), (1, 0)).reshape(9, C3, 1)
    w_proj2 = w_proj.reshape(C, C)
    temp_col = jnp.repeat(
        temperature.reshape(num_heads).astype(jnp.float32), ch).reshape(C, 1)

    # Per-tap boundary masks for the 3x3 depthwise conv (baked constants).
    ys, xs = np.meshgrid(np.arange(H), np.arange(W), indexing="ij")
    ys = ys.reshape(-1)
    xs = xs.reshape(-1)
    vt = np.zeros((9, 1, HW), np.float32)
    for t in range(9):
        sy, sx = t // 3 - 1, t % 3 - 1
        ok = ((ys + sy >= 0) & (ys + sy < H) & (xs + sx >= 0) & (xs + sx < W))
        vt[t, 0, :] = ok.astype(np.float32)
    valid_taps = jnp.asarray(vt)

    kernel = functools.partial(
        _attention_kernel, num_heads=num_heads, spatial_w=W)

    out = pl.pallas_call(
        kernel,
        out_shape=jax.ShapeDtypeStruct((b, C, HW), x.dtype),
        grid_spec=pltpu.PrefetchScalarGridSpec(
            num_scalar_prefetch=0,
            grid=(b,),
            in_specs=[
                pl.BlockSpec((1, C, HW), lambda i: (i, 0, 0)),      # x
                pl.BlockSpec((C3, C), lambda i: (0, 0)),            # w_qkv
                pl.BlockSpec((9, C3, 1), lambda i: (0, 0, 0)),      # w_dw taps
                pl.BlockSpec((9, 1, HW), lambda i: (0, 0, 0)),      # tap masks
                pl.BlockSpec((C, C), lambda i: (0, 0)),             # w_proj
                pl.BlockSpec((C, 1), lambda i: (0, 0)),             # temperature
            ],
            out_specs=pl.BlockSpec((1, C, HW), lambda i: (i, 0, 0)),
            scratch_shapes=[pltpu.VMEM((C, HW), jnp.float32)],
        ),
        compiler_params=pltpu.CompilerParams(
            dimension_semantics=("parallel",),
        ),
    )(x, w_qkv2, w_dw_taps, valid_taps, w_proj2, temp_col)

    return out.reshape(b, C, H, W)


def _attention_reference(x, w_qkv, w_dw, w_proj, temperature, num_heads):
    """Pure-JAX reference mirroring the PyTorch module (high precision)."""
    b, C, H, W = x.shape
    hp = lax.Precision.HIGHEST
    dn = ("NCHW", "OIHW", "NCHW")
    qkv = lax.conv_general_dilated(
        x, w_qkv, (1, 1), "VALID", dimension_numbers=dn, precision=hp)
    qkv = lax.conv_general_dilated(
        qkv, w_dw, (1, 1), ((1, 1), (1, 1)), dimension_numbers=dn,
        feature_group_count=3 * C, precision=hp)
    q, k, v = jnp.split(qkv, 3, axis=1)
    ch = C // num_heads
    q = q.reshape(b, num_heads, ch, H * W)
    k = k.reshape(b, num_heads, ch, H * W)
    v = v.reshape(b, num_heads, ch, H * W)

    def l2n(t):
        n = jnp.sqrt(jnp.sum(t * t, axis=-1, keepdims=True))
        return t / jnp.maximum(n, 1e-12)

    q, k = l2n(q), l2n(k)
    attn = jnp.einsum("bhcd,bhkd->bhck", q, k, precision=hp)
    attn = attn * temperature.reshape(1, num_heads, 1, 1)
    attn = jax.nn.softmax(attn, axis=-1)
    out = jnp.einsum("bhck,bhkd->bhcd", attn, v, precision=hp)
    out = out.reshape(b, C, H, W)
    out = lax.conv_general_dilated(
        out, w_proj, (1, 1), "VALID", dimension_numbers=dn, precision=hp)
    return out


if __name__ == "__main__":
    key = jax.random.PRNGKey(0)
    k1, k2, k3, k4, k5 = jax.random.split(key, 5)

    b, dim, H, W = 2, 32, 16, 16
    num_heads = 4

    x = jax.random.normal(k1, (b, dim, H, W), dtype=jnp.float32)
    w_qkv = jax.random.normal(k2, (3 * dim, dim, 1, 1), jnp.float32) * (
        1.0 / math.sqrt(dim))
    w_dw = jax.random.normal(k3, (3 * dim, 1, 3, 3), jnp.float32) * (1.0 / 3.0)
    w_proj = jax.random.normal(k4, (dim, dim, 1, 1), jnp.float32) * (
        1.0 / math.sqrt(dim))
    # PyTorch initializes temperature to ones; use non-trivial values so the
    # per-head scaling path is actually exercised by the check.
    temperature = 1.0 + 0.5 * jax.random.uniform(
        k5, (num_heads, 1, 1), dtype=jnp.float32)

    y = attention_forward(
        x, w_qkv, w_dw, w_proj, temperature, num_heads=num_heads)
    y = jax.block_until_ready(y)

    y_ref = _attention_reference(x, w_qkv, w_dw, w_proj, temperature, num_heads)
    assert y.shape == (b, dim, H, W)
    max_diff = float(jnp.max(jnp.abs(y - y_ref)))
    assert jnp.allclose(y, y_ref, atol=3e-2, rtol=3e-2), max_diff

    print("KERNEL_OK")
</pallas_src>

<mosaic_0001>
module attributes {stable_mosaic.version = 11 : i64} {
  func.func @_attention_kernel(%arg0: i32, %arg1: memref<1x32x256xf32, #tpu.memory_space<vmem>>, %arg2: memref<96x32xf32, #tpu.memory_space<vmem>>, %arg3: memref<9x96x1xf32, #tpu.memory_space<vmem>>, %arg4: memref<9x1x256xf32, #tpu.memory_space<vmem>>, %arg5: memref<32x32xf32, #tpu.memory_space<vmem>>, %arg6: memref<32x1xf32, #tpu.memory_space<vmem>>, %arg7: memref<1x32x256xf32, #tpu.memory_space<vmem>>, %arg8: memref<32x256xf32, #tpu.memory_space<vmem>>) attributes {dimension_semantics = [#tpu.dimension_semantics<parallel>], iteration_bounds = array<i64: 2>, scalar_prefetch = 0 : i64, scratch_operands = 1 : i64, tpu.core_type = #tpu.core_type<tc>, window_params = [{transform_indices = @transform_0, window_bounds = array<i64: 1, 32, 256>}, {pipeline_mode = #tpu.pipeline_mode<synchronous>, transform_indices = @transform_1, window_bounds = array<i64: 96, 32>}, {pipeline_mode = #tpu.pipeline_mode<synchronous>, transform_indices = @transform_2, window_bounds = array<i64: 9, 96, 1>}, {pipeline_mode = #tpu.pipeline_mode<synchronous>, transform_indices = @transform_3, window_bounds = array<i64: 9, 1, 256>}, {pipeline_mode = #tpu.pipeline_mode<synchronous>, transform_indices = @transform_4, window_bounds = array<i64: 32, 32>}, {pipeline_mode = #tpu.pipeline_mode<synchronous>, transform_indices = @transform_5, window_bounds = array<i64: 32, 1>}, {transform_indices = @transform_6, window_bounds = array<i64: 1, 32, 256>}]} {
    %c0 = arith.constant 0 : index
    %c0_0 = arith.constant 0 : index
    %c0_1 = arith.constant 0 : index
    %0 = vector.load %arg1[%c0, %c0_0, %c0_1] : memref<1x32x256xf32, #tpu.memory_space<vmem>>, vector<1x32x256xf32>
    %1 = vector.shape_cast %0 : vector<1x32x256xf32> to vector<32x256xf32>
    %c0_2 = arith.constant 0 : index
    %c0_3 = arith.constant 0 : index
    %2 = vector.load %arg2[%c0_2, %c0_3] : memref<96x32xf32, #tpu.memory_space<vmem>>, vector<96x32xf32>
    %cst = arith.constant dense<0.000000e+00> : vector<96x256xf32>
    %3 = tpu.matmul %2, %1, %cst {dimension_numbers = #tpu.dot_dimension_numbers<[1], [0], [0], [1], [0, 0, 1, 1], [], []>} : vector<96x32xf32>, vector<32x256xf32>, vector<96x256xf32> -> vector<96x256xf32>
    %4 = tpu.iota {dimensions = array<i32: 0>} : vector<256x256xi32>
    %5 = tpu.iota {dimensions = array<i32: 1>} : vector<256x256xi32>
    %6 = arith.subi %4, %5 : vector<256x256xi32>
    %cst_4 = arith.constant 0.000000e+00 : f32
    %7 = vector.broadcast %cst_4 : f32 to vector<96x256xf32>
    %c0_5 = arith.constant 0 : index
    %c0_6 = arith.constant 0 : index
    %c0_7 = arith.constant 0 : index
    %8 = vector.load %arg4[%c0_5, %c0_6, %c0_7] : memref<9x1x256xf32, #tpu.memory_space<vmem>>, vector<1x1x256xf32>
    %9 = vector.shape_cast %8 : vector<1x1x256xf32> to vector<1x256xf32>
    %c-17_i32 = arith.constant -17 : i32
    %10 = vector.broadcast %c-17_i32 : i32 to vector<256x256xi32>
    %11 = arith.cmpi eq, %6, %10 : vector<256x256xi32>
    %cst_8 = arith.constant 0.000000e+00 : f32
    %12 = vector.shape_cast %9 : vector<1x256xf32> to vector<1x256xf32>
    %13 = vector.broadcast %12 : vector<1x256xf32> to vector<256x256xf32>
    %14 = vector.broadcast %cst_8 : f32 to vector<256x256xf32>
    %15 = arith.select %11, %13, %14 : vector<256x256xi1>, vector<256x256xf32>
    %cst_9 = arith.constant dense<0.000000e+00> : vector<96x256xf32>
    %16 = tpu.matmul %3, %15, %cst_9 {dimension_numbers = #tpu.dot_dimension_numbers<[1], [0], [0], [1], [0, 0, 1, 1], [], []>} : vector<96x256xf32>, vector<256x256xf32>, vector<96x256xf32> -> vector<96x256xf32>
    %c0_10 = arith.constant 0 : index
    %c0_11 = arith.constant 0 : index
    %c0_12 = arith.constant 0 : index
    %17 = vector.load %arg3[%c0_10, %c0_11, %c0_12] : memref<9x96x1xf32, #tpu.memory_space<vmem>>, vector<1x96x1xf32>
    %18 = vector.shape_cast %17 : vector<1x96x1xf32> to vector<96x1xf32>
    %19 = vector.broadcast %18 : vector<96x1xf32> to vector<96x256xf32>
    %20 = arith.mulf %19, %16 : vector<96x256xf32>
    %21 = arith.addf %7, %20 : vector<96x256xf32>
    %c1 = arith.constant 1 : index
    %c0_13 = arith.constant 0 : index
    %c0_14 = arith.constant 0 : index
    %22 = vector.load %arg4[%c1, %c0_13, %c0_14] : memref<9x1x256xf32, #tpu.memory_space<vmem>>, vector<1x1x256xf32>
    %23 = vector.shape_cast %22 : vector<1x1x256xf32> to vector<1x256xf32>
    %c-16_i32 = arith.constant -16 : i32
    %24 = vector.broadcast %c-16_i32 : i32 to vector<256x256xi32>
    %25 = arith.cmpi eq, %6, %24 : vector<256x256xi32>
    %cst_15 = arith.constant 0.000000e+00 : f32
    %26 = vector.shape_cast %23 : vector<1x256xf32> to vector<1x256xf32>
    %27 = vector.broadcast %26 : vector<1x256xf32> to vector<256x256xf32>
    %28 = vector.broadcast %cst_15 : f32 to vector<256x256xf32>
    %29 = arith.select %25, %27, %28 : vector<256x256xi1>, vector<256x256xf32>
    %cst_16 = arith.constant dense<0.000000e+00> : vector<96x256xf32>
    %30 = tpu.matmul %3, %29, %cst_16 {dimension_numbers = #tpu.dot_dimension_numbers<[1], [0], [0], [1], [0, 0, 1, 1], [], []>} : vector<96x256xf32>, vector<256x256xf32>, vector<96x256xf32> -> vector<96x256xf32>
    %c1_17 = arith.constant 1 : index
    %c0_18 = arith.constant 0 : index
    %c0_19 = arith.constant 0 : index
    %31 = vector.load %arg3[%c1_17, %c0_18, %c0_19] : memref<9x96x1xf32, #tpu.memory_space<vmem>>, vector<1x96x1xf32>
    %32 = vector.shape_cast %31 : vector<1x96x1xf32> to vector<96x1xf32>
    %33 = vector.broadcast %32 : vector<96x1xf32> to vector<96x256xf32>
    %34 = arith.mulf %33, %30 : vector<96x256xf32>
    %35 = arith.addf %21, %34 : vector<96x256xf32>
    %c2 = arith.constant 2 : index
    %c0_20 = arith.constant 0 : index
    %c0_21 = arith.constant 0 : index
    %36 = vector.load %arg4[%c2, %c0_20, %c0_21] : memref<9x1x256xf32, #tpu.memory_space<vmem>>, vector<1x1x256xf32>
    %37 = vector.shape_cast %36 : vector<1x1x256xf32> to vector<1x256xf32>
    %c-15_i32 = arith.constant -15 : i32
    %38 = vector.broadcast %c-15_i32 : i32 to vector<256x256xi32>
    %39 = arith.cmpi eq, %6, %38 : vector<256x256xi32>
    %cst_22 = arith.constant 0.000000e+00 : f32
    %40 = vector.shape_cast %37 : vector<1x256xf32> to vector<1x256xf32>
    %41 = vector.broadcast %40 : vector<1x256xf32> to vector<256x256xf32>
    %42 = vector.broadcast %cst_22 : f32 to vector<256x256xf32>
    %43 = arith.select %39, %41, %42 : vector<256x256xi1>, vector<256x256xf32>
    %cst_23 = arith.constant dense<0.000000e+00> : vector<96x256xf32>
    %44 = tpu.matmul %3, %43, %cst_23 {dimension_numbers = #tpu.dot_dimension_numbers<[1], [0], [0], [1], [0, 0, 1, 1], [], []>} : vector<96x256xf32>, vector<256x256xf32>, vector<96x256xf32> -> vector<96x256xf32>
    %c2_24 = arith.constant 2 : index
    %c0_25 = arith.constant 0 : index
    %c0_26 = arith.constant 0 : index
    %45 = vector.load %arg3[%c2_24, %c0_25, %c0_26] : memref<9x96x1xf32, #tpu.memory_space<vmem>>, vector<1x96x1xf32>
    %46 = vector.shape_cast %45 : vector<1x96x1xf32> to vector<96x1xf32>
    %47 = vector.broadcast %46 : vector<96x1xf32> to vector<96x256xf32>
    %48 = arith.mulf %47, %44 : vector<96x256xf32>
    %49 = arith.addf %35, %48 : vector<96x256xf32>
    %c3 = arith.constant 3 : index
    %c0_27 = arith.constant 0 : index
    %c0_28 = arith.constant 0 : index
    %50 = vector.load %arg4[%c3, %c0_27, %c0_28] : memref<9x1x256xf32, #tpu.memory_space<vmem>>, vector<1x1x256xf32>
    %51 = vector.shape_cast %50 : vector<1x1x256xf32> to vector<1x256xf32>
    %c-1_i32 = arith.constant -1 : i32
    %52 = vector.broadcast %c-1_i32 : i32 to vector<256x256xi32>
    %53 = arith.cmpi eq, %6, %52 : vector<256x256xi32>
    %cst_29 = arith.constant 0.000000e+00 : f32
    %54 = vector.shape_cast %51 : vector<1x256xf32> to vector<1x256xf32>
    %55 = vector.broadcast %54 : vector<1x256xf32> to vector<256x256xf32>
    %56 = vector.broadcast %cst_29 : f32 to vector<256x256xf32>
    %57 = arith.select %53, %55, %56 : vector<256x256xi1>, vector<256x256xf32>
    %cst_30 = arith.constant dense<0.000000e+00> : vector<96x256xf32>
    %58 = tpu.matmul %3, %57, %cst_30 {dimension_numbers = #tpu.dot_dimension_numbers<[1], [0], [0], [1], [0, 0, 1, 1], [], []>} : vector<96x256xf32>, vector<256x256xf32>, vector<96x256xf32> -> vector<96x256xf32>
    %c3_31 = arith.constant 3 : index
    %c0_32 = arith.constant 0 : index
    %c0_33 = arith.constant 0 : index
    %59 = vector.load %arg3[%c3_31, %c0_32, %c0_33] : memref<9x96x1xf32, #tpu.memory_space<vmem>>, vector<1x96x1xf32>
    %60 = vector.shape_cast %59 : vector<1x96x1xf32> to vector<96x1xf32>
    %61 = vector.broadcast %60 : vector<96x1xf32> to vector<96x256xf32>
    %62 = arith.mulf %61, %58 : vector<96x256xf32>
    %63 = arith.addf %49, %62 : vector<96x256xf32>
    %c4 = arith.constant 4 : index
    %c0_34 = arith.constant 0 : index
    %c0_35 = arith.constant 0 : index
    %64 = vector.load %arg4[%c4, %c0_34, %c0_35] : memref<9x1x256xf32, #tpu.memory_space<vmem>>, vector<1x1x256xf32>
    %65 = vector.shape_cast %64 : vector<1x1x256xf32> to vector<1x256xf32>
    %c0_i32 = arith.constant 0 : i32
    %66 = vector.broadcast %c0_i32 : i32 to vector<256x256xi32>
    %67 = arith.cmpi eq, %6, %66 : vector<256x256xi32>
    %cst_36 = arith.constant 0.000000e+00 : f32
    %68 = vector.shape_cast %65 : vector<1x256xf32> to vector<1x256xf32>
    %69 = vector.broadcast %68 : vector<1x256xf32> to vector<256x256xf32>
    %70 = vector.broadcast %cst_36 : f32 to vector<256x256xf32>
    %71 = arith.select %67, %69, %70 : vector<256x256xi1>, vector<256x256xf32>
    %cst_37 = arith.constant dense<0.000000e+00> : vector<96x256xf32>
    %72 = tpu.matmul %3, %71, %cst_37 {dimension_numbers = #tpu.dot_dimension_numbers<[1], [0], [0], [1], [0, 0, 1, 1], [], []>} : vector<96x256xf32>, vector<256x256xf32>, vector<96x256xf32> -> vector<96x256xf32>
    %c4_38 = arith.constant 4 : index
    %c0_39 = arith.constant 0 : index
    %c0_40 = arith.constant 0 : index
    %73 = vector.load %arg3[%c4_38, %c0_39, %c0_40] : memref<9x96x1xf32, #tpu.memory_space<vmem>>, vector<1x96x1xf32>
    %74 = vector.shape_cast %73 : vector<1x96x1xf32> to vector<96x1xf32>
    %75 = vector.broadcast %74 : vector<96x1xf32> to vector<96x256xf32>
    %76 = arith.mulf %75, %72 : vector<96x256xf32>
    %77 = arith.addf %63, %76 : vector<96x256xf32>
    %c5 = arith.constant 5 : index
    %c0_41 = arith.constant 0 : index
    %c0_42 = arith.constant 0 : index
    %78 = vector.load %arg4[%c5, %c0_41, %c0_42] : memref<9x1x256xf32, #tpu.memory_space<vmem>>, vector<1x1x256xf32>
    %79 = vector.shape_cast %78 : vector<1x1x256xf32> to vector<1x256xf32>
    %c1_i32 = arith.constant 1 : i32
    %80 = vector.broadcast %c1_i32 : i32 to vector<256x256xi32>
    %81 = arith.cmpi eq, %6, %80 : vector<256x256xi32>
    %cst_43 = arith.constant 0.000000e+00 : f32
    %82 = vector.shape_cast %79 : vector<1x256xf32> to vector<1x256xf32>
    %83 = vector.broadcast %82 : vector<1x256xf32> to vector<256x256xf32>
    %84 = vector.broadcast %cst_43 : f32 to vector<256x256xf32>
    %85 = arith.select %81, %83, %84 : vector<256x256xi1>, vector<256x256xf32>
    %cst_44 = arith.constant dense<0.000000e+00> : vector<96x256xf32>
    %86 = tpu.matmul %3, %85, %cst_44 {dimension_numbers = #tpu.dot_dimension_numbers<[1], [0], [0], [1], [0, 0, 1, 1], [], []>} : vector<96x256xf32>, vector<256x256xf32>, vector<96x256xf32> -> vector<96x256xf32>
    %c5_45 = arith.constant 5 : index
    %c0_46 = arith.constant 0 : index
    %c0_47 = arith.constant 0 : index
    %87 = vector.load %arg3[%c5_45, %c0_46, %c0_47] : memref<9x96x1xf32, #tpu.memory_space<vmem>>, vector<1x96x1xf32>
    %88 = vector.shape_cast %87 : vector<1x96x1xf32> to vector<96x1xf32>
    %89 = vector.broadcast %88 : vector<96x1xf32> to vector<96x256xf32>
    %90 = arith.mulf %89, %86 : vector<96x256xf32>
    %91 = arith.addf %77, %90 : vector<96x256xf32>
    %c6 = arith.constant 6 : index
    %c0_48 = arith.constant 0 : index
    %c0_49 = arith.constant 0 : index
    %92 = vector.load %arg4[%c6, %c0_48, %c0_49] : memref<9x1x256xf32, #tpu.memory_space<vmem>>, vector<1x1x256xf32>
    %93 = vector.shape_cast %92 : vector<1x1x256xf32> to vector<1x256xf32>
    %c15_i32 = arith.constant 15 : i32
    %94 = vector.broadcast %c15_i32 : i32 to vector<256x256xi32>
    %95 = arith.cmpi eq, %6, %94 : vector<256x256xi32>
    %cst_50 = arith.constant 0.000000e+00 : f32
    %96 = vector.shape_cast %93 : vector<1x256xf32> to vector<1x256xf32>
    %97 = vector.broadcast %96 : vector<1x256xf32> to vector<256x256xf32>
    %98 = vector.broadcast %cst_50 : f32 to vector<256x256xf32>
    %99 = arith.select %95, %97, %98 : vector<256x256xi1>, vector<256x256xf32>
    %cst_51 = arith.constant dense<0.000000e+00> : vector<96x256xf32>
    %100 = tpu.matmul %3, %99, %cst_51 {dimension_numbers = #tpu.dot_dimension_numbers<[1], [0], [0], [1], [0, 0, 1, 1], [], []>} : vector<96x256xf32>, vector<256x256xf32>, vector<96x256xf32> -> vector<96x256xf32>
    %c6_52 = arith.constant 6 : index
    %c0_53 = arith.constant 0 : index
    %c0_54 = arith.constant 0 : index
    %101 = vector.load %arg3[%c6_52, %c0_53, %c0_54] : memref<9x96x1xf32, #tpu.memory_space<vmem>>, vector<1x96x1xf32>
    %102 = vector.shape_cast %101 : vector<1x96x1xf32> to vector<96x1xf32>
    %103 = vector.broadcast %102 : vector<96x1xf32> to vector<96x256xf32>
    %104 = arith.mulf %103, %100 : vector<96x256xf32>
    %105 = arith.addf %91, %104 : vector<96x256xf32>
    %c7 = arith.constant 7 : index
    %c0_55 = arith.constant 0 : index
    %c0_56 = arith.constant 0 : index
    %106 = vector.load %arg4[%c7, %c0_55, %c0_56] : memref<9x1x256xf32, #tpu.memory_space<vmem>>, vector<1x1x256xf32>
    %107 = vector.shape_cast %106 : vector<1x1x256xf32> to vector<1x256xf32>
    %c16_i32 = arith.constant 16 : i32
    %108 = vector.broadcast %c16_i32 : i32 to vector<256x256xi32>
    %109 = arith.cmpi eq, %6, %108 : vector<256x256xi32>
    %cst_57 = arith.constant 0.000000e+00 : f32
    %110 = vector.shape_cast %107 : vector<1x256xf32> to vector<1x256xf32>
    %111 = vector.broadcast %110 : vector<1x256xf32> to vector<256x256xf32>
    %112 = vector.broadcast %cst_57 : f32 to vector<256x256xf32>
    %113 = arith.select %109, %111, %112 : vector<256x256xi1>, vector<256x256xf32>
    %cst_58 = arith.constant dense<0.000000e+00> : vector<96x256xf32>
    %114 = tpu.matmul %3, %113, %cst_58 {dimension_numbers = #tpu.dot_dimension_numbers<[1], [0], [0], [1], [0, 0, 1, 1], [], []>} : vector<96x256xf32>, vector<256x256xf32>, vector<96x256xf32> -> vector<96x256xf32>
    %c7_59 = arith.constant 7 : index
    %c0_60 = arith.constant 0 : index
    %c0_61 = arith.constant 0 : index
    %115 = vector.load %arg3[%c7_59, %c0_60, %c0_61] : memref<9x96x1xf32, #tpu.memory_space<vmem>>, vector<1x96x1xf32>
    %116 = vector.shape_cast %115 : vector<1x96x1xf32> to vector<96x1xf32>
    %117 = vector.broadcast %116 : vector<96x1xf32> to vector<96x256xf32>
    %118 = arith.mulf %117, %114 : vector<96x256xf32>
    %119 = arith.addf %105, %118 : vector<96x256xf32>
    %c8 = arith.constant 8 : index
    %c0_62 = arith.constant 0 : index
    %c0_63 = arith.constant 0 : index
    %120 = vector.load %arg4[%c8, %c0_62, %c0_63] : memref<9x1x256xf32, #tpu.memory_space<vmem>>, vector<1x1x256xf32>
    %121 = vector.shape_cast %120 : vector<1x1x256xf32> to vector<1x256xf32>
    %c17_i32 = arith.constant 17 : i32
    %122 = vector.broadcast %c17_i32 : i32 to vector<256x256xi32>
    %123 = arith.cmpi eq, %6, %122 : vector<256x256xi32>
    %cst_64 = arith.constant 0.000000e+00 : f32
    %124 = vector.shape_cast %121 : vector<1x256xf32> to vector<1x256xf32>
    %125 = vector.broadcast %124 : vector<1x256xf32> to vector<256x256xf32>
    %126 = vector.broadcast %cst_64 : f32 to vector<256x256xf32>
    %127 = arith.select %123, %125, %126 : vector<256x256xi1>, vector<256x256xf32>
    %cst_65 = arith.constant dense<0.000000e+00> : vector<96x256xf32>
    %128 = tpu.matmul %3, %127, %cst_65 {dimension_numbers = #tpu.dot_dimension_numbers<[1], [0], [0], [1], [0, 0, 1, 1], [], []>} : vector<96x256xf32>, vector<256x256xf32>, vector<96x256xf32> -> vector<96x256xf32>
    %c8_66 = arith.constant 8 : index
    %c0_67 = arith.constant 0 : index
    %c0_68 = arith.constant 0 : index
    %129 = vector.load %arg3[%c8_66, %c0_67, %c0_68] : memref<9x96x1xf32, #tpu.memory_space<vmem>>, vector<1x96x1xf32>
    %130 = vector.shape_cast %129 : vector<1x96x1xf32> to vector<96x1xf32>
    %131 = vector.broadcast %130 : vector<96x1xf32> to vector<96x256xf32>
    %132 = arith.mulf %131, %128 : vector<96x256xf32>
    %133 = arith.addf %119, %132 : vector<96x256xf32>
    %c0_69 = arith.constant 0 : index
    %c0_70 = arith.constant 0 : index
    %134 = vector.load %arg6[%c0_69, %c0_70] : memref<32x1xf32, #tpu.memory_space<vmem>>, vector<32x1xf32>
    %135 = vector.extract_strided_slice %133 {offsets = [0, 0], sizes = [8, 256], strides = [1, 1]} : vector<96x256xf32> to vector<8x256xf32>
    %136 = vector.extract_strided_slice %133 {offsets = [32, 0], sizes = [8, 256], strides = [1, 1]} : vector<96x256xf32> to vector<8x256xf32>
    %137 = vector.extract_strided_slice %133 {offsets = [64, 0], sizes = [8, 256], strides = [1, 1]} : vector<96x256xf32> to vector<8x256xf32>
    %138 = arith.mulf %135, %135 : vector<8x256xf32>
    %cst_71 = arith.constant dense<0.000000e+00> : vector<8xf32>
    %139 = vector.multi_reduction <add>, %138, %cst_71 [1] : vector<8x256xf32> to vector<8xf32>
    %140 = vector.shape_cast %139 : vector<8xf32> to vector<8x1xf32>
    %141 = math.sqrt %140 : vector<8x1xf32>
    %cst_72 = arith.constant 9.99999996E-13 : f32
    %142 = vector.broadcast %cst_72 : f32 to vector<8x1xf32>
    %143 = arith.maximumf %141, %142 : vector<8x1xf32>
    %144 = vector.broadcast %143 : vector<8x1xf32> to vector<8x256xf32>
    %145 = arith.divf %135, %144 : vector<8x256xf32>
    %146 = arith.mulf %136, %136 : vector<8x256xf32>
    %cst_73 = arith.constant dense<0.000000e+00> : vector<8xf32>
    %147 = vector.multi_reduction <add>, %146, %cst_73 [1] : vector<8x256xf32> to vector<8xf32>
    %148 = vector.shape_cast %147 : vector<8xf32> to vector<8x1xf32>
    %149 = math.sqrt %148 : vector<8x1xf32>
    %cst_74 = arith.constant 9.99999996E-13 : f32
    %150 = vector.broadcast %cst_74 : f32 to vector<8x1xf32>
    %151 = arith.maximumf %149, %150 : vector<8x1xf32>
    %152 = vector.broadcast %151 : vector<8x1xf32> to vector<8x256xf32>
    %153 = arith.divf %136, %152 : vector<8x256xf32>
    %154 = vector.extract_strided_slice %134 {offsets = [0, 0], sizes = [8, 1], strides = [1, 1]} : vector<32x1xf32> to vector<8x1xf32>
    %155 = vector.broadcast %154 : vector<8x1xf32> to vector<8x256xf32>
    %156 = arith.mulf %145, %155 : vector<8x256xf32>
    %cst_75 = arith.constant dense<0.000000e+00> : vector<8x8xf32>
    %157 = tpu.matmul %156, %153, %cst_75 {dimension_numbers = #tpu.dot_dimension_numbers<[1], [1], [0], [0], [0, 0, 1, 0], [], []>} : vector<8x256xf32>, vector<8x256xf32>, vector<8x8xf32> -> vector<8x8xf32>
    %cst_76 = arith.constant dense<0xFF800000> : vector<8xf32>
    %158 = vector.multi_reduction <maximumf>, %157, %cst_76 [1] : vector<8x8xf32> to vector<8xf32>
    %159 = vector.shape_cast %158 : vector<8xf32> to vector<8x1xf32>
    %160 = vector.broadcast %159 : vector<8x1xf32> to vector<8x8xf32>
    %161 = arith.subf %157, %160 : vector<8x8xf32>
    %162 = math.exp %161 : vector<8x8xf32>
    %cst_77 = arith.constant dense<0.000000e+00> : vector<8xf32>
    %163 = vector.multi_reduction <add>, %162, %cst_77 [1] : vector<8x8xf32> to vector<8xf32>
    %164 = vector.shape_cast %163 : vector<8xf32> to vector<8x1xf32>
    %165 = vector.broadcast %164 : vector<8x1xf32> to vector<8x8xf32>
    %166 = arith.divf %162, %165 : vector<8x8xf32>
    %cst_78 = arith.constant dense<0.000000e+00> : vector<8x256xf32>
    %167 = tpu.matmul %166, %137, %cst_78 {dimension_numbers = #tpu.dot_dimension_numbers<[1], [0], [0], [1], [0, 0, 1, 1], [], []>} : vector<8x8xf32>, vector<8x256xf32>, vector<8x256xf32> -> vector<8x256xf32>
    %c0_79 = arith.constant 0 : index
    %c0_80 = arith.constant 0 : index
    %168 = vector.load %arg8[%c0_79, %c0_80] : memref<32x256xf32, #tpu.memory_space<vmem>>, vector<8x256xf32>
    tpu.vector_store %arg8[%c0_79, %c0_80], %167 {strides = array<i32>} : memref<32x256xf32, #tpu.memory_space<vmem>>, vector<8x256xf32>,
    %169 = vector.extract_strided_slice %133 {offsets = [8, 0], sizes = [8, 256], strides = [1, 1]} : vector<96x256xf32> to vector<8x256xf32>
    %170 = vector.extract_strided_slice %133 {offsets = [40, 0], sizes = [8, 256], strides = [1, 1]} : vector<96x256xf32> to vector<8x256xf32>
    %171 = vector.extract_strided_slice %133 {offsets = [72, 0], sizes = [8, 256], strides = [1, 1]} : vector<96x256xf32> to vector<8x256xf32>
    %172 = arith.mulf %169, %169 : vector<8x256xf32>
    %cst_81 = arith.constant dense<0.000000e+00> : vector<8xf32>
    %173 = vector.multi_reduction <add>, %172, %cst_81 [1] : vector<8x256xf32> to vector<8xf32>
    %174 = vector.shape_cast %173 : vector<8xf32> to vector<8x1xf32>
    %175 = math.sqrt %174 : vector<8x1xf32>
    %cst_82 = arith.constant 9.99999996E-13 : f32
    %176 = vector.broadcast %cst_82 : f32 to vector<8x1xf32>
    %177 = arith.maximumf %175, %176 : vector<8x1xf32>
    %178 = vector.broadcast %177 : vector<8x1xf32> to vector<8x256xf32>
    %179 = arith.divf %169, %178 : vector<8x256xf32>
    %180 = arith.mulf %170, %170 : vector<8x256xf32>
    %cst_83 = arith.constant dense<0.000000e+00> : vector<8xf32>
    %181 = vector.multi_reduction <add>, %180, %cst_83 [1] : vector<8x256xf32> to vector<8xf32>
    %182 = vector.shape_cast %181 : vector<8xf32> to vector<8x1xf32>
    %183 = math.sqrt %182 : vector<8x1xf32>
    %cst_84 = arith.constant 9.99999996E-13 : f32
    %184 = vector.broadcast %cst_84 : f32 to vector<8x1xf32>
    %185 = arith.maximumf %183, %184 : vector<8x1xf32>
    %186 = vector.broadcast %185 : vector<8x1xf32> to vector<8x256xf32>
    %187 = arith.divf %170, %186 : vector<8x256xf32>
    %188 = vector.extract_strided_slice %134 {offsets = [8, 0], sizes = [8, 1], strides = [1, 1]} : vector<32x1xf32> to vector<8x1xf32>
    %189 = vector.broadcast %188 : vector<8x1xf32> to vector<8x256xf32>
    %190 = arith.mulf %179, %189 : vector<8x256xf32>
    %cst_85 = arith.constant dense<0.000000e+00> : vector<8x8xf32>
    %191 = tpu.matmul %190, %187, %cst_85 {dimension_numbers = #tpu.dot_dimension_numbers<[1], [1], [0], [0], [0, 0, 1, 0], [], []>} : vector<8x256xf32>, vector<8x256xf32>, vector<8x8xf32> -> vector<8x8xf32>
    %cst_86 = arith.constant dense<0xFF800000> : vector<8xf32>
    %192 = vector.multi_reduction <maximumf>, %191, %cst_86 [1] : vector<8x8xf32> to vector<8xf32>
    %193 = vector.shape_cast %192 : vector<8xf32> to vector<8x1xf32>
    %194 = vector.broadcast %193 : vector<8x1xf32> to vector<8x8xf32>
    %195 = arith.subf %191, %194 : vector<8x8xf32>
    %196 = math.exp %195 : vector<8x8xf32>
    %cst_87 = arith.constant dense<0.000000e+00> : vector<8xf32>
    %197 = vector.multi_reduction <add>, %196, %cst_87 [1] : vector<8x8xf32> to vector<8xf32>
    %198 = vector.shape_cast %197 : vector<8xf32> to vector<8x1xf32>
    %199 = vector.broadcast %198 : vector<8x1xf32> to vector<8x8xf32>
    %200 = arith.divf %196, %199 : vector<8x8xf32>
    %cst_88 = arith.constant dense<0.000000e+00> : vector<8x256xf32>
    %201 = tpu.matmul %200, %171, %cst_88 {dimension_numbers = #tpu.dot_dimension_numbers<[1], [0], [0], [1], [0, 0, 1, 1], [], []>} : vector<8x8xf32>, vector<8x256xf32>, vector<8x256xf32> -> vector<8x256xf32>
    %c8_89 = arith.constant 8 : index
    %c0_90 = arith.constant 0 : index
    %202 = vector.load %arg8[%c8_89, %c0_90] : memref<32x256xf32, #tpu.memory_space<vmem>>, vector<8x256xf32>
    tpu.vector_store %arg8[%c8_89, %c0_90], %201 {strides = array<i32>} : memref<32x256xf32, #tpu.memory_space<vmem>>, vector<8x256xf32>,
    %203 = vector.extract_strided_slice %133 {offsets = [16, 0], sizes = [8, 256], strides = [1, 1]} : vector<96x256xf32> to vector<8x256xf32>
    %204 = vector.extract_strided_slice %133 {offsets = [48, 0], sizes = [8, 256], strides = [1, 1]} : vector<96x256xf32> to vector<8x256xf32>
    %205 = vector.extract_strided_slice %133 {offsets = [80, 0], sizes = [8, 256], strides = [1, 1]} : vector<96x256xf32> to vector<8x256xf32>
    %206 = arith.mulf %203, %203 : vector<8x256xf32>
    %cst_91 = arith.constant dense<0.000000e+00> : vector<8xf32>
    %207 = vector.multi_reduction <add>, %206, %cst_91 [1] : vector<8x256xf32> to vector<8xf32>
    %208 = vector.shape_cast %207 : vector<8xf32> to vector<8x1xf32>
    %209 = math.sqrt %208 : vector<8x1xf32>
    %cst_92 = arith.constant 9.99999996E-13 : f32
    %210 = vector.broadcast %cst_92 : f32 to vector<8x1xf32>
    %211 = arith.maximumf %209, %210 : vector<8x1xf32>
    %212 = vector.broadcast %211 : vector<8x1xf32> to vector<8x256xf32>
    %213 = arith.divf %203, %212 : vector<8x256xf32>
    %214 = arith.mulf %204, %204 : vector<8x256xf32>
    %cst_93 = arith.constant dense<0.000000e+00> : vector<8xf32>
    %215 = vector.multi_reduction <add>, %214, %cst_93 [1] : vector<8x256xf32> to vector<8xf32>
    %216 = vector.shape_cast %215 : vector<8xf32> to vector<8x1xf32>
    %217 = math.sqrt %216 : vector<8x1xf32>
    %cst_94 = arith.constant 9.99999996E-13 : f32
    %218 = vector.broadcast %cst_94 : f32 to vector<8x1xf32>
    %219 = arith.maximumf %217, %218 : vector<8x1xf32>
    %220 = vector.broadcast %219 : vector<8x1xf32> to vector<8x256xf32>
    %221 = arith.divf %204, %220 : vector<8x256xf32>
    %222 = vector.extract_strided_slice %134 {offsets = [16, 0], sizes = [8, 1], strides = [1, 1]} : vector<32x1xf32> to vector<8x1xf32>
    %223 = vector.broadcast %222 : vector<8x1xf32> to vector<8x256xf32>
    %224 = arith.mulf %213, %223 : vector<8x256xf32>
    %cst_95 = arith.constant dense<0.000000e+00> : vector<8x8xf32>
    %225 = tpu.matmul %224, %221, %cst_95 {dimension_numbers = #tpu.dot_dimension_numbers<[1], [1], [0], [0], [0, 0, 1, 0], [], []>} : vector<8x256xf32>, vector<8x256xf32>, vector<8x8xf32> -> vector<8x8xf32>
    %cst_96 = arith.constant dense<0xFF800000> : vector<8xf32>
    %226 = vector.multi_reduction <maximumf>, %225, %cst_96 [1] : vector<8x8xf32> to vector<8xf32>
    %227 = vector.shape_cast %226 : vector<8xf32> to vector<8x1xf32>
    %228 = vector.broadcast %227 : vector<8x1xf32> to vector<8x8xf32>
    %229 = arith.subf %225, %228 : vector<8x8xf32>
    %230 = math.exp %229 : vector<8x8xf32>
    %cst_97 = arith.constant dense<0.000000e+00> : vector<8xf32>
    %231 = vector.multi_reduction <add>, %230, %cst_97 [1] : vector<8x8xf32> to vector<8xf32>
    %232 = vector.shape_cast %231 : vector<8xf32> to vector<8x1xf32>
    %233 = vector.broadcast %232 : vector<8x1xf32> to vector<8x8xf32>
    %234 = arith.divf %230, %233 : vector<8x8xf32>
    %cst_98 = arith.constant dense<0.000000e+00> : vector<8x256xf32>
    %235 = tpu.matmul %234, %205, %cst_98 {dimension_numbers = #tpu.dot_dimension_numbers<[1], [0], [0], [1], [0, 0, 1, 1], [], []>} : vector<8x8xf32>, vector<8x256xf32>, vector<8x256xf32> -> vector<8x256xf32>
    %c16 = arith.constant 16 : index
    %c0_99 = arith.constant 0 : index
    %236 = vector.load %arg8[%c16, %c0_99] : memref<32x256xf32, #tpu.memory_space<vmem>>, vector<8x256xf32>
    tpu.vector_store %arg8[%c16, %c0_99], %235 {strides = array<i32>} : memref<32x256xf32, #tpu.memory_space<vmem>>, vector<8x256xf32>,
    %237 = vector.extract_strided_slice %133 {offsets = [24, 0], sizes = [8, 256], strides = [1, 1]} : vector<96x256xf32> to vector<8x256xf32>
    %238 = vector.extract_strided_slice %133 {offsets = [56, 0], sizes = [8, 256], strides = [1, 1]} : vector<96x256xf32> to vector<8x256xf32>
    %239 = vector.extract_strided_slice %133 {offsets = [88, 0], sizes = [8, 256], strides = [1, 1]} : vector<96x256xf32> to vector<8x256xf32>
    %240 = arith.mulf %237, %237 : vector<8x256xf32>
    %cst_100 = arith.constant dense<0.000000e+00> : vector<8xf32>
    %241 = vector.multi_reduction <add>, %240, %cst_100 [1] : vector<8x256xf32> to vector<8xf32>
    %242 = vector.shape_cast %241 : vector<8xf32> to vector<8x1xf32>
    %243 = math.sqrt %242 : vector<8x1xf32>
    %cst_101 = arith.constant 9.99999996E-13 : f32
    %244 = vector.broadcast %cst_101 : f32 to vector<8x1xf32>
    %245 = arith.maximumf %243, %244 : vector<8x1xf32>
    %246 = vector.broadcast %245 : vector<8x1xf32> to vector<8x256xf32>
    %247 = arith.divf %237, %246 : vector<8x256xf32>
    %248 = arith.mulf %238, %238 : vector<8x256xf32>
    %cst_102 = arith.constant dense<0.000000e+00> : vector<8xf32>
    %249 = vector.multi_reduction <add>, %248, %cst_102 [1] : vector<8x256xf32> to vector<8xf32>
    %250 = vector.shape_cast %249 : vector<8xf32> to vector<8x1xf32>
    %251 = math.sqrt %250 : vector<8x1xf32>
    %cst_103 = arith.constant 9.99999996E-13 : f32
    %252 = vector.broadcast %cst_103 : f32 to vector<8x1xf32>
    %253 = arith.maximumf %251, %252 : vector<8x1xf32>
    %254 = vector.broadcast %253 : vector<8x1xf32> to vector<8x256xf32>
    %255 = arith.divf %238, %254 : vector<8x256xf32>
    %256 = vector.extract_strided_slice %134 {offsets = [24, 0], sizes = [8, 1], strides = [1, 1]} : vector<32x1xf32> to vector<8x1xf32>
    %257 = vector.broadcast %256 : vector<8x1xf32> to vector<8x256xf32>
    %258 = arith.mulf %247, %257 : vector<8x256xf32>
    %cst_104 = arith.constant dense<0.000000e+00> : vector<8x8xf32>
    %259 = tpu.matmul %258, %255, %cst_104 {dimension_numbers = #tpu.dot_dimension_numbers<[1], [1], [0], [0], [0, 0, 1, 0], [], []>} : vector<8x256xf32>, vector<8x256xf32>, vector<8x8xf32> -> vector<8x8xf32>
    %cst_105 = arith.constant dense<0xFF800000> : vector<8xf32>
    %260 = vector.multi_reduction <maximumf>, %259, %cst_105 [1] : vector<8x8xf32> to vector<8xf32>
    %261 = vector.shape_cast %260 : vector<8xf32> to vector<8x1xf32>
    %262 = vector.broadcast %261 : vector<8x1xf32> to vector<8x8xf32>
    %263 = arith.subf %259, %262 : vector<8x8xf32>
    %264 = math.exp %263 : vector<8x8xf32>
    %cst_106 = arith.constant dense<0.000000e+00> : vector<8xf32>
    %265 = vector.multi_reduction <add>, %264, %cst_106 [1] : vector<8x8xf32> to vector<8xf32>
    %266 = vector.shape_cast %265 : vector<8xf32> to vector<8x1xf32>
    %267 = vector.broadcast %266 : vector<8x1xf32> to vector<8x8xf32>
    %268 = arith.divf %264, %267 : vector<8x8xf32>
    %cst_107 = arith.constant dense<0.000000e+00> : vector<8x256xf32>
    %269 = tpu.matmul %268, %239, %cst_107 {dimension_numbers = #tpu.dot_dimension_numbers<[1], [0], [0], [1], [0, 0, 1, 1], [], []>} : vector<8x8xf32>, vector<8x256xf32>, vector<8x256xf32> -> vector<8x256xf32>
    %c24 = arith.constant 24 : index
    %c0_108 = arith.constant 0 : index
    %270 = vector.load %arg8[%c24, %c0_108] : memref<32x256xf32, #tpu.memory_space<vmem>>, vector<8x256xf32>
    tpu.vector_store %arg8[%c24, %c0_108], %269 {strides = array<i32>} : memref<32x256xf32, #tpu.memory_space<vmem>>, vector<8x256xf32>,
    %c0_109 = arith.constant 0 : index
    %c0_110 = arith.constant 0 : index
    %271 = vector.load %arg5[%c0_109, %c0_110] : memref<32x32xf32, #tpu.memory_space<vmem>>, vector<32x32xf32>
    %c0_111 = arith.constant 0 : index
    %c0_112 = arith.constant 0 : index
    %272 = vector.load %arg8[%c0_111, %c0_112] : memref<32x256xf32, #tpu.memory_space<vmem>>, vector<32x256xf32>
    %cst_113 = arith.constant dense<0.000000e+00> : vector<32x256xf32>
    %273 = tpu.matmul %271, %272, %cst_113 {dimension_numbers = #tpu.dot_dimension_numbers<[1], [0], [0], [1], [0, 0, 1, 1], [], []>} : vector<32x32xf32>, vector<32x256xf32>, vector<32x256xf32> -> vector<32x256xf32>
    %c0_114 = arith.constant 0 : index
    %c0_115 = arith.constant 0 : index
    %c0_116 = arith.constant 0 : index
    %274 = vector.load %arg7[%c0_114, %c0_115, %c0_116] : memref<1x32x256xf32, #tpu.memory_space<vmem>>, vector<1x32x256xf32>
    %275 = vector.shape_cast %274 : vector<1x32x256xf32> to vector<32x256xf32>
    %276 = vector.shape_cast %273 : vector<32x256xf32> to vector<1x32x256xf32>
    tpu.vector_store %arg7[%c0_114, %c0_115, %c0_116], %276 {strides = array<i32>} : memref<1x32x256xf32, #tpu.memory_space<vmem>>, vector<1x32x256xf32>,
    return
  }
  func.func @transform_0(%arg0: i32) -> (i32, i32, i32) {
    %c0_i32 = arith.constant 0 : i32
    %c0_i32_0 = arith.constant 0 : i32
    %c0_i32_1 = arith.constant 0 : i32
    return %arg0, %c0_i32, %c0_i32_0 : i32, i32, i32
  }
  func.func @transform_1(%arg0: i32) -> (i32, i32) {
    %c0_i32 = arith.constant 0 : i32
    %c0_i32_0 = arith.constant 0 : i32
    %c0_i32_1 = arith.constant 0 : i32
    return %c0_i32, %c0_i32_0 : i32, i32
  }
  func.func @transform_2(%arg0: i32) -> (i32, i32, i32) {
    %c0_i32 = arith.constant 0 : i32
    %c0_i32_0 = arith.constant 0 : i32
    %c0_i32_1 = arith.constant 0 : i32
    %c0_i32_2 = arith.constant 0 : i32
    return %c0_i32, %c0_i32_0, %c0_i32_1 : i32, i32, i32
  }
  func.func @transform_3(%arg0: i32) -> (i32, i32, i32) {
    %c0_i32 = arith.constant 0 : i32
    %c0_i32_0 = arith.constant 0 : i32
    %c0_i32_1 = arith.constant 0 : i32
    %c0_i32_2 = arith.constant 0 : i32
    return %c0_i32, %c0_i32_0, %c0_i32_1 : i32, i32, i32
  }
  func.func @transform_4(%arg0: i32) -> (i32, i32) {
    %c0_i32 = arith.constant 0 : i32
    %c0_i32_0 = arith.constant 0 : i32
    %c0_i32_1 = arith.constant 0 : i32
    return %c0_i32, %c0_i32_0 : i32, i32
  }
  func.func @transform_5(%arg0: i32) -> (i32, i32) {
    %c0_i32 = arith.constant 0 : i32
    %c0_i32_0 = arith.constant 0 : i32
    %c0_i32_1 = arith.constant 0 : i32
    return %c0_i32, %c0_i32_0 : i32, i32
  }
  func.func @transform_6(%arg0: i32) -> (i32, i32, i32) {
    %c0_i32 = arith.constant 0 : i32
    %c0_i32_0 = arith.constant 0 : i32
    %c0_i32_1 = arith.constant 0 : i32
    return %arg0, %c0_i32, %c0_i32_0 : i32, i32, i32
  }
}

</mosaic_0001>

<bundles_post_ra>
// kernel: tpu_custom_call.1
= control target key start
LH: loop header
LB: loop body
LE: loop exit
PB: predicated region body
PF: predicated region fallthrough
CT: control target
= control target key end

     0   :  { %11 = vsyncpa [#allocation4], 0  ;;  %s8925_s0 = inlined_call_operand.vmem [shape: f32[2,32,256], index: 0, kind: input, shape index: {}]   ;;  %s8926_s1 = inlined_call_operand.vmem [shape: f32[96,32], index: 1, kind: input, shape index: {}]   ;;  %s8927_s2 = inlined_call_operand.vmem [shape: f32[9,96,1], index: 2, kind: input, shape index: {}]   ;;  %s8928_s3 = inlined_call_operand.vmem [shape: f32[9,1,256], index: 3, kind: input, shape index: {}]   ;;  %s8929_s4 = inlined_call_operand.vmem [shape: f32[32,32], index: 4, kind: input, shape index: {}]   ;;  %s8930_s5 = inlined_call_operand.vmem [shape: f32[32,1], index: 5, kind: input, shape index: {}]   ;;  %s8931_s6 = inlined_call_operand.hbm [shape: f32[2,32,256], index: 6, kind: output, shape index: {}]  }
   0x1   :  { %13 = vsyncpa [#allocation4 + $0x1], 0  ;;  %s6330_s21 = smov 0   ;;  %s6332_s22 = smov 0  }
   0x2   :  { %s6334_s23 = smov 0   ;;  %s6336_s24 = smov 0  }
   0x3 LB: > { %s6351_s25 = sadd.s32 4294967295, %s6286_s24   ;;  %s5119_s26 = sadd.s32 4294967294, %s6286_s24   ;;  %s6286_s24 = sphi %s6336_s24, %s9314_s24   ;;  %s6282_s23 = sphi %s6334_s23, %s9313_s23   ;;  %s6278_s22 = sphi %s6332_s22, %s9312_s22   ;;  %s6274_s21 = sphi %s6330_s21, %s9311_s21  }
   0x4   : > { %s6355_s27 = sadd.s32 1, %s6286_s24   ;;  %s157_s28 = sadd.s32 1, %s6282_s23 }
   0x5   : > { %s154_s29 = ssub.s32 %s6286_s24, %s6355_s27  ;;  %p167_p0 = scmp.ne.s32.totalorder %s6282_s23, %s6278_s22 }
   0x6   : > { %p155_p1 = scmp.eq.s32.totalorder %s154_s29, 0  ;;  %p168_p2 = scmp.eq.s32.totalorder %s6351_s25, 1 }
   0x7   : > { %p173_p3 = scmp.ne.s32.totalorder %s6278_s22, %s6274_s21  ;;  %p174_p4 = scmp.eq.s32.totalorder %s5119_s26, 1 }
   0x8   : > { %s6366_s30 = scalar_select %p155_p1, %s6282_s23, %s157_s28  }
   0x9   : > { %p6368_p5 = por %p168_p2, %p167_p0  ;;  %p6372_p6 = por %p174_p4, %p173_p3 }
   0xa   : > { %p5122_p7 = scmp.ge.s32.totalorder %s6286_s24, 1  ;;  %p215_p8 = scmp.lt.s32.totalorder %s6286_s24, 3 }
   0xc   : > { %p216_p9 = pnand %p5122_p7, %p215_p8 }
   0xe   : > { %219 = sbr.rel (%p216_p9) target bundleno = 3505 (0xdb1), region = 44 }
  0x15   : > { %p245_p10 = scmp.lt.s32.totalorder %s6351_s25, 1  ;;  %v444_v0 = vlaneseq  ;;  %v8932_v1 = vmov 0.0   ;;  %v8936_v2 = vmov 0.0|0.0   ;;  %v6394_v7 = vld [vmem:[%s8928_s3] sm:$0x3]  ;;  %vm270_vm10 = vcmask 261120  }
  0x16   : > { %371 = vmatprep.mubr.f32.mxu0 %v8932_v1  ;;  %5549 = vmatprep.subr.bf16.mxu1 %v8936_v2  ;;  %v6405_v9 = vld [vmem:[%s8928_s3 + $0x2] sm:$0x3]  ;;  %v259_v47 = vld [vmem:[%s8926_s1 + $0x8] sm:$0xff]  ;;  %v260_v56 = vld [vmem:[%s8926_s1 + $0x10] sm:$0xff]  ;;  %s242_s18 = sand.u32 1, %s6278_s22   ;;  %s5540_s28 = sshll.u32 %s6351_s25, 10 }
  0x17   : > { %s246_s9 = scalar_select %p245_p10, %s6351_s25, 1  ;;  %v6382_v3 = vshrl.u32 %v444_v0, 7  ;;  %v6384_v4 = vand.u32 127, %v444_v0  ;;  %v258_v39 = vld [vmem:[%s8926_s1] sm:$0xff]  ;;  %v261_v0 = vld [vmem:[%s8926_s1 + $0x18] sm:$0xff] }
  0x18   : > { %s5123_s19 = sshll.u32 %s242_s18, 6  ;;  %s8884_s11 = scalar_lea.sflag [#allocation4], %s242_s18 }
  0x19   : > { %8960 = vst [vmem:[#allocation6_spill] sm:$0xff] %v6384_v4  ;;  %s5539_s10 = sshll.u32 %s246_s9, 6  ;;  %v446_v5 = vadd.s32 8, %v6382_v3  ;;  %v6389_v6 = vsub.s32 %v6382_v3, %v6384_v4  ;;  %v6397_v8 = vsub.s32 0, %v6382_v3  ;;  %v447_v10 = vadd.s32 16, %v6382_v3  ;;  %s244_s20 = scalar_lea.vmem [#allocation3], %s5123_s19 }
  0x1a   : > { %s249_s15 = scalar_lea.vmem %s8925_s0, %s5539_s10  ;;  %v448_v11 = vadd.s32 24, %v6382_v3  ;;  %v449_v17 = vadd.s32 32, %v6382_v3  ;;  %v450_v23 = vadd.s32 40, %v6382_v3  ;;  %v451_v34 = vadd.s32 48, %v6382_v3  ;;  %s5057_s26 = sshll.u32 %s244_s20, 4  ;;  %s8877_s26 = int_to_ptr.vmem [resolvable:$true] %s5057_s26 }
  0x1b   : > { %v251_v12 = vld [vmem:[%s249_s15 + $0x8] sm:$0xff]  ;;  %v253_v13 = vld [vmem:[%s249_s15 + $0x18] sm:$0xff]  ;;  %v250_v14 = vld [vmem:[%s249_s15] sm:$0xff]  ;;  %v6410_v15 = vsub.s32 %v446_v5, %v6384_v4  ;;  %vm545_vm0 = vcmp.eq.s32.totalorder %v6389_v6, 4294967279  ;;  %v613_v16 = vrot.slane %v6394_v7, %v6397_v8  ;;  %v6417_v22 = vsub.s32 %v447_v10, %v6384_v4  ;;  %s8882_s10 = scalar_lea.hbm %s8931_s6, %s5540_s28  ;;  %s6224_s12 = scalar_lea.vmem %s8877_s26, 1024 }
  0x1c   : > { %v5541_v18 = vpack.c.bf16 %v253_v13, %v251_v12  ;;  %v252_v19 = vld [vmem:[%s249_s15 + $0x10] sm:$0xff]  ;;  %v255_v20 = vld [vmem:[%s249_s15 + $0x28] sm:$0xff]  ;;  %v257_v21 = vld [vmem:[%s249_s15 + $0x38] sm:$0xff]  ;;  %v1011_v29 = vrot.slane %v6405_v9, %v6397_v8  ;;  %v6429_v31 = vsub.s32 %v448_v11, %v6384_v4  ;;  %v6433_v32 = vsub.s32 %v449_v17, %v6384_v4  ;;  %p6225_p11 = scmp.ne.s32.totalorder %s8877_s26, %s6224_s12  ;;  %s6292_s25 = smov [#allocation3]  }
  0x1d   : > { %v5543_v24 = vpack.c.bf16 %v252_v19, %v250_v14  ;;  %v5545_v25 = vpack.c.bf16 %v257_v21, %v255_v20  ;;  %v254_v26 = vld [vmem:[%s249_s15 + $0x20] sm:$0xff]  ;;  %v256_v27 = vld [vmem:[%s249_s15 + $0x30] sm:$0xff]  ;;  %vm547_vm1 = vcmp.eq.s32.totalorder %v6410_v15, 4294967279  ;;  %v6421_v28 = vpack.c.bf16 %v613_v16, %v613_v16  ;;  %s6228_s13 = sshll.u32 %s6292_s25, 4  ;;  %s6229_s13 = int_to_ptr.vmem [resolvable:$false] %s6228_s13 }
  0x1e   : > { %5542 = vmatprep.subr.bf16.mxu0 %v5541_v18  ;;  %vm5551_vm2 = vmpackc.low %vm547_vm1, %vm545_vm0  ;;  %v5547_v30 = vpack.c.bf16 %v256_v27, %v254_v26  ;;  %vm549_vm3 = vcmp.eq.s32.totalorder %v6417_v22, 4294967279  ;;  %v6437_v33 = vsub.s32 %v450_v23, %v6384_v4  ;;  %v452_v35 = vadd.s32 56, %v6382_v3  ;;  %v262_v17 = vld [vmem:[%s8926_s1 + $0x20] sm:$0xff]  ;;  %v263_v27 = vld [vmem:[%s8926_s1 + $0x28] sm:$0xff]  ;;  %p6226_p12 = pnand %p6225_p11, %p6368_p5  ;;  %s6230_s14 = scalar_lea.vmem %s6229_s13, 2048 }
  0x1f   : > { %5544 = vmatpush1.bf16.msra.mxu0 %v5543_v24  ;;  %5552 = vmatpush1.bf16.msk.msra.mxu1 %vm5551_vm2, %v6421_v28  ;;  %vm943_vm4 = vcmp.eq.s32.totalorder %v6389_v6, 4294967280  ;;  %vm945_vm5 = vcmp.eq.s32.totalorder %v6410_v15, 4294967280  ;;  %vm551_vm6 = vcmp.eq.s32.totalorder %v6429_v31, 4294967279  ;;  %v453_v36 = vadd.s32 64, %v6382_v3  ;;  %v268_v14 = vld [vmem:[%s8926_s1 + $0x50] sm:$0xff]  ;;  %v269_v23 = vld [vmem:[%s8926_s1 + $0x58] sm:$0xff]  ;;  %p6231_p0 = scmp.lt.s32.totalorder %s8877_s26, %s6229_s13  ;;  %p6232_p1 = scmp.lt.s32.totalorder %s6230_s14, %s6224_s12 }
  0x20   : > { %5546 = vmatprep.subr.bf16.mxu0 %v5545_v25  ;;  %5553 = vmatprep.subr.bf16.mxu1 %v8936_v2  ;;  %vm5555_vm7 = vmpackc.low %vm551_vm6, %vm549_vm3  ;;  %vm553_vm8 = vcmp.eq.s32.totalorder %v6433_v32, 4294967279  ;;  %vm555_vm9 = vcmp.eq.s32.totalorder %v6437_v33, 4294967279  ;;  %v6448_v37 = vsub.s32 %v451_v34, %v6384_v4  ;;  %v6451_v38 = vsub.s32 %v452_v35, %v6384_v4  ;;  %v264_v35 = vld [vmem:[%s8926_s1 + $0x30] sm:$0xff]  ;;  %v821_v24 = vld [vmem:[%s8927_s2] sm:$0xff]  ;;  %p6227_p13 = pneg %p6226_p12 }
  0x21   : > { %v6456_v40 = vpack.c.bf16 %v1011_v29, %v1011_v29  ;;  %v454_v41 = vadd.s32 72, %v6382_v3  ;;  %vm5613_vm11 = vmpackc.low %vm945_vm5, %vm943_vm4  ;;  %vm947_vm12 = vcmp.eq.s32.totalorder %v6417_v22, 4294967280  ;;  %vm949_vm13 = vcmp.eq.s32.totalorder %v6429_v31, 4294967280  ;;  %p6233_p2 = por %p6232_p1, %p6231_p0 }
  0x22   : > { %vm6470_vm14 = vmpackc.low %vm555_vm9, %vm553_vm8  ;;  %v6475_v43 = vsub.s32 %v453_v36, %v6384_v4  ;;  %v455_v44 = vadd.s32 80, %v6382_v3  ;;  %vm557_vm15 = vcmp.eq.s32.totalorder %v6448_v37, 4294967279  ;;  %vm559_vm0 = vcmp.eq.s32.totalorder %v6451_v38, 4294967279 }
  0x23   : > { %5548 = vmatpush1.bf16.msra.mxu0 %v5547_v30  ;;  %5556 = vmatpush1.bf16.msk.msra.mxu1 %vm5555_vm7, %v6421_v28  ;;  %v6482_v45 = vsub.s32 %v454_v41, %v6384_v4  ;;  %v456_v46 = vadd.s32 88, %v6382_v3  ;;  %v458_v48 = vadd.s32 104, %v6382_v3  ;;  %v6492_v49 = vadd.s32 128, %v6384_v4  ;;  %vm5617_vm1 = vmpackc.low %vm949_vm13, %vm947_vm12  ;;  %p6234_p3 = pnand %p6233_p2, %p6227_p13 }
  0x24   : > { %5611 = vmatprep.subr.bf16.mxu0 %v8936_v2  ;;  %5557 = vmatprep.subr.bf16.mxu1 %v8936_v2  ;;  %v6495_v50 = vsub.s32 1, %v6382_v3  ;;  %vm951_vm2 = vcmp.eq.s32.totalorder %v6433_v32, 4294967280  ;;  %vm953_vm3 = vcmp.eq.s32.totalorder %v6437_v33, 4294967280  ;;  %vm6512_vm4 = vmpackc.low %vm559_vm0, %vm557_vm15  ;;  %vm561_vm5 = vcmp.eq.s32.totalorder %v6475_v43, 4294967279 }
  0x25   : > { %v6518_v52 = vsub.s32 %v455_v44, %v6384_v4  ;;  %vm563_vm6 = vcmp.eq.s32.totalorder %v6482_v45, 4294967279  ;;  %v6523_v53 = vsub.s32 %v456_v46, %v6384_v4  ;;  %v457_v54 = vadd.s32 96, %v6382_v3  ;;  %vm5621_vm7 = vmpackc.low %vm953_vm3, %vm951_vm2  ;;  %v265_v46 = vld [vmem:[%s8926_s1 + $0x38] sm:$0xff] }
  0x26   : > { %5126 = vmatmul.mubr.msk.f32.vlgmr.msra.gmra.mrb[0].mxu0 %vm270_vm10, %v258_v39  ;;  %v6527_v55 = vadd.s32 112, %v6382_v3  ;;  %v507_v57 = vsub.s32 %v458_v48, %v6492_v49  ;;  %v6536_v58 = vadd.s32 120, %v6382_v3  ;;  %vm955_vm8 = vcmp.eq.s32.totalorder %v6448_v37, 4294967280 }
  0x27   : > { %377 = vmatprep.mubr.f32.mxu0 %v8932_v1  ;;  %5614 = vmatpush1.bf16.msk.msra.mxu0 %vm5613_vm11, %v6456_v40  ;;  %vm957_vm9 = vcmp.eq.s32.totalorder %v6451_v38, 4294967280  ;;  %vm6553_vm11 = vmpackc.low %vm563_vm6, %vm561_vm5  ;;  %vm565_vm12 = vcmp.eq.s32.totalorder %v6518_v52, 4294967279  ;;  %v617_v60 = vrot.slane %v6394_v7, %v6495_v50  ;;  %vm567_vm13 = vcmp.eq.s32.totalorder %v6523_v53, 4294967279 }
  0x28   : > { %5615 = vmatprep.subr.bf16.mxu0 %v8936_v2  ;;  %5560 = vmatpush1.bf16.msk.msra.mxu1 %vm6470_vm14, %v6421_v28  ;;  %v6563_v61 = vsub.s32 %v458_v48, %v6384_v4  ;;  %v6566_v62 = vsub.s32 %v457_v54, %v6384_v4  ;;  %v6570_v63 = vsub.s32 %v6527_v55, %v6492_v49  ;;  %vm572_vm14 = vcmp.eq.s32.totalorder %v507_v57, 4294967279  ;;  %vm6592_vm15 = vmpackc.low %vm957_vm9, %vm955_vm8 }
  0x29   : > { %5561 = vmatprep.subr.bf16.mxu1 %v8936_v2  ;;  %v6579_v5 = vsub.s32 %v6536_v58, %v6492_v49  ;;  %v6582_v7 = vadd.s32 128, %v6382_v3  ;;  %v6585_v10 = vadd.s32 136, %v6382_v3  ;;  %vm959_vm0 = vcmp.eq.s32.totalorder %v6475_v43, 4294967280  ;;  %vm6606_vm2 = vmpackc.low %vm567_vm13, %vm565_vm12 }
  0x2a   : > { %5127 = vmatmul.mubr.msk.f32.gmra.mrb[2].mxu0 %vm270_vm10, %v259_v47  ;;  %v5573_v13 = vpack.c.bf16 %v617_v60, %v8932_v1  ;;  %vm6290_vm3 = vmmov 1   ;;  %vm569_vm5 = vcmp.eq.s32.totalorder %v6566_v62, 4294967279  ;;  %vm571_vm6 = vcmp.eq.s32.totalorder %v6563_v61, 4294967279 }
  0x2b   : > { %383 = vmatprep.mubr.f32.mxu0 %v8932_v1  ;;  %5618 = vmatpush1.bf16.msk.msra.mxu0 %vm5617_vm1, %v6456_v40  ;;  %8967 = vst [vmem:[#allocation7_spill] sm:$0xff] %v6582_v7  ;;  %8968 = vst [vmem:[#allocation8_spill] sm:$0xff] %v6585_v10  ;;  %vm961_vm1 = vcmp.eq.s32.totalorder %v6482_v45, 4294967280  ;;  %v6621_v16 = vadd.s32 144, %v6382_v3  ;;  %vm576_vm8 = vcmp.eq.s32.totalorder %v6579_v5, 4294967279  ;;  %v6633_v18 = vsub.s32 %v6582_v7, %v6492_v49 }
  0x2c   : > { %5619 = vmatprep.subr.bf16.mxu0 %v8936_v2  ;;  %5564 = vmatpush1.bf16.msk.msra.mxu1 %vm6512_vm4, %v6421_v28  ;;  %vm6613_vm4 = vmpackc.low %vm572_vm14, %vm6290_vm3  ;;  %v6637_v19 = vsub.s32 %v6585_v10, %v6492_v49  ;;  %v464_v20 = vadd.s32 152, %v6382_v3  ;;  %vm965_vm12 = vcmp.eq.s32.totalorder %v6523_v53, 4294967280  ;;  %v6652_v21 = vpack.c.bf16 %v617_v60, %v617_v60 }
  0x2d   : > { %5565 = vmatprep.subr.bf16.mxu1 %v8936_v2  ;;  %8975 = vst [vmem:[#allocation9_spill] sm:$0xff] %v6621_v16  ;;  %vm5629_vm9 = vmpackc.low %vm961_vm1, %vm959_vm0  ;;  %v6671_v25 = vsub.s32 %v6621_v16, %v6492_v49  ;;  %v465_v26 = vadd.s32 160, %v6382_v3  ;;  %v466_v30 = vadd.s32 168, %v6382_v3  ;;  %v1015_v34 = vrot.slane %v6405_v9, %v6495_v50  ;;  %v6875_v9 = vld [vmem:[%s8928_s3 + $0x6] sm:$0x3] }
  0x2e   : > { %5128 = vmatmul.mubr.msk.f32.gmra.mrb[4].mxu0 %vm270_vm10, %v260_v56  ;;  %vm6658_vm13 = vmpackc.low %vm571_vm6, %vm569_vm5  ;;  %vm580_vm0 = vcmp.eq.s32.totalorder %v6637_v19, 4294967279  ;;  %v6682_v29 = vsub.s32 %v464_v20, %v6492_v49  ;;  %vm972_vm5 = vcmp.eq.s32.totalorder %v6570_v63, 4294967280  ;;  %vm974_vm6 = vcmp.eq.s32.totalorder %v6579_v5, 4294967280  ;;  %v266_v56 = vld [vmem:[%s8926_s1 + $0x40] sm:$0xff] }
  0x2f   : > { %389 = vmatprep.mubr.f32.mxu0 %v8932_v1  ;;  %5622 = vmatpush1.bf16.msk.msra.mxu0 %vm5621_vm7, %v6456_v40  ;;  %vm574_vm7 = vcmp.eq.s32.totalorder %v6570_v63, 4294967279  ;;  %v6718_v36 = vsub.s32 %v466_v30, %v6492_v49  ;;  %v467_v39 = vadd.s32 176, %v6382_v3  ;;  %v468_v41 = vadd.s32 184, %v6382_v3  ;;  %v5204_v30 = vld [vmem:[%s8927_s2 + $0x80] sm:$0xff] }
  0x30   : > { %5623 = vmatprep.subr.bf16.mxu0 %v8936_v2  ;;  %5568 = vmatpush1.bf16.msk.msra.mxu1 %vm6553_vm11, %v6421_v28  ;;  %vm963_vm11 = vcmp.eq.s32.totalorder %v6518_v52, 4294967280  ;;  %vm6665_vm14 = vmpackc.low %vm576_vm8, %vm574_vm7  ;;  %vm582_vm8 = vcmp.eq.s32.totalorder %v6671_v25, 4294967279  ;;  %v6722_v42 = vpack.c.bf16 %v1015_v34, %v1015_v34  ;;  %v469_v44 = vadd.s32 192, %v6382_v3  ;;  %v6870_v34 = vld [vmem:[%s8928_s3 + $0x4] sm:$0x3] }
  0x31   : > { %5569 = vmatprep.subr.bf16.mxu1 %v8936_v2  ;;  %vm5633_vm1 = vmpackc.low %vm965_vm12, %vm963_vm11  ;;  %v6751_v47 = vsub.s32 %v467_v39, %v6492_v49  ;;  %v6754_v48 = vsub.s32 %v468_v41, %v6492_v49  ;;  %v470_v51 = vadd.s32 200, %v6382_v3  ;;  %v471_v54 = vadd.s32 208, %v6382_v3 }
  0x32   : > { %5129 = vmatmul.mubr.msk.f32.gmra.mrb[6].mxu0 %vm270_vm10, %v261_v0  ;;  %vm5640_vm12 = vmpackc.low %vm974_vm6, %vm972_vm5  ;;  %vm982_vm5 = vcmp.eq.s32.totalorder %v6682_v29, 4294967280  ;;  %v472_v59 = vadd.s32 216, %v6382_v3  ;;  %v267_v0 = vld [vmem:[%s8926_s1 + $0x48] sm:$0xff]  ;;  %v473_v12 = vadd.s32 224, %v6382_v3  ;;  %v1809_v39 = vrot.slane %v6875_v9, %v6397_v8 }
  0x33   : > { %395 = vmatprep.mubr.f32.mxu0 %v8932_v1  ;;  %5626 = vmatpush1.bf16.msk.msra.mxu0 %vm6592_vm15, %v6456_v40  ;;  %vm578_vm15 = vcmp.eq.s32.totalorder %v6633_v18, 4294967279  ;;  %v6777_v57 = vsub.s32 %v470_v51, %v6492_v49  ;;  %v6788_v60 = vsub.s32 %v471_v54, %v6492_v49  ;;  %v8995_v16 = vmov 0.0  }
  0x34   : > { %5627 = vmatprep.subr.bf16.mxu0 %v8936_v2  ;;  %5572 = vmatpush1.bf16.msk.msra.mxu1 %vm6606_vm2, %v6421_v28  ;;  %vm967_vm2 = vcmp.eq.s32.totalorder %v6566_v62, 4294967280  ;;  %vm6703_vm7 = vmpackc.low %vm580_vm0, %vm578_vm15  ;;  %v6797_v11 = vsub.s32 %v472_v59, %v6492_v49 }
  0x35   : > { %5575 = vmatprep.subr.msk.bf16.mxu1 %vm6613_vm4, %v5573_v13  ;;  %vm969_vm4 = vcmp.eq.s32.totalorder %v6563_v61, 4294967280  ;;  %8983 = vst [vmem:[#allocation11_spill] sm:$0xff] %v6777_v57  ;;  %v474_v13 = vadd.s32 232, %v6382_v3 }
  0x36   : > { %5130 = vmatmul.mubr.msk.f32.gmra.mrb[8].mxu0 %vm270_vm10, %v262_v17  ;;  %vm5637_vm11 = vmpackc.low %vm969_vm4, %vm967_vm2  ;;  %vm980_vm4 = vcmp.eq.s32.totalorder %v6671_v25, 4294967280  ;;  %8984 = vst [vmem:[#allocation12_spill] sm:$0xff] %v6797_v11  ;;  %v6817_v17 = vsub.s32 %v473_v12, %v6492_v49 }
  0x37   : > { %401 = vmatprep.mubr.f32.mxu0 %v8932_v1  ;;  %5630 = vmatpush1.bf16.msk.msra.mxu0 %vm5629_vm9, %v6456_v40  ;;  %vm584_vm9 = vcmp.eq.s32.totalorder %v6682_v29, 4294967279  ;;  %v6820_v20 = vsub.s32 %v474_v13, %v6492_v49 }
  0x38   : > { %5631 = vmatprep.subr.bf16.mxu0 %v8936_v2  ;;  %5578 = vmatpush1.bf16.msk.msra.mxu1 %vm6658_vm13, %v6421_v28  ;;  %v6709_v28 = vsub.s32 %v465_v26, %v6492_v49  ;;  %vm976_vm13 = vcmp.eq.s32.totalorder %v6633_v18, 4294967280  ;;  %vm5588_vm15 = vmpackc.low %vm584_vm9, %vm582_vm8  ;;  %vm592_vm8 = vcmp.eq.s32.totalorder %v6754_v48, 4294967279  ;;  %v5200_v26 = vld [vmem:[%s8927_s2 + $0x60] sm:$0xff] }
  0x39   : > { %5581 = vmatprep.subr.msk.bf16.mxu1 %vm6665_vm14, %v6652_v21  ;;  %vm978_vm14 = vcmp.eq.s32.totalorder %v6637_v19, 4294967280  ;;  %vm5648_vm9 = vmpackc.low %vm982_vm5, %vm980_vm4  ;;  %vm598_vm5 = vcmp.eq.s32.totalorder %v6788_v60, 4294967279  ;;  %8985 = vst [vmem:[#allocation13_spill] sm:$0xff] %v6820_v20 }
  0x3a   : > { %5131 = vmatmul.mubr.msk.f32.gmra.mrb[10].mxu0 %vm270_vm10, %v263_v27  ;;  %vm586_vm0 = vcmp.eq.s32.totalorder %v6709_v28, 4294967279  ;;  %vm5644_vm2 = vmpackc.low %vm978_vm14, %vm976_vm13  ;;  %v825_v27 = vld [vmem:[%s8927_s2 + $0x20] sm:$0xff] }
  0x3b   : > { %407 = vmatprep.mubr.f32.mxu0 %v8932_v1  ;;  %5634 = vmatpush1.bf16.msk.msra.mxu0 %vm5633_vm1, %v6456_v40  ;;  %vm588_vm1 = vcmp.eq.s32.totalorder %v6718_v36, 4294967279 }
  0x3c   : > { %5635 = vmatprep.subr.bf16.mxu0 %v8936_v2  ;;  %5582 = vmatpush1.bf16.msra.mxu1 %v8936_v2  ;;  %vm5592_vm6 = vmpackc.low %vm588_vm1, %vm586_vm0  ;;  %vm988_vm1 = vcmp.eq.s32.totalorder %v6751_v47, 4294967280 }
  0x3d   : > { %5585 = vmatprep.subr.msk.bf16.mxu1 %vm6703_vm7, %v6652_v21  ;;  %vm590_vm7 = vcmp.eq.s32.totalorder %v6751_v47, 4294967279 }
  0x3e   : > { %5132 = vmatmul.mubr.msk.f32.gmra.mrb[12].mxu0 %vm270_vm10, %v264_v35  ;;  %vm5596_vm13 = vmpackc.low %vm592_vm8, %vm590_vm7  ;;  %v6879_v35 = vrot.slane %v6870_v34, %v6397_v8 }
  0x3f   : > { %413 = vmatprep.mubr.f32.mxu0 %v8932_v1  ;;  %5638 = vmatpush1.bf16.msk.msra.mxu0 %vm5637_vm11, %v6456_v40  ;;  %v6766_v40 = vsub.s32 %v469_v44, %v6492_v49  ;;  %vm984_vm11 = vcmp.eq.s32.totalorder %v6709_v28, 4294967280  ;;  %v6893_v44 = vpack.c.bf16 %v1809_v39, %v1809_v39 }
  0x40   : > { %5641 = vmatprep.subr.msk.bf16.mxu0 %vm5640_vm12, %v6722_v42  ;;  %5586 = vmatpush1.bf16.msra.mxu1 %v8936_v2  ;;  %vm986_vm12 = vcmp.eq.s32.totalorder %v6718_v36, 4294967280 }
  0x41   : > { %5589 = vmatprep.subr.msk.bf16.mxu1 %vm5588_vm15, %v6652_v21  ;;  %8982 = vst [vmem:[#allocation10_spill] sm:$0xff] %v6766_v40  ;;  %vm594_vm14 = vcmp.eq.s32.totalorder %v6766_v40, 4294967279  ;;  %vm596_vm15 = vcmp.eq.s32.totalorder %v6777_v57, 4294967279  ;;  %vm5652_vm0 = vmpackc.low %vm986_vm12, %vm984_vm11  ;;  %vm992_vm8 = vcmp.eq.s32.totalorder %v6766_v40, 4294967280  ;;  %vm602_vm12 = vcmp.eq.s32.totalorder %v6817_v17, 4294967279 }
  0x42   : > { %5133 = vmatmul.mubr.msk.f32.gmra.mrb[14].mxu0 %vm270_vm10, %v265_v46  ;;  %vm5600_vm4 = vmpackc.low %vm596_vm15, %vm594_vm14  ;;  %vm996_vm15 = vcmp.eq.s32.totalorder %v6788_v60, 4294967280 }
  0x43   : > { %419 = vmatprep.mubr.f32.mxu0 %v8932_v1  ;;  %5642 = vmatpush1.bf16.msra.mxu0 %v8936_v2 }
  0x44   : > { %5645 = vmatprep.subr.msk.bf16.mxu0 %vm5644_vm2, %v6722_v42  ;;  %5590 = vmatpush1.bf16.msra.mxu1 %v8936_v2  ;;  %vm990_vm2 = vcmp.eq.s32.totalorder %v6754_v48, 4294967280 }
  0x45   : > { %5593 = vmatprep.subr.msk.bf16.mxu1 %vm5592_vm6, %v6652_v21  ;;  %vm600_vm6 = vcmp.eq.s32.totalorder %v6797_v11, 4294967279  ;;  %vm5656_vm7 = vmpackc.low %vm990_vm2, %vm988_vm1 }
  0x46   : > { %5134 = vmatmul.mubr.msk.f32.gmra.mrb[16].mxu0 %vm270_vm10, %v266_v56  ;;  %vm5604_vm11 = vmpackc.low %vm600_vm6, %vm598_vm5  ;;  %vm1002_vm5 = vcmp.eq.s32.totalorder %v6820_v20, 4294967280 }
  0x47   : > { %425 = vmatprep.mubr.f32.mxu0 %v8932_v1  ;;  %5646 = vmatpush1.bf16.msra.mxu0 %v8936_v2 }
  0x48   : > { %5649 = vmatprep.subr.msk.bf16.mxu0 %vm5648_vm9, %v6722_v42  ;;  %5594 = vmatpush1.bf16.msra.mxu1 %v8936_v2  ;;  %vm994_vm9 = vcmp.eq.s32.totalorder %v6777_v57, 4294967280 }
  0x49   : > { %5597 = vmatprep.subr.msk.bf16.mxu1 %vm5596_vm13, %v6652_v21  ;;  %vm604_vm13 = vcmp.eq.s32.totalorder %v6820_v20, 4294967279  ;;  %vm5660_vm14 = vmpackc.low %vm994_vm9, %vm992_vm8  ;;  %vm1344_vm8 = vcmp.eq.s32.totalorder %v6410_v15, 4294967281  ;;  %vm1741_vm9 = vcmp.eq.s32.totalorder %v6389_v6, 4294967295 }
  0x4a   : > { %5135 = vmatmul.mubr.msk.f32.gmra.mrb[18].mxu0 %vm270_vm10, %v267_v0  ;;  %vm5608_vm1 = vmpackc.low %vm604_vm13, %vm602_vm12 }
  0x4b   : > { %431 = vmatprep.mubr.f32.mxu0 %v8932_v1  ;;  %5650 = vmatpush1.bf16.msra.mxu0 %v8936_v2 }
  0x4c   : > { %5653 = vmatprep.subr.msk.bf16.mxu0 %vm5652_vm0, %v6722_v42  ;;  %5598 = vmatpush1.bf16.msra.mxu1 %v8936_v2  ;;  %vm998_vm0 = vcmp.eq.s32.totalorder %v6797_v11, 4294967280 }
  0x4d   : > { %5601 = vmatprep.subr.msk.bf16.mxu1 %vm5600_vm4, %v6652_v21  ;;  %vm5664_vm2 = vmpackc.low %vm998_vm0, %vm996_vm15  ;;  %vm1000_vm4 = vcmp.eq.s32.totalorder %v6817_v17, 4294967280  ;;  %vm1348_vm15 = vcmp.eq.s32.totalorder %v6429_v31, 4294967281  ;;  %vm1745_vm0 = vcmp.eq.s32.totalorder %v6417_v22, 4294967295 }
  0x4e   : > { %5136 = vmatmul.mubr.msk.f32.gmra.mrb[20].mxu0 %vm270_vm10, %v268_v14  ;;  %vm5668_vm6 = vmpackc.low %vm1002_vm5, %vm1000_vm4  ;;  %vm1350_vm5 = vcmp.eq.s32.totalorder %v6433_v32, 4294967281 }
  0x4f   : > { %437 = vmatprep.mubr.f32.mxu0 %v8932_v1  ;;  %5654 = vmatpush1.bf16.msra.mxu0 %v8936_v2 }
  0x50   : > { %5657 = vmatprep.subr.msk.bf16.mxu0 %vm5656_vm7, %v6722_v42  ;;  %5602 = vmatpush1.bf16.msra.mxu1 %v8936_v2  ;;  %vm1342_vm7 = vcmp.eq.s32.totalorder %v6389_v6, 4294967281 }
  0x51   : > { %5605 = vmatprep.subr.msk.bf16.mxu1 %vm5604_vm11, %v6652_v21  ;;  %vm1743_vm11 = vcmp.eq.s32.totalorder %v6410_v15, 4294967295  ;;  %vm5673_vm12 = vmpackc.low %vm1344_vm8, %vm1342_vm7  ;;  %vm1749_vm7 = vcmp.eq.s32.totalorder %v6433_v32, 4294967295  ;;  %vm1751_vm8 = vcmp.eq.s32.totalorder %v6437_v33, 4294967295 }
  0x52   : > { %5137 = vmatmul.mubr.msk.f32.gmra.mrb[22].mxu0 %vm270_vm10, %v269_v23  ;;  %vm5735_vm13 = vmpackc.low %vm1743_vm11, %vm1741_vm9  ;;  %v6971_v23 = vsub.s32 %v6527_v55, %v6384_v4  ;;  %v6989_v55 = vrot.slane %v6870_v34, %v6495_v50 }
  0x53   : > { %5658 = vmatpush1.bf16.msra.mxu0 %v8936_v2  ;;  %vm5743_vm11 = vmpackc.low %vm1751_vm8, %vm1749_vm7 }
  0x54   : > { %5661 = vmatprep.subr.msk.bf16.mxu0 %vm5660_vm14, %v6722_v42  ;;  %5606 = vmatpush1.bf16.msra.mxu1 %v8936_v2  ;;  %vm1346_vm14 = vcmp.eq.s32.totalorder %v6417_v22, 4294967281  ;;  %v7031_v39 = vpack.c.bf16 %v6989_v55, %v6989_v55 }
  0x55   : > { %5609 = vmatprep.subr.msk.bf16.mxu1 %vm5608_vm1, %v6652_v21  ;;  %v6291_v21 = vmov 0   ;;  %vm1747_vm1 = vcmp.eq.s32.totalorder %v6429_v31, 4294967295 }
  0x56   : > { %6175 = vset.pattern.permute.xlu1 %v6291_v21  ;;  %6174 = vset.pattern.permute.xlu0 %v6291_v21  ;;  %vm5739_vm4 = vmpackc.low %vm1747_vm1, %vm1745_vm0  ;;  %v6975_v21 = vsub.s32 %v6536_v58, %v6384_v4 }
  0x57   : > { %5662 = vmatpush1.bf16.msra.mxu0 %v8936_v2  ;;  %835 = vperm.xlu1 %6175, %v821_v24  }
  0x58   : > { %5665 = vmatprep.subr.msk.bf16.mxu0 %vm5664_vm2, %v6722_v42  ;;  %5610 = vmatpush1.bf16.msra.mxu1 %v8936_v2  ;;  %vm5677_vm2 = vmpackc.low %vm1348_vm15, %vm1346_vm14  ;;  %vm1753_vm14 = vcmp.eq.s32.totalorder %v6448_v37, 4294967295  ;;  %vm1755_vm15 = vcmp.eq.s32.totalorder %v6451_v38, 4294967295 }
  0x59   : > { %5671 = vmatprep.subr.bf16.mxu1 %v8936_v2  ;;  %855 = vperm.xlu0 %6174, %v825_v27   ;;  %vm5747_vm1 = vmpackc.low %vm1755_vm15, %vm1753_vm14  ;;  %vm1366_vm15 = vcmp.eq.s32.totalorder %v6566_v62, 4294967281  ;;  %v1813_v27 = vrot.slane %v6875_v9, %v6495_v50 }
  0x5b   : > { %5666 = vmatpush1.bf16.msra.mxu0 %v8936_v2  ;;  %1234 = vperm.xlu1 %6175, %v5200_v26   ;;  %v5761_v10 = vpack.c.bf16 %v1813_v27, %v8995_v16 }
  0x5c   : > { %5669 = vmatprep.subr.msk.bf16.mxu0 %vm5668_vm6, %v6722_v42  ;;  %v6891_v42 = vpack.c.bf16 %v6879_v35, %v6879_v35  ;;  %vm1352_vm6 = vcmp.eq.s32.totalorder %v6437_v33, 4294967281 }
  0x5d   : > { %1254 = vperm.xlu0 %6174, %v5204_v30   ;;  %vm5681_vm9 = vmpackc.low %vm1352_vm6, %vm1350_vm5  ;;  %vm1757_vm5 = vcmp.eq.s32.totalorder %v6475_v43, 4294967295  ;;  %vm1759_vm6 = vcmp.eq.s32.totalorder %v6482_v45, 4294967295 }
  0x5e   : > { %vm5751_vm8 = vmpackc.low %vm1759_vm6, %vm1757_vm5  ;;  %vm1371_vm5 = vcmp.eq.s32.totalorder %v6570_v63, 4294967281  ;;  %vm1373_vm6 = vcmp.eq.s32.totalorder %v6579_v5, 4294967281  ;;  %v5291_v63 = vld [vmem:[%s8927_s2 + $0x120] sm:$0xff] }
  0x5f   : > { %5670 = vmatpush1.bf16.msra.mxu0 %v8936_v2 }
  0x60   : > { %5733 = vmatprep.subr.bf16.mxu0 %v8936_v2 }
  0xf9   : > { %v6887_v41 = vpop.f32.mrb[0].mxu0 }
  0xfa   : > { %v6895_v46 = vpop.f32.mrb[1].mxu0 }
  0xfb   : > { %8986 = vst [vmem:[#allocation14_spill] sm:$0xff] %v6895_v46  ;;  %748 = vmatprep.mubr.f32.mxu1 %v6895_v46  ;;  %1146 = vmatprep.mubr.f32.mxu0 %v6895_v46 }
  0xfc   : > { %749 = vmatmul.mubr.f32.vlgmr.msra.gmra.mrb[0].mxu1 %v6887_v41  ;;  %1147 = vmatmul.mubr.f32.vlgmr.msra.gmra.mrb[24].mxu0 %v6887_v41 }
  0xfd   : > { %5674 = vmatpush1.bf16.msk.msra.mxu1 %vm5673_vm12, %v6891_v42  ;;  %5736 = vmatpush1.bf16.msk.msra.mxu0 %vm5735_vm13, %v6893_v44  ;;  %v6907_v51 = vpop.f32.mrb[2].mxu0  ;;  %vm1354_vm12 = vcmp.eq.s32.totalorder %v6448_v37, 4294967281  ;;  %vm1356_vm13 = vcmp.eq.s32.totalorder %v6451_v38, 4294967281 }
  0xfe   : > { %v6909_v54 = vpop.f32.mrb[3].mxu0  ;;  %5675 = vmatprep.subr.bf16.mxu1 %v8936_v2  ;;  %5737 = vmatprep.subr.bf16.mxu0 %v8936_v2  ;;  %vm5685_vm0 = vmpackc.low %vm1356_vm13, %vm1354_vm12  ;;  %vm1761_vm12 = vcmp.eq.s32.totalorder %v6518_v52, 4294967295  ;;  %vm1763_vm13 = vcmp.eq.s32.totalorder %v6523_v53, 4294967295 }
  0xff   : > { %754 = vmatprep.mubr.f32.mxu1 %v6909_v54  ;;  %1152 = vmatprep.mubr.f32.mxu0 %v6909_v54 }
 0x100   : > { %755 = vmatmul.mubr.f32.gmra.mrb[2].mxu1 %v6907_v51  ;;  %1153 = vmatmul.mubr.f32.gmra.mrb[26].mxu0 %v6907_v51 }
 0x101   : > { %5678 = vmatpush1.bf16.msk.msra.mxu1 %vm5677_vm2, %v6891_v42  ;;  %5740 = vmatpush1.bf16.msk.msra.mxu0 %vm5739_vm4, %v6893_v44  ;;  %v6923_v56 = vpop.f32.mrb[4].mxu0  ;;  %vm1358_vm2 = vcmp.eq.s32.totalorder %v6475_v43, 4294967281  ;;  %vm1360_vm4 = vcmp.eq.s32.totalorder %v6482_v45, 4294967281 }
 0x102   : > { %v6925_v59 = vpop.f32.mrb[5].mxu0  ;;  %5679 = vmatprep.subr.bf16.mxu1 %v8936_v2  ;;  %5741 = vmatprep.subr.bf16.mxu0 %v8936_v2  ;;  %vm5689_vm7 = vmpackc.low %vm1360_vm4, %vm1358_vm2  ;;  %vm1765_vm2 = vcmp.eq.s32.totalorder %v6566_v62, 4294967295  ;;  %vm1767_vm4 = vcmp.eq.s32.totalorder %v6563_v61, 4294967295 }
 0x103   : > { %760 = vmatprep.mubr.f32.mxu1 %v6925_v59  ;;  %1158 = vmatprep.mubr.f32.mxu0 %v6925_v59 }
 0x104   : > { %761 = vmatmul.mubr.f32.gmra.mrb[4].mxu1 %v6923_v56  ;;  %1159 = vmatmul.mubr.f32.gmra.mrb[28].mxu0 %v6923_v56 }
 0x105   : > { %5682 = vmatpush1.bf16.msk.msra.mxu1 %vm5681_vm9, %v6891_v42  ;;  %5744 = vmatpush1.bf16.msk.msra.mxu0 %vm5743_vm11, %v6893_v44  ;;  %v6939_v0 = vpop.f32.mrb[6].mxu0  ;;  %vm1362_vm9 = vcmp.eq.s32.totalorder %v6518_v52, 4294967281  ;;  %vm1364_vm11 = vcmp.eq.s32.totalorder %v6523_v53, 4294967281 }
 0x106   : > { %v6941_v12 = vpop.f32.mrb[7].mxu0  ;;  %5683 = vmatprep.subr.bf16.mxu1 %v8936_v2  ;;  %5745 = vmatprep.subr.bf16.mxu0 %v8936_v2  ;;  %vm6981_vm14 = vmpackc.low %vm1364_vm11, %vm1362_vm9  ;;  %vm1370_vm11 = vcmp.eq.s32.totalorder %v6971_v23, 4294967281 }
 0x107   : > { %766 = vmatprep.mubr.f32.mxu1 %v6941_v12  ;;  %1164 = vmatprep.mubr.f32.mxu0 %v6941_v12  ;;  %vm7024_vm9 = vmpackc.low %vm1767_vm4, %vm1765_vm2  ;;  %vm1774_vm4 = vcmp.eq.s32.totalorder %v6633_v18, 4294967295 }
 0x108   : > { %767 = vmatmul.mubr.f32.gmra.mrb[6].mxu1 %v6939_v0  ;;  %1165 = vmatmul.mubr.f32.gmra.mrb[30].mxu0 %v6939_v0  ;;  %vm7058_vm2 = vmpackc.low %vm6290_vm3, %vm1370_vm11  ;;  %vm1381_vm11 = vcmp.eq.s32.totalorder %v6682_v29, 4294967281 }
 0x109   : > { %5686 = vmatpush1.bf16.msk.msra.mxu1 %vm5685_vm0, %v6891_v42  ;;  %5748 = vmatpush1.bf16.msk.msra.mxu0 %vm5747_vm1, %v6893_v44  ;;  %v6955_v13 = vpop.f32.mrb[8].mxu0  ;;  %vm1368_vm0 = vcmp.eq.s32.totalorder %v6563_v61, 4294967281  ;;  %vm5755_vm1 = vmpackc.low %vm1763_vm13, %vm1761_vm12  ;;  %vm1769_vm13 = vcmp.eq.s32.totalorder %v6971_v23, 4294967295 }
 0x10a   : > { %v6957_v14 = vpop.f32.mrb[9].mxu0  ;;  %5687 = vmatprep.subr.bf16.mxu1 %v8936_v2  ;;  %5749 = vmatprep.subr.bf16.mxu0 %v8936_v2  ;;  %vm7039_vm12 = vmpackc.low %vm1373_vm6, %vm1371_vm5  ;;  %vm1776_vm5 = vcmp.eq.s32.totalorder %v6637_v19, 4294967295 }
 0x10b   : > { %772 = vmatprep.mubr.f32.mxu1 %v6957_v14  ;;  %1170 = vmatprep.mubr.f32.mxu0 %v6957_v14 }
 0x10c   : > { %773 = vmatmul.mubr.f32.gmra.mrb[8].mxu1 %v6955_v13  ;;  %1171 = vmatmul.mubr.f32.gmra.mrb[32].mxu0 %v6955_v13 }
 0x10d   : > { %5690 = vmatpush1.bf16.msk.msra.mxu1 %vm5689_vm7, %v6891_v42  ;;  %5752 = vmatpush1.bf16.msk.msra.mxu0 %vm5751_vm8, %v6893_v44  ;;  %v6979_v24 = vpop.f32.mrb[10].mxu0  ;;  %vm7013_vm7 = vmpackc.low %vm1368_vm0, %vm1366_vm15  ;;  %vm1772_vm8 = vcmp.eq.s32.totalorder %v6579_v5, 4294967295  ;;  %vm1375_vm0 = vcmp.eq.s32.totalorder %v6633_v18, 4294967281 }
 0x10e   : > { %v6991_v58 = vpop.f32.mrb[11].mxu0  ;;  %5691 = vmatprep.subr.bf16.mxu1 %v8936_v2  ;;  %5753 = vmatprep.subr.bf16.mxu0 %v8936_v2  ;;  %vm5762_vm15 = vmpackc.low %vm1772_vm8, %vm6290_vm3 }
 0x10f   : > { %778 = vmatprep.mubr.f32.mxu1 %v6991_v58  ;;  %1176 = vmatprep.mubr.f32.mxu0 %v6991_v58  ;;  %vm5768_vm8 = vmpackc.low %vm1776_vm5, %vm1774_vm4  ;;  %vm1784_vm4 = vcmp.eq.s32.totalorder %v6718_v36, 4294967295 }
 0x110   : > { %779 = vmatmul.mubr.f32.gmra.mrb[10].mxu1 %v6979_v24  ;;  %1177 = vmatmul.mubr.f32.gmra.mrb[34].mxu0 %v6979_v24 }
 0x111   : > { %5694 = vmatpush1.bf16.msk.msra.mxu1 %vm6981_vm14, %v6891_v42  ;;  %5756 = vmatpush1.bf16.msk.msra.mxu0 %vm5755_vm1, %v6893_v44  ;;  %v7022_v34 = vpop.f32.mrb[12].mxu0  ;;  %vm1771_vm14 = vcmp.eq.s32.totalorder %v6975_v21, 4294967295  ;;  %vm1377_vm1 = vcmp.eq.s32.totalorder %v6637_v19, 4294967281 }
 0x112   : > { %v7033_v1 = vpop.f32.mrb[13].mxu0  ;;  %5695 = vmatprep.subr.bf16.mxu1 %v8936_v2  ;;  %5757 = vmatprep.subr.bf16.mxu0 %v8936_v2  ;;  %v5702_v2 = vpack.c.bf16 %v8995_v16, %v6879_v35  ;;  %vm7078_vm6 = vmpackc.low %vm1771_vm14, %vm1769_vm13  ;;  %vm1780_vm13 = vcmp.eq.s32.totalorder %v6682_v29, 4294967295 }
 0x113   : > { %784 = vmatprep.mubr.f32.mxu1 %v7033_v1  ;;  %1182 = vmatprep.mubr.f32.mxu0 %v7033_v1 }
 0x114   : > { %785 = vmatmul.mubr.f32.gmra.mrb[12].mxu1 %v7022_v34  ;;  %1183 = vmatmul.mubr.f32.gmra.mrb[36].mxu0 %v7022_v34 }
 0x115   : > { %5698 = vmatpush1.bf16.msk.msra.mxu1 %vm7013_vm7, %v6891_v42  ;;  %5760 = vmatpush1.bf16.msk.msra.mxu0 %vm7024_vm9, %v6893_v44  ;;  %v7070_v5 = vpop.f32.mrb[14].mxu0  ;;  %v7087_v42 = vpack.c.bf16 %v1813_v27, %v1813_v27  ;;  %vm5706_vm7 = vmpackc.low %vm1377_vm1, %vm1375_vm0  ;;  %vm1379_vm9 = vcmp.eq.s32.totalorder %v6671_v25, 4294967281  ;;  %vm1383_vm0 = vcmp.eq.s32.totalorder %v6709_v28, 4294967281  ;;  %vm1385_vm1 = vcmp.eq.s32.totalorder %v6718_v36, 4294967281 }
 0x116   : > { %v7082_v4 = vpop.f32.mrb[15].mxu0  ;;  %5701 = vmatprep.subr.msk.bf16.mxu1 %vm7039_vm12, %v7031_v39  ;;  %5763 = vmatprep.subr.msk.bf16.mxu0 %vm5762_vm15, %v5761_v10  ;;  %vm1778_vm12 = vcmp.eq.s32.totalorder %v6671_v25, 4294967295  ;;  %vm5710_vm14 = vmpackc.low %vm1381_vm11, %vm1379_vm9  ;;  %vm1786_vm9 = vcmp.eq.s32.totalorder %v6751_v47, 4294967295  ;;  %vm1788_vm11 = vcmp.eq.s32.totalorder %v6754_v48, 4294967295 }
 0x117   : > { %790 = vmatprep.mubr.f32.mxu1 %v7082_v4  ;;  %1188 = vmatprep.mubr.f32.mxu0 %v7082_v4  ;;  %vm5772_vm15 = vmpackc.low %vm1780_vm13, %vm1778_vm12 }
 0x118   : > { %791 = vmatmul.mubr.f32.gmra.mrb[14].mxu1 %v7070_v5  ;;  %1189 = vmatmul.mubr.f32.gmra.mrb[38].mxu0 %v7070_v5  ;;  %vm5714_vm5 = vmpackc.low %vm1385_vm1, %vm1383_vm0  ;;  %vm1790_vm0 = vcmp.eq.s32.totalorder %v6766_v40, 4294967295  ;;  %vm1792_vm1 = vcmp.eq.s32.totalorder %v6777_v57, 4294967295 }
 0x119   : > { %5704 = vmatpush1.bf16.msk.msra.mxu1 %vm7058_vm2, %v5702_v2  ;;  %5766 = vmatpush1.bf16.msk.msra.mxu0 %vm7078_vm6, %v6893_v44  ;;  %v7106_v10 = vpop.f32.mrb[16].mxu0  ;;  %vm1782_vm2 = vcmp.eq.s32.totalorder %v6709_v28, 4294967295  ;;  %v9000_v2 = vmov 0.0|0.0   ;;  %vm5780_vm13 = vmpackc.low %vm1788_vm11, %vm1786_vm9 }
 0x11a   : > { %v7108_v35 = vpop.f32.mrb[17].mxu0  ;;  %5707 = vmatprep.subr.msk.bf16.mxu1 %vm5706_vm7, %v7031_v39  ;;  %5769 = vmatprep.subr.msk.bf16.mxu0 %vm5768_vm8, %v7087_v42  ;;  %vm5776_vm6 = vmpackc.low %vm1784_vm4, %vm1782_vm2  ;;  %vm1387_vm7 = vcmp.eq.s32.totalorder %v6751_v47, 4294967281  ;;  %vm1389_vm8 = vcmp.eq.s32.totalorder %v6754_v48, 4294967281  ;;  %vm1395_vm4 = vcmp.eq.s32.totalorder %v6788_v60, 4294967281 }
 0x11b   : > { %796 = vmatprep.mubr.f32.mxu1 %v7108_v35  ;;  %1194 = vmatprep.mubr.f32.mxu0 %v7108_v35  ;;  %vm5718_vm12 = vmpackc.low %vm1389_vm8, %vm1387_vm7  ;;  %vm1794_vm7 = vcmp.eq.s32.totalorder %v6788_v60, 4294967295  ;;  %vm1796_vm8 = vcmp.eq.s32.totalorder %v6797_v11, 4294967295 }
 0x11c   : > { %797 = vmatmul.mubr.f32.gmra.mrb[16].mxu1 %v7106_v10  ;;  %1195 = vmatmul.mubr.f32.gmra.mrb[40].mxu0 %v7106_v10  ;;  %vm5788_vm11 = vmpackc.low %vm1796_vm8, %vm1794_vm7  ;;  %vm2140_vm7 = vcmp.eq.s32.totalorder %v6389_v6, 0  ;;  %vm2142_vm8 = vcmp.eq.s32.totalorder %v6410_v15, 0 }
 0x11d   : > { %5708 = vmatpush1.bf16.msra.mxu1 %v9000_v2  ;;  %5770 = vmatpush1.bf16.msra.mxu0 %v9000_v2  ;;  %v7122_v7 = vpop.f32.mrb[18].mxu0 }
 0x11e   : > { %v7124_v44 = vpop.f32.mrb[19].mxu0  ;;  %5711 = vmatprep.subr.msk.bf16.mxu1 %vm5710_vm14, %v7031_v39  ;;  %5773 = vmatprep.subr.msk.bf16.mxu0 %vm5772_vm15, %v7087_v42  ;;  %vm1391_vm14 = vcmp.eq.s32.totalorder %v6766_v40, 4294967281  ;;  %vm1393_vm15 = vcmp.eq.s32.totalorder %v6777_v57, 4294967281  ;;  %v475_v57 = vadd.s32 240, %v6382_v3  ;;  %v476_v40 = vadd.s32 248, %v6382_v3 }
 0x11f   : > { %802 = vmatprep.mubr.f32.mxu1 %v7124_v44  ;;  %1200 = vmatprep.mubr.f32.mxu0 %v7124_v44  ;;  %vm7162_vm2 = vmpackc.low %vm1393_vm15, %vm1391_vm14  ;;  %vm1798_vm14 = vcmp.eq.s32.totalorder %v6817_v17, 4294967295  ;;  %vm1800_vm15 = vcmp.eq.s32.totalorder %v6820_v20, 4294967295 }
 0x120   : > { %803 = vmatmul.mubr.f32.gmra.mrb[18].mxu1 %v7122_v7  ;;  %1201 = vmatmul.mubr.f32.gmra.mrb[42].mxu0 %v7122_v7 }
 0x121   : > { %5712 = vmatpush1.bf16.msra.mxu1 %v9000_v2  ;;  %5774 = vmatpush1.bf16.msra.mxu0 %v9000_v2  ;;  %v7138_v27 = vpop.f32.mrb[20].mxu0 }
 0x122   : > { %v7140_v30 = vpop.f32.mrb[21].mxu0  ;;  %5715 = vmatprep.subr.msk.bf16.mxu1 %vm5714_vm5, %v7031_v39  ;;  %5777 = vmatprep.subr.msk.bf16.mxu0 %vm5776_vm6, %v7087_v42  ;;  %vm1397_vm5 = vcmp.eq.s32.totalorder %v6797_v11, 4294967281  ;;  %vm5784_vm6 = vmpackc.low %vm1792_vm1, %vm1790_vm0  ;;  %v7202_v11 = vsub.s32 %v476_v40, %v6492_v49  ;;  %v7230_v40 = vld [vmem:[%s8928_s3 + $0xa] sm:$0x3] }
 0x123   : > { %808 = vmatprep.mubr.f32.mxu1 %v7140_v30  ;;  %1206 = vmatprep.mubr.f32.mxu0 %v7140_v30  ;;  %vm7186_vm9 = vmpackc.low %vm1397_vm5, %vm1395_vm4  ;;  %v2611_v3 = vrot.slane %v7230_v40, %v6495_v50 }
 0x124   : > { %809 = vmatmul.mubr.f32.gmra.mrb[20].mxu1 %v7138_v27  ;;  %1207 = vmatmul.mubr.f32.gmra.mrb[44].mxu0 %v7138_v27  ;;  %vm5792_vm1 = vmpackc.low %vm1800_vm15, %vm1798_vm14  ;;  %vm1804_vm4 = vcmp.eq.s32.totalorder %v7202_v11, 4294967295  ;;  %vm2146_vm14 = vcmp.eq.s32.totalorder %v6429_v31, 0 }
 0x125   : > { %5716 = vmatpush1.bf16.msra.mxu1 %v9000_v2  ;;  %5778 = vmatpush1.bf16.msra.mxu0 %v9000_v2  ;;  %v7152_v9 = vpop.f32.mrb[22].mxu0 }
 0x126   : > { %9001 = vst [vmem:[#allocation15_spill] sm:$0xff] %v7152_v9  ;;  %v7156_v26 = vpop.f32.mrb[23].mxu0  ;;  %5719 = vmatprep.subr.msk.bf16.mxu1 %vm5718_vm12, %v7031_v39  ;;  %5781 = vmatprep.subr.msk.bf16.mxu0 %vm5780_vm13, %v7087_v42  ;;  %vm1399_vm12 = vcmp.eq.s32.totalorder %v6817_v17, 4294967281  ;;  %vm1401_vm13 = vcmp.eq.s32.totalorder %v6820_v20, 4294967281  ;;  %v5295_v20 = vld [vmem:[%s8927_s2 + $0x140] sm:$0xff] }
 0x127   : > { %9002 = vst [vmem:[#allocation16_spill] sm:$0xff] %v7156_v26  ;;  %814 = vmatprep.mubr.f32.mxu1 %v7156_v26  ;;  %1212 = vmatprep.mubr.f32.mxu0 %v7156_v26  ;;  %v5245_v26 = vld [vmem:[%s8927_s2 + $0xc0] sm:$0xff]  ;;  %vm5730_vm0 = vmpackc.low %vm1401_vm13, %vm1399_vm12  ;;  %vm2144_vm13 = vcmp.eq.s32.totalorder %v6417_v22, 0 }
 0x128   : > { %815 = vmatmul.mubr.f32.gmra.mrb[22].mxu1 %v7152_v9  ;;  %1213 = vmatmul.mubr.f32.gmra.mrb[46].mxu0 %v7152_v9  ;;  %v5249_v9 = vld [vmem:[%s8927_s2 + $0xe0] sm:$0xff]  ;;  %vm5801_vm12 = vmpackc.low %vm2142_vm8, %vm2140_vm7  ;;  %vm2547_vm7 = vcmp.eq.s32.totalorder %v6433_v32, 1  ;;  %vm2549_vm8 = vcmp.eq.s32.totalorder %v6437_v33, 1 }
 0x129   : > { %5720 = vmatpush1.bf16.msra.mxu1 %v9000_v2  ;;  %5782 = vmatpush1.bf16.msra.mxu0 %v9000_v2 }
 0x12a   : > { %1545 = vmatprep.mubr.f32.mxu1 %v6895_v46  ;;  %1944 = vmatprep.mubr.f32.mxu0 %v6895_v46  ;;  %v7199_v46 = vsub.s32 %v475_v57, %v6492_v49  ;;  %v7221_v49 = vld [vmem:[%s8928_s3 + $0x8] sm:$0x3] }
 0x12b   : > { %5723 = vmatprep.subr.msk.bf16.mxu1 %vm7162_vm2, %v7031_v39  ;;  %5785 = vmatprep.subr.msk.bf16.mxu0 %vm5784_vm6, %v7087_v42  ;;  %v2208_v57 = vrot.slane %v7221_v49, %v6397_v8 }
 0x12c   : > { %1633 = vperm.xlu1 %6175, %v5245_v26   ;;  %1653 = vperm.xlu0 %6174, %v5249_v9   ;;  %vm1802_vm2 = vcmp.eq.s32.totalorder %v7199_v46, 4294967295  ;;  %vm1403_vm5 = vcmp.eq.s32.totalorder %v7199_v46, 4294967281 }
 0x12d   : > { %5724 = vmatpush1.bf16.msra.mxu1 %v9000_v2  ;;  %5786 = vmatpush1.bf16.msra.mxu0 %v9000_v2  ;;  %vm5796_vm6 = vmpackc.low %vm1804_vm4, %vm1802_vm2  ;;  %vm2148_vm4 = vcmp.eq.s32.totalorder %v6433_v32, 0 }
 0x12e   : > { %5727 = vmatprep.subr.msk.bf16.mxu1 %vm7186_vm9, %v7031_v39  ;;  %5789 = vmatprep.subr.msk.bf16.mxu0 %vm5788_vm11, %v7087_v42  ;;  %vm2539_vm9 = vcmp.eq.s32.totalorder %v6389_v6, 1  ;;  %vm2541_vm11 = vcmp.eq.s32.totalorder %v6410_v15, 1  ;;  %vm5805_vm2 = vmpackc.low %vm2146_vm14, %vm2144_vm13  ;;  %vm2551_vm14 = vcmp.eq.s32.totalorder %v6448_v37, 1  ;;  %v2212_v6 = vrot.slane %v7221_v49, %v6495_v50 }
 0x12f   : > { %vm5865_vm15 = vmpackc.low %vm2541_vm11, %vm2539_vm9  ;;  %vm2152_vm11 = vcmp.eq.s32.totalorder %v6448_v37, 0  ;;  %v7360_v49 = vpack.c.bf16 %v2611_v3, %v2611_v3  ;;  %v5340_v3 = vld [vmem:[%s8927_s2 + $0x1a0] sm:$0xff] }
 0x130   : > { %2032 = vperm.xlu1 %6175, %v5291_v63   ;;  %2052 = vperm.xlu0 %6174, %v5295_v20   ;;  %v7241_v20 = vrot.slane %v7230_v40, %v6397_v8  ;;  %vm5873_vm13 = vmpackc.low %vm2549_vm8, %vm2547_vm7  ;;  %vm2160_vm8 = vcmp.eq.s32.totalorder %v6518_v52, 0  ;;  %v7351_v63 = vpack.c.bf16 %v2212_v6, %v2212_v6  ;;  %v9009_v40 = vld [vmem:[#allocation16_spill] sm:$0xff]  ;;  %v9014_v6 = vld [vmem:[#allocation14_spill] sm:$0xff] }
 0x131   : > { %5728 = vmatpush1.bf16.msra.mxu1 %v9000_v2  ;;  %5790 = vmatpush1.bf16.msra.mxu0 %v9000_v2 }
 0x132   : > { %5731 = vmatprep.subr.msk.bf16.mxu1 %vm5730_vm0, %v7031_v39  ;;  %5793 = vmatprep.subr.msk.bf16.mxu0 %vm5792_vm1, %v7087_v42  ;;  %v7245_v39 = vpack.c.bf16 %v2208_v57, %v2208_v57  ;;  %v7253_v9 = vpack.c.bf16 %v7241_v20, %v7241_v20  ;;  %vm2543_vm0 = vcmp.eq.s32.totalorder %v6417_v22, 1  ;;  %vm2545_vm1 = vcmp.eq.s32.totalorder %v6429_v31, 1  ;;  %v9010_v57 = vld [vmem:[#allocation10_spill] sm:$0xff] }
 0x134   : > { %2451 = vperm.xlu0 %6174, %v5340_v3  }
 0x135   : > { %5732 = vmatpush1.bf16.msra.mxu1 %v9000_v2  ;;  %5794 = vmatpush1.bf16.msra.mxu0 %v9000_v2 }
 0x136   : > { %5244 = vmatprep.subr.msk.mxu1 %vm1403_vm5, %v6989_v55  ;;  %5797 = vmatprep.subr.msk.bf16.mxu0 %vm5796_vm6, %v7087_v42  ;;  %vm2150_vm5 = vcmp.eq.s32.totalorder %v6437_v33, 0  ;;  %vm5869_vm6 = vmpackc.low %vm2545_vm1, %vm2543_vm0  ;;  %vm2156_vm1 = vcmp.eq.s32.totalorder %v6475_v43, 0  ;;  %v9007_v55 = vld [vmem:[#allocation6_spill] sm:$0xff]  ;;  %v9008_v42 = vld [vmem:[#allocation7_spill] sm:$0xff] }
 0x137   : > { %vm5809_vm9 = vmpackc.low %vm2150_vm5, %vm2148_vm4  ;;  %vm2555_vm5 = vcmp.eq.s32.totalorder %v6475_v43, 1  ;;  %v7339_v26 = vsub.s32 %v9008_v42, %v9007_v55  ;;  %v5336_v42 = vld [vmem:[%s8927_s2 + $0x180] sm:$0xff] }
 0x138   : > { %2431 = vperm.xlu1 %6175, %v5336_v42   ;;  %v7449_v42 = vld [vmem:[%s8928_s3 + $0xc] sm:$0x3] }
 0x139   : > { %1542 = vmatpush1.msra.mxu1 %v8995_v16  ;;  %5798 = vmatpush1.bf16.msra.mxu0 %v9000_v2 }
 0x13a   : > { %1546 = vmatmul.mubr.f32.vlgmr.msra.gmra.mrb[24].mxu1 %v6887_v41  ;;  %5799 = vmatprep.subr.bf16.mxu1 %v9000_v2 }
 0x13b   : > { %1551 = vmatprep.mubr.f32.mxu1 %v6909_v54  ;;  %5802 = vmatpush1.bf16.msk.msra.mxu1 %vm5801_vm12, %v7245_v39  ;;  %vm2154_vm12 = vcmp.eq.s32.totalorder %v6451_v38, 0 }
 0x13c   : > { %1945 = vmatmul.mubr.f32.vlgmr.msra.gmra.mrb[48].mxu0 %v6887_v41  ;;  %5863 = vmatprep.subr.bf16.mxu0 %v9000_v2  ;;  %vm5813_vm0 = vmpackc.low %vm2154_vm12, %vm2152_vm11  ;;  %vm2559_vm12 = vcmp.eq.s32.totalorder %v6518_v52, 1 }
 0x13d   : > { %1950 = vmatprep.mubr.f32.mxu0 %v6909_v54  ;;  %5866 = vmatpush1.bf16.msk.msra.mxu0 %vm5865_vm15, %v7253_v9  ;;  %vm2553_vm15 = vcmp.eq.s32.totalorder %v6451_v38, 1 }
 0x13e   : > { %1552 = vmatmul.mubr.f32.gmra.mrb[26].mxu1 %v6907_v51  ;;  %5803 = vmatprep.subr.bf16.mxu1 %v9000_v2  ;;  %vm5877_vm4 = vmpackc.low %vm2553_vm15, %vm2551_vm14  ;;  %vm2164_vm15 = vcmp.eq.s32.totalorder %v6566_v62, 0 }
 0x13f   : > { %1557 = vmatprep.mubr.f32.mxu1 %v6925_v59  ;;  %5806 = vmatpush1.bf16.msk.msra.mxu1 %vm5805_vm2, %v7245_v39  ;;  %vm2158_vm2 = vcmp.eq.s32.totalorder %v6482_v45, 0 }
 0x140   : > { %1951 = vmatmul.mubr.f32.gmra.mrb[50].mxu0 %v6907_v51  ;;  %5867 = vmatprep.subr.bf16.mxu0 %v9000_v2  ;;  %vm5817_vm7 = vmpackc.low %vm2158_vm2, %vm2156_vm1  ;;  %vm2563_vm2 = vcmp.eq.s32.totalorder %v6566_v62, 1 }
 0x141   : > { %1956 = vmatprep.mubr.f32.mxu0 %v6925_v59  ;;  %5870 = vmatpush1.bf16.msk.msra.mxu0 %vm5869_vm6, %v7253_v9  ;;  %vm2557_vm6 = vcmp.eq.s32.totalorder %v6482_v45, 1 }
 0x142   : > { %1558 = vmatmul.mubr.f32.gmra.mrb[28].mxu1 %v6923_v56  ;;  %5807 = vmatprep.subr.bf16.mxu1 %v9000_v2  ;;  %vm5881_vm11 = vmpackc.low %vm2557_vm6, %vm2555_vm5  ;;  %vm2168_vm6 = vcmp.eq.s32.totalorder %v6971_v23, 0 }
 0x143   : > { %1563 = vmatprep.mubr.f32.mxu1 %v6941_v12  ;;  %5810 = vmatpush1.bf16.msk.msra.mxu1 %vm5809_vm9, %v7245_v39  ;;  %vm2162_vm9 = vcmp.eq.s32.totalorder %v6523_v53, 0 }
 0x144   : > { %1957 = vmatmul.mubr.f32.gmra.mrb[52].mxu0 %v6923_v56  ;;  %5871 = vmatprep.subr.bf16.mxu0 %v9000_v2  ;;  %vm5821_vm14 = vmpackc.low %vm2162_vm9, %vm2160_vm8  ;;  %vm2567_vm9 = vcmp.eq.s32.totalorder %v6971_v23, 1 }
 0x145   : > { %1962 = vmatprep.mubr.f32.mxu0 %v6941_v12  ;;  %5874 = vmatpush1.bf16.msk.msra.mxu0 %vm5873_vm13, %v7253_v9  ;;  %vm2561_vm13 = vcmp.eq.s32.totalorder %v6523_v53, 1 }
 0x146   : > { %1564 = vmatmul.mubr.f32.gmra.mrb[30].mxu1 %v6939_v0  ;;  %5811 = vmatprep.subr.bf16.mxu1 %v9000_v2  ;;  %vm5885_vm1 = vmpackc.low %vm2561_vm13, %vm2559_vm12  ;;  %vm2173_vm13 = vcmp.eq.s32.totalorder %v6633_v18, 0 }
 0x147   : > { %1569 = vmatprep.mubr.f32.mxu1 %v6957_v14  ;;  %5814 = vmatpush1.bf16.msk.msra.mxu1 %vm5813_vm0, %v7245_v39  ;;  %vm2166_vm0 = vcmp.eq.s32.totalorder %v6563_v61, 0 }
 0x148   : > { %1963 = vmatmul.mubr.f32.gmra.mrb[54].mxu0 %v6939_v0  ;;  %5875 = vmatprep.subr.bf16.mxu0 %v9000_v2  ;;  %vm5825_vm5 = vmpackc.low %vm2166_vm0, %vm2164_vm15  ;;  %vm2572_vm0 = vcmp.eq.s32.totalorder %v6633_v18, 1  ;;  %v5898_v18 = vpack.c.bf16 %v8995_v16, %v7241_v20  ;;  %v9011_v20 = vld [vmem:[#allocation11_spill] sm:$0xff] }
 0x149   : > { %1968 = vmatprep.mubr.f32.mxu0 %v6957_v14  ;;  %5878 = vmatpush1.bf16.msk.msra.mxu0 %vm5877_vm4, %v7253_v9  ;;  %vm2565_vm4 = vcmp.eq.s32.totalorder %v6563_v61, 1 }
 0x14a   : > { %1570 = vmatmul.mubr.f32.gmra.mrb[32].mxu1 %v6955_v13  ;;  %5815 = vmatprep.subr.bf16.mxu1 %v9000_v2  ;;  %vm5889_vm8 = vmpackc.low %vm2565_vm4, %vm2563_vm2  ;;  %vm2571_vm4 = vcmp.eq.s32.totalorder %v7339_v26, 1 }
 0x14b   : > { %1575 = vmatprep.mubr.f32.mxu1 %v6991_v58  ;;  %5818 = vmatpush1.bf16.msk.msra.mxu1 %vm5817_vm7, %v7245_v39  ;;  %vm2170_vm7 = vcmp.eq.s32.totalorder %v6975_v21, 0 }
 0x14c   : > { %1969 = vmatmul.mubr.f32.gmra.mrb[56].mxu0 %v6955_v13  ;;  %5879 = vmatprep.subr.bf16.mxu0 %v9000_v2  ;;  %vm5829_vm12 = vmpackc.low %vm2170_vm7, %vm2168_vm6  ;;  %vm2179_vm6 = vcmp.eq.s32.totalorder %v6682_v29, 0 }
 0x14d   : > { %1974 = vmatprep.mubr.f32.mxu0 %v6991_v58  ;;  %5882 = vmatpush1.bf16.msk.msra.mxu0 %vm5881_vm11, %v7253_v9  ;;  %vm2569_vm11 = vcmp.eq.s32.totalorder %v6975_v21, 1 }
 0x14e   : > { %1576 = vmatmul.mubr.f32.gmra.mrb[34].mxu1 %v6979_v24  ;;  %5819 = vmatprep.subr.bf16.mxu1 %v9000_v2  ;;  %vm5893_vm15 = vmpackc.low %vm2569_vm11, %vm2567_vm9  ;;  %vm2576_vm9 = vcmp.eq.s32.totalorder %v6671_v25, 1  ;;  %vm2578_vm11 = vcmp.eq.s32.totalorder %v6682_v29, 1 }
 0x14f   : > { %1581 = vmatprep.mubr.f32.mxu1 %v7033_v1  ;;  %5822 = vmatpush1.bf16.msk.msra.mxu1 %vm5821_vm14, %v7245_v39  ;;  %vm2175_vm14 = vcmp.eq.s32.totalorder %v6637_v19, 0 }
 0x150   : > { %1975 = vmatmul.mubr.f32.gmra.mrb[58].mxu0 %v6979_v24  ;;  %5883 = vmatprep.subr.bf16.mxu0 %v9000_v2  ;;  %vm5832_vm2 = vmpackc.low %vm2175_vm14, %vm2173_vm13  ;;  %vm2181_vm13 = vcmp.eq.s32.totalorder %v6709_v28, 0  ;;  %vm2183_vm14 = vcmp.eq.s32.totalorder %v6718_v36, 0 }
 0x151   : > { %1980 = vmatprep.mubr.f32.mxu0 %v7033_v1  ;;  %5886 = vmatpush1.bf16.msk.msra.mxu0 %vm5885_vm1, %v7253_v9  ;;  %vm2574_vm1 = vcmp.eq.s32.totalorder %v6637_v19, 1 }
 0x152   : > { %1582 = vmatmul.mubr.f32.gmra.mrb[36].mxu1 %v7022_v34  ;;  %5823 = vmatprep.subr.bf16.mxu1 %v9000_v2  ;;  %vm5896_vm7 = vmpackc.low %vm2574_vm1, %vm2572_vm0  ;;  %vm2580_vm0 = vcmp.eq.s32.totalorder %v6709_v28, 1  ;;  %vm2582_vm1 = vcmp.eq.s32.totalorder %v6718_v36, 1 }
 0x153   : > { %1587 = vmatprep.mubr.f32.mxu1 %v7082_v4  ;;  %5826 = vmatpush1.bf16.msk.msra.mxu1 %vm5825_vm5, %v7245_v39  ;;  %vm2177_vm5 = vcmp.eq.s32.totalorder %v6671_v25, 0 }
 0x154   : > { %1981 = vmatmul.mubr.f32.gmra.mrb[60].mxu0 %v7022_v34  ;;  %5887 = vmatprep.subr.bf16.mxu0 %v9000_v2 }
 0x155   : > { %1986 = vmatprep.mubr.f32.mxu0 %v7082_v4  ;;  %5890 = vmatpush1.bf16.msk.msra.mxu0 %vm5889_vm8, %v7253_v9  ;;  %vm5899_vm8 = vmpackc.low %vm6290_vm3, %vm2571_vm4  ;;  %vm2185_vm4 = vcmp.eq.s32.totalorder %v6751_v47, 0 }
 0x156   : > { %1588 = vmatmul.mubr.f32.gmra.mrb[38].mxu1 %v7070_v5  ;;  %5827 = vmatprep.subr.bf16.mxu1 %v9000_v2 }
 0x157   : > { %1593 = vmatprep.mubr.f32.mxu1 %v7108_v35  ;;  %5830 = vmatpush1.bf16.msk.msra.mxu1 %vm5829_vm12, %v7245_v39  ;;  %vm5836_vm12 = vmpackc.low %vm2179_vm6, %vm2177_vm5  ;;  %vm2187_vm5 = vcmp.eq.s32.totalorder %v6754_v48, 0  ;;  %v9012_v39 = vld [vmem:[#allocation15_spill] sm:$0xff] }
 0x158   : > { %1987 = vmatmul.mubr.f32.gmra.mrb[62].mxu0 %v7070_v5  ;;  %5891 = vmatprep.subr.bf16.mxu0 %v9000_v2  ;;  %vm5906_vm6 = vmpackc.low %vm2582_vm1, %vm2580_vm0  ;;  %vm2193_vm1 = vcmp.eq.s32.totalorder %v6788_v60, 0 }
 0x159   : > { %1992 = vmatprep.mubr.f32.mxu0 %v7108_v35  ;;  %5894 = vmatpush1.bf16.msk.msra.mxu0 %vm5893_vm15, %v7253_v9  ;;  %vm5902_vm15 = vmpackc.low %vm2578_vm11, %vm2576_vm9  ;;  %vm2189_vm11 = vcmp.eq.s32.totalorder %v9010_v57, 0  ;;  %v9013_v9 = vld [vmem:[#allocation12_spill] sm:$0xff] }
 0x15a   : > { %1594 = vmatmul.mubr.f32.gmra.mrb[40].mxu1 %v7106_v10  ;;  %5833 = vmatprep.subr.msk.bf16.mxu1 %vm5832_vm2, %v7351_v63  ;;  %vm5840_vm2 = vmpackc.low %vm2183_vm14, %vm2181_vm13  ;;  %vm2588_vm13 = vcmp.eq.s32.totalorder %v9010_v57, 1  ;;  %vm2590_vm14 = vcmp.eq.s32.totalorder %v9011_v20, 1 }
 0x15b   : > { %1599 = vmatprep.mubr.f32.mxu1 %v7124_v44  ;;  %5834 = vmatpush1.bf16.msra.mxu1 %v9000_v2  ;;  %vm5844_vm9 = vmpackc.low %vm2187_vm5, %vm2185_vm4  ;;  %vm2592_vm5 = vcmp.eq.s32.totalorder %v6788_v60, 1 }
 0x15c   : > { %1993 = vmatmul.mubr.f32.gmra.mrb[64].mxu0 %v7106_v10  ;;  %5897 = vmatprep.subr.msk.bf16.mxu0 %vm5896_vm7, %v7360_v49  ;;  %vm2584_vm7 = vcmp.eq.s32.totalorder %v6751_v47, 1  ;;  %vm5914_vm4 = vmpackc.low %vm2590_vm14, %vm2588_vm13 }
 0x15d   : > { %1998 = vmatprep.mubr.f32.mxu0 %v7124_v44  ;;  %5900 = vmatpush1.bf16.msk.msra.mxu0 %vm5899_vm8, %v5898_v18  ;;  %vm2586_vm8 = vcmp.eq.s32.totalorder %v6754_v48, 1  ;;  %v9015_v18 = vld [vmem:[#allocation13_spill] sm:$0xff] }
 0x15e   : > { %1600 = vmatmul.mubr.f32.gmra.mrb[42].mxu1 %v7122_v7  ;;  %5837 = vmatprep.subr.msk.bf16.mxu1 %vm5836_vm12, %v7351_v63  ;;  %vm2191_vm12 = vcmp.eq.s32.totalorder %v9011_v20, 0  ;;  %vm2598_vm13 = vcmp.eq.s32.totalorder %v9015_v18, 1 }
 0x15f   : > { %1605 = vmatprep.mubr.f32.mxu1 %v7140_v30  ;;  %5838 = vmatpush1.bf16.msra.mxu1 %v9000_v2  ;;  %vm5848_vm0 = vmpackc.low %vm2191_vm12, %vm2189_vm11  ;;  %vm2596_vm12 = vcmp.eq.s32.totalorder %v6817_v17, 1 }
 0x160   : > { %1999 = vmatmul.mubr.f32.gmra.mrb[66].mxu0 %v7122_v7  ;;  %5903 = vmatprep.subr.msk.bf16.mxu0 %vm5902_vm15, %v7360_v49  ;;  %vm5910_vm15 = vmpackc.low %vm2586_vm8, %vm2584_vm7  ;;  %vm2197_vm8 = vcmp.eq.s32.totalorder %v6817_v17, 0 }
 0x161   : > { %2004 = vmatprep.mubr.f32.mxu0 %v7140_v30  ;;  %5904 = vmatpush1.bf16.msra.mxu0 %v9000_v2 }
 0x162   : > { %1606 = vmatmul.mubr.f32.gmra.mrb[44].mxu1 %v7138_v27  ;;  %5841 = vmatprep.subr.msk.bf16.mxu1 %vm5840_vm2, %v7351_v63  ;;  %vm2195_vm2 = vcmp.eq.s32.totalorder %v9013_v9, 0 }
 0x163   : > { %1611 = vmatprep.mubr.f32.mxu1 %v9009_v40  ;;  %5842 = vmatpush1.bf16.msra.mxu1 %v9000_v2  ;;  %vm5852_vm7 = vmpackc.low %vm2195_vm2, %vm2193_vm1  ;;  %vm2600_vm2 = vcmp.eq.s32.totalorder %v7199_v46, 1 }
 0x164   : > { %2005 = vmatmul.mubr.f32.gmra.mrb[68].mxu0 %v7138_v27  ;;  %5907 = vmatprep.subr.msk.bf16.mxu0 %vm5906_vm6, %v7360_v49  ;;  %vm2594_vm6 = vcmp.eq.s32.totalorder %v9013_v9, 1  ;;  %v5386_v9 = vld [vmem:[%s8927_s2 + $0x200] sm:$0xff]  ;;  %vm5922_vm1 = vmpackc.low %vm2598_vm13, %vm2596_vm12  ;;  %vm3341_vm12 = vcmp.eq.s32.totalorder %v6417_v22, 16  ;;  %vm3343_vm13 = vcmp.eq.s32.totalorder %v6429_v31, 16 }
 0x165   : > { %2010 = vmatprep.mubr.f32.mxu0 %v9009_v40  ;;  %5908 = vmatpush1.bf16.msra.mxu0 %v9000_v2  ;;  %vm5918_vm11 = vmpackc.low %vm2594_vm6, %vm2592_vm5 }
 0x166   : > { %1612 = vmatmul.mubr.f32.gmra.mrb[46].mxu1 %v9012_v39  ;;  %5845 = vmatprep.subr.msk.bf16.mxu1 %vm5844_vm9, %v7351_v63  ;;  %vm2199_vm9 = vcmp.eq.s32.totalorder %v9015_v18, 0 }
 0x167   : > { %5846 = vmatpush1.bf16.msra.mxu1 %v9000_v2  ;;  %2343 = vmatprep.mubr.f32.mxu1 %v9014_v6  ;;  %vm5856_vm14 = vmpackc.low %vm2199_vm9, %vm2197_vm8  ;;  %vm2942_vm9 = vcmp.eq.s32.totalorder %v6417_v22, 15 }
 0x168   : > { %2011 = vmatmul.mubr.f32.gmra.mrb[70].mxu0 %v9012_v39  ;;  %5911 = vmatprep.subr.msk.bf16.mxu0 %vm5910_vm15, %v7360_v49  ;;  %vm2201_vm15 = vcmp.eq.s32.totalorder %v7199_v46, 0 }
 0x169   : > { %5912 = vmatpush1.bf16.msra.mxu0 %v9000_v2  ;;  %2742 = vmatprep.mubr.f32.mxu0 %v9014_v6  ;;  %v5382_v6 = vld [vmem:[%s8927_s2 + $0x1e0] sm:$0xff] }
 0x16a   : > { %5849 = vmatprep.subr.msk.bf16.mxu1 %vm5848_vm0, %v7351_v63  ;;  %5915 = vmatprep.subr.msk.bf16.mxu0 %vm5914_vm4, %v7360_v49  ;;  %vm2203_vm0 = vcmp.eq.s32.totalorder %v7202_v11, 0  ;;  %vm2602_vm4 = vcmp.eq.s32.totalorder %v7202_v11, 1 }
 0x16b   : > { %5850 = vmatpush1.bf16.msra.mxu1 %v9000_v2  ;;  %2830 = vperm.xlu1 %6175, %v5382_v6   ;;  %vm5860_vm5 = vmpackc.low %vm2203_vm0, %vm2201_vm15  ;;  %v3006_v6 = vrot.slane %v7449_v42, %v6397_v8  ;;  %vm2946_vm15 = vcmp.eq.s32.totalorder %v6433_v32, 15  ;;  %vm2948_vm0 = vcmp.eq.s32.totalorder %v6437_v33, 15 }
 0x16c   : > { %5853 = vmatprep.subr.msk.bf16.mxu1 %vm5852_vm7, %v7351_v63  ;;  %2850 = vperm.xlu0 %6174, %v5386_v9   ;;  %vm5926_vm6 = vmpackc.low %vm2602_vm4, %vm2600_vm2  ;;  %vm2940_vm7 = vcmp.eq.s32.totalorder %v6410_v15, 15  ;;  %v7463_v9 = vld [vmem:[%s8928_s3 + $0xe] sm:$0x3]  ;;  %vm3345_vm2 = vcmp.eq.s32.totalorder %v6433_v32, 16  ;;  %vm3347_vm4 = vcmp.eq.s32.totalorder %v6437_v33, 16 }
 0x16d   : > { %5916 = vmatpush1.bf16.msra.mxu0 %v9000_v2  ;;  %v5930_v3 = vpack.c.bf16 %v3006_v6, %v8995_v16  ;;  %vm5931_vm8 = vmpackc.low %vm2940_vm7, %vm6290_vm3  ;;  %v3405_v15 = vrot.slane %v7463_v9, %v6397_v8  ;;  %vm2952_vm7 = vcmp.eq.s32.totalorder %v6451_v38, 15 }
 0x16e   : > { %5919 = vmatprep.subr.msk.bf16.mxu0 %vm5918_vm11, %v7360_v49  ;;  %vm2944_vm11 = vcmp.eq.s32.totalorder %v6429_v31, 15 }
 0x16f   : > { %5854 = vmatpush1.bf16.msra.mxu1 %v9000_v2 }
 0x170   : > { %5857 = vmatprep.subr.msk.bf16.mxu1 %vm5856_vm14, %v7351_v63  ;;  %vm5935_vm14 = vmpackc.low %vm2944_vm11, %vm2942_vm9  ;;  %vm3349_vm9 = vcmp.eq.s32.totalorder %v6448_v37, 16  ;;  %vm3351_vm11 = vcmp.eq.s32.totalorder %v6451_v38, 16 }
 0x171   : > { %5920 = vmatpush1.bf16.msra.mxu0 %v9000_v2 }
 0x172   : > { %5923 = vmatprep.subr.msk.bf16.mxu0 %vm5922_vm1, %v7360_v49  ;;  %vm5999_vm1 = vmpackc.low %vm3343_vm13, %vm3341_vm12  ;;  %vm2954_vm13 = vcmp.eq.s32.totalorder %v6475_v43, 15 }
 0x173   : > { %5858 = vmatpush1.bf16.msra.mxu1 %v9000_v2 }
 0x174   : > { %5861 = vmatprep.subr.msk.bf16.mxu1 %vm5860_vm5, %v7351_v63  ;;  %v7477_v63 = vpack.c.bf16 %v3006_v6, %v3006_v6  ;;  %vm5939_vm5 = vmpackc.low %vm2948_vm0, %vm2946_vm15  ;;  %vm3353_vm0 = vcmp.eq.s32.totalorder %v6475_v43, 16  ;;  %v3010_v6 = vrot.slane %v7449_v42, %v6495_v50 }
 0x175   : > { %5924 = vmatpush1.bf16.msra.mxu0 %v9000_v2  ;;  %vm6007_vm15 = vmpackc.low %vm3351_vm11, %vm3349_vm9  ;;  %vm2962_vm11 = vcmp.eq.s32.totalorder %v6566_v62, 15 }
 0x176   : > { %5927 = vmatprep.subr.msk.bf16.mxu0 %vm5926_vm6, %v7360_v49  ;;  %v7485_v49 = vpack.c.bf16 %v3405_v15, %v3405_v15  ;;  %vm2950_vm6 = vcmp.eq.s32.totalorder %v6448_v37, 15  ;;  %v5961_v42 = vpack.c.bf16 %v3010_v6, %v8995_v16 }
 0x177   : > { %5862 = vmatpush1.bf16.msra.mxu1 %v9000_v2  ;;  %vm5943_vm12 = vmpackc.low %vm2952_vm7, %vm2950_vm6  ;;  %vm3357_vm7 = vcmp.eq.s32.totalorder %v6518_v52, 16 }
 0x178   : > { %5929 = vmatprep.subr.bf16.mxu1 %v9000_v2 }
 0x179   : > { %5928 = vmatpush1.bf16.msra.mxu0 %v9000_v2 }
 0x17a   : > { %2344 = vmatmul.mubr.f32.vlgmr.msra.gmra.mrb[48].mxu1 %v6887_v41  ;;  %5995 = vmatprep.subr.bf16.mxu0 %v9000_v2 }
 0x17b   : > { %2349 = vmatprep.mubr.f32.mxu1 %v6909_v54  ;;  %5932 = vmatpush1.bf16.msk.msra.mxu1 %vm5931_vm8, %v5930_v3  ;;  %vm6003_vm8 = vmpackc.low %vm3347_vm4, %vm3345_vm2  ;;  %vm2958_vm4 = vcmp.eq.s32.totalorder %v6518_v52, 15  ;;  %v9016_v3 = vld [vmem:[#allocation8_spill] sm:$0xff] }
 0x17c   : > { %2743 = vmatmul.mubr.f32.vlgmr.msra.gmra.mrb[72].mxu0 %v6887_v41  ;;  %5933 = vmatprep.subr.bf16.mxu1 %v9000_v2  ;;  %v7553_v15 = vsub.s32 %v9016_v3, %v9007_v55  ;;  %v7581_v3 = vpack.c.bf16 %v3010_v6, %v3010_v6  ;;  %v5427_v6 = vld [vmem:[%s8927_s2 + $0x240] sm:$0xff] }
 0x17d   : > { %2748 = vmatprep.mubr.f32.mxu0 %v6909_v54  ;;  %5996 = vmatpush1.bf16.msra.mxu0 %v9000_v2 }
 0x17e   : > { %2350 = vmatmul.mubr.f32.gmra.mrb[50].mxu1 %v6907_v51  ;;  %5997 = vmatprep.subr.bf16.mxu0 %v9000_v2 }
 0x17f   : > { %2355 = vmatprep.mubr.f32.mxu1 %v6925_v59  ;;  %5936 = vmatpush1.bf16.msk.msra.mxu1 %vm5935_vm14, %v7477_v63  ;;  %vm2956_vm14 = vcmp.eq.s32.totalorder %v6482_v45, 15 }
 0x180   : > { %2749 = vmatmul.mubr.f32.gmra.mrb[74].mxu0 %v6907_v51  ;;  %5937 = vmatprep.subr.bf16.mxu1 %v9000_v2  ;;  %vm5947_vm2 = vmpackc.low %vm2956_vm14, %vm2954_vm13  ;;  %vm3361_vm14 = vcmp.eq.s32.totalorder %v6566_v62, 16 }
 0x181   : > { %2754 = vmatprep.mubr.f32.mxu0 %v6925_v59  ;;  %6000 = vmatpush1.bf16.msk.msra.mxu0 %vm5999_vm1, %v7485_v49  ;;  %vm3355_vm1 = vcmp.eq.s32.totalorder %v6482_v45, 16 }
 0x182   : > { %2356 = vmatmul.mubr.f32.gmra.mrb[52].mxu1 %v6923_v56  ;;  %6001 = vmatprep.subr.bf16.mxu0 %v9000_v2  ;;  %vm6011_vm6 = vmpackc.low %vm3355_vm1, %vm3353_vm0  ;;  %vm2966_vm1 = vcmp.eq.s32.totalorder %v6971_v23, 15 }
 0x183   : > { %2361 = vmatprep.mubr.f32.mxu1 %v6941_v12  ;;  %5940 = vmatpush1.bf16.msk.msra.mxu1 %vm5939_vm5, %v7477_v63  ;;  %vm2960_vm5 = vcmp.eq.s32.totalorder %v6523_v53, 15 }
 0x184   : > { %2755 = vmatmul.mubr.f32.gmra.mrb[76].mxu0 %v6923_v56  ;;  %5941 = vmatprep.subr.bf16.mxu1 %v9000_v2  ;;  %vm5951_vm9 = vmpackc.low %vm2960_vm5, %vm2958_vm4  ;;  %vm2973_vm5 = vcmp.eq.s32.totalorder %v6637_v19, 15  ;;  %v3409_v19 = vrot.slane %v7463_v9, %v6495_v50 }
 0x185   : > { %2760 = vmatprep.mubr.f32.mxu0 %v6941_v12  ;;  %6004 = vmatpush1.bf16.msk.msra.mxu0 %vm6003_vm8, %v7485_v49  ;;  %vm3359_vm8 = vcmp.eq.s32.totalorder %v6523_v53, 16 }
 0x186   : > { %2362 = vmatmul.mubr.f32.gmra.mrb[54].mxu1 %v6939_v0  ;;  %6005 = vmatprep.subr.bf16.mxu0 %v9000_v2  ;;  %vm6015_vm13 = vmpackc.low %vm3359_vm8, %vm3357_vm7  ;;  %vm3367_vm7 = vcmp.eq.s32.totalorder %v6975_v21, 16  ;;  %v7593_v9 = vpack.c.bf16 %v3409_v19, %v3409_v19  ;;  %v5470_v19 = vld [vmem:[%s8927_s2 + $0x2a0] sm:$0xff] }
 0x187   : > { %2367 = vmatprep.mubr.f32.mxu1 %v6957_v14  ;;  %5944 = vmatpush1.bf16.msk.msra.mxu1 %vm5943_vm12, %v7477_v63  ;;  %vm2964_vm12 = vcmp.eq.s32.totalorder %v6563_v61, 15 }
 0x188   : > { %2761 = vmatmul.mubr.f32.gmra.mrb[78].mxu0 %v6939_v0  ;;  %5945 = vmatprep.subr.bf16.mxu1 %v9000_v2  ;;  %vm5955_vm0 = vmpackc.low %vm2964_vm12, %vm2962_vm11  ;;  %vm2970_vm11 = vcmp.eq.s32.totalorder %v7339_v26, 15  ;;  %vm2972_vm12 = vcmp.eq.s32.totalorder %v7553_v15, 15 }
 0x189   : > { %2766 = vmatprep.mubr.f32.mxu0 %v6957_v14  ;;  %6008 = vmatpush1.bf16.msk.msra.mxu0 %vm6007_vm15, %v7485_v49  ;;  %vm3363_vm15 = vcmp.eq.s32.totalorder %v6563_v61, 16 }
 0x18a   : > { %2368 = vmatmul.mubr.f32.gmra.mrb[56].mxu1 %v6955_v13  ;;  %6009 = vmatprep.subr.bf16.mxu0 %v9000_v2  ;;  %vm6019_vm4 = vmpackc.low %vm3363_vm15, %vm3361_vm14  ;;  %vm2975_vm14 = vcmp.eq.s32.totalorder %v6671_v25, 15  ;;  %vm2977_vm15 = vcmp.eq.s32.totalorder %v6682_v29, 15 }
 0x18b   : > { %2373 = vmatprep.mubr.f32.mxu1 %v6991_v58  ;;  %5948 = vmatpush1.bf16.msk.msra.mxu1 %vm5947_vm2, %v7477_v63  ;;  %vm2968_vm2 = vcmp.eq.s32.totalorder %v6975_v21, 15 }
 0x18c   : > { %2767 = vmatmul.mubr.f32.gmra.mrb[80].mxu0 %v6955_v13  ;;  %5949 = vmatprep.subr.bf16.mxu1 %v9000_v2  ;;  %vm5959_vm8 = vmpackc.low %vm2968_vm2, %vm2966_vm1  ;;  %vm3371_vm1 = vcmp.eq.s32.totalorder %v7553_v15, 16 }
 0x18d   : > { %2772 = vmatprep.mubr.f32.mxu0 %v6991_v58  ;;  %6012 = vmatpush1.bf16.msk.msra.mxu0 %vm6011_vm6, %v7485_v49  ;;  %vm3365_vm6 = vcmp.eq.s32.totalorder %v6971_v23, 16  ;;  %vm5965_vm2 = vmpackc.low %vm2972_vm12, %vm2970_vm11  ;;  %vm3378_vm12 = vcmp.eq.s32.totalorder %v6709_v28, 16 }
 0x18e   : > { %2374 = vmatmul.mubr.f32.gmra.mrb[58].mxu1 %v6979_v24  ;;  %6013 = vmatprep.subr.bf16.mxu0 %v9000_v2 }
 0x18f   : > { %2379 = vmatprep.mubr.f32.mxu1 %v7033_v1  ;;  %5952 = vmatpush1.bf16.msk.msra.mxu1 %vm5951_vm9, %v7477_v63  ;;  %vm5962_vm9 = vmpackc.low %vm2973_vm5, %vm6290_vm3  ;;  %vm3376_vm5 = vcmp.eq.s32.totalorder %v6682_v29, 16 }
 0x190   : > { %2773 = vmatmul.mubr.f32.gmra.mrb[82].mxu0 %v6979_v24  ;;  %5953 = vmatprep.subr.bf16.mxu1 %v9000_v2 }
 0x191   : > { %2778 = vmatprep.mubr.f32.mxu0 %v7033_v1  ;;  %6016 = vmatpush1.bf16.msk.msra.mxu0 %vm6015_vm13, %v7485_v49  ;;  %vm6023_vm13 = vmpackc.low %vm3367_vm7, %vm3365_vm6 }
 0x192   : > { %2380 = vmatmul.mubr.f32.gmra.mrb[60].mxu1 %v7022_v34  ;;  %6017 = vmatprep.subr.bf16.mxu0 %v9000_v2  ;;  %vm5968_vm6 = vmpackc.low %vm2977_vm15, %vm2975_vm14  ;;  %vm2983_vm15 = vcmp.eq.s32.totalorder %v6751_v47, 15 }
 0x193   : > { %2385 = vmatprep.mubr.f32.mxu1 %v7082_v4  ;;  %5956 = vmatpush1.bf16.msk.msra.mxu1 %vm5955_vm0, %v7477_v63  ;;  %vm3369_vm0 = vcmp.eq.s32.totalorder %v7339_v26, 16 }
 0x194   : > { %2779 = vmatmul.mubr.f32.gmra.mrb[84].mxu0 %v7022_v34  ;;  %5957 = vmatprep.subr.bf16.mxu1 %v9000_v2  ;;  %vm6027_vm7 = vmpackc.low %vm3371_vm1, %vm3369_vm0  ;;  %vm2985_vm0 = vcmp.eq.s32.totalorder %v6754_v48, 15 }
 0x195   : > { %2784 = vmatprep.mubr.f32.mxu0 %v7082_v4  ;;  %6020 = vmatpush1.bf16.msk.msra.mxu0 %vm6019_vm4, %v7485_v49  ;;  %vm3374_vm4 = vcmp.eq.s32.totalorder %v6671_v25, 16 }
 0x196   : > { %2386 = vmatmul.mubr.f32.gmra.mrb[62].mxu1 %v7070_v5  ;;  %6021 = vmatprep.subr.bf16.mxu0 %v9000_v2  ;;  %vm6030_vm11 = vmpackc.low %vm3376_vm5, %vm3374_vm4  ;;  %vm3384_vm4 = vcmp.eq.s32.totalorder %v6754_v48, 16 }
 0x197   : > { %2391 = vmatprep.mubr.f32.mxu1 %v7108_v35  ;;  %5960 = vmatpush1.bf16.msk.msra.mxu1 %vm5959_vm8, %v7477_v63  ;;  %vm2979_vm8 = vcmp.eq.s32.totalorder %v6709_v28, 15  ;;  %vm5976_vm5 = vmpackc.low %vm2985_vm0, %vm2983_vm15  ;;  %vm3390_vm0 = vcmp.eq.s32.totalorder %v6788_v60, 16 }
 0x198   : > { %2785 = vmatmul.mubr.f32.gmra.mrb[86].mxu0 %v7070_v5  ;;  %5963 = vmatprep.subr.msk.bf16.mxu1 %vm5962_vm9, %v5961_v42  ;;  %vm2981_vm9 = vcmp.eq.s32.totalorder %v6718_v36, 15  ;;  %v5431_v42 = vld [vmem:[%s8927_s2 + $0x260] sm:$0xff] }
 0x199   : > { %2790 = vmatprep.mubr.f32.mxu0 %v7108_v35  ;;  %6024 = vmatpush1.bf16.msk.msra.mxu0 %vm6023_vm13, %v7485_v49  ;;  %vm3380_vm13 = vcmp.eq.s32.totalorder %v6718_v36, 16  ;;  %vm5972_vm14 = vmpackc.low %vm2981_vm9, %vm2979_vm8  ;;  %vm3386_vm9 = vcmp.eq.s32.totalorder %v9010_v57, 16 }
 0x19a   : > { %2392 = vmatmul.mubr.f32.gmra.mrb[64].mxu1 %v7106_v10  ;;  %6025 = vmatprep.subr.bf16.mxu0 %v9000_v2  ;;  %vm6034_vm1 = vmpackc.low %vm3380_vm13, %vm3378_vm12  ;;  %vm2991_vm13 = vcmp.eq.s32.totalorder %v6788_v60, 15 }
 0x19b   : > { %2397 = vmatprep.mubr.f32.mxu1 %v7124_v44  ;;  %5966 = vmatpush1.bf16.msk.msra.mxu1 %vm5965_vm2, %v7477_v63  ;;  %vm3382_vm2 = vcmp.eq.s32.totalorder %v6751_v47, 16  ;;  %v9017_v63 = vld [vmem:[#allocation12_spill] sm:$0xff] }
 0x19c   : > { %2791 = vmatmul.mubr.f32.gmra.mrb[88].mxu0 %v7106_v10  ;;  %5969 = vmatprep.subr.msk.bf16.mxu1 %vm5968_vm6, %v7581_v3  ;;  %vm2987_vm6 = vcmp.eq.s32.totalorder %v9010_v57, 15  ;;  %vm6038_vm8 = vmpackc.low %vm3384_vm4, %vm3382_vm2  ;;  %vm2995_vm4 = vcmp.eq.s32.totalorder %v6817_v17, 15 }
 0x19d   : > { %2796 = vmatprep.mubr.f32.mxu0 %v7124_v44  ;;  %6028 = vmatpush1.bf16.msk.msra.mxu0 %vm6027_vm7, %v7485_v49  ;;  %vm2989_vm7 = vcmp.eq.s32.totalorder %v9011_v20, 15  ;;  %v9018_v49 = vld [vmem:[#allocation14_spill] sm:$0xff] }
 0x19e   : > { %2398 = vmatmul.mubr.f32.gmra.mrb[66].mxu1 %v7122_v7  ;;  %6031 = vmatprep.subr.msk.bf16.mxu0 %vm6030_vm11, %v7593_v9  ;;  %vm3388_vm11 = vcmp.eq.s32.totalorder %v9011_v20, 16  ;;  %vm5980_vm12 = vmpackc.low %vm2989_vm7, %vm2987_vm6  ;;  %vm3394_vm7 = vcmp.eq.s32.totalorder %v6817_v17, 16 }
 0x19f   : > { %2403 = vmatprep.mubr.f32.mxu1 %v7140_v30  ;;  %5970 = vmatpush1.bf16.msra.mxu1 %v9000_v2  ;;  %vm6042_vm15 = vmpackc.low %vm3388_vm11, %vm3386_vm9  ;;  %vm2999_vm11 = vcmp.eq.s32.totalorder %v7199_v46, 15 }
 0x1a0   : > { %2797 = vmatmul.mubr.f32.gmra.mrb[90].mxu0 %v7122_v7  ;;  %5973 = vmatprep.subr.msk.bf16.mxu1 %vm5972_vm14, %v7581_v3  ;;  %vm2993_vm14 = vcmp.eq.s32.totalorder %v9017_v63, 15 }
 0x1a1   : > { %2802 = vmatprep.mubr.f32.mxu0 %v7140_v30  ;;  %6032 = vmatpush1.bf16.msra.mxu0 %v9000_v2  ;;  %vm5984_vm2 = vmpackc.low %vm2993_vm14, %vm2991_vm13  ;;  %vm3398_vm14 = vcmp.eq.s32.totalorder %v7199_v46, 16 }
 0x1a2   : > { %2404 = vmatmul.mubr.f32.gmra.mrb[68].mxu1 %v7138_v27  ;;  %6035 = vmatprep.subr.msk.bf16.mxu0 %vm6034_vm1, %v7593_v9  ;;  %vm3392_vm1 = vcmp.eq.s32.totalorder %v9017_v63, 16 }
 0x1a3   : > { %2409 = vmatprep.mubr.f32.mxu1 %v9009_v40  ;;  %5974 = vmatpush1.bf16.msra.mxu1 %v9000_v2  ;;  %vm6046_vm6 = vmpackc.low %vm3392_vm1, %vm3390_vm0 }
 0x1a4   : > { %2803 = vmatmul.mubr.f32.gmra.mrb[92].mxu0 %v7138_v27  ;;  %5977 = vmatprep.subr.msk.bf16.mxu1 %vm5976_vm5, %v7581_v3  ;;  %vm2997_vm5 = vcmp.eq.s32.totalorder %v9015_v18, 15 }
 0x1a5   : > { %2808 = vmatprep.mubr.f32.mxu0 %v9009_v40  ;;  %6036 = vmatpush1.bf16.msra.mxu0 %v9000_v2  ;;  %vm5988_vm9 = vmpackc.low %vm2997_vm5, %vm2995_vm4  ;;  %vm3742_vm4 = vcmp.eq.s32.totalorder %v6429_v31, 17  ;;  %v836_v31 = vpop.permute.xlu1 %835 }
 0x1a6   : > { %2410 = vmatmul.mubr.f32.gmra.mrb[70].mxu1 %v9012_v39  ;;  %6039 = vmatprep.subr.msk.bf16.mxu0 %vm6038_vm8, %v7593_v9  ;;  %vm3396_vm8 = vcmp.eq.s32.totalorder %v9015_v18, 16 }
 0x1a7   : > { %5978 = vmatpush1.bf16.msra.mxu1 %v9000_v2  ;;  %3141 = vmatprep.mubr.f32.mxu1 %v9018_v49  ;;  %vm6050_vm13 = vmpackc.low %vm3396_vm8, %vm3394_vm7  ;;  %vm3746_vm7 = vcmp.eq.s32.totalorder %v6437_v33, 17 }
 0x1a8   : > { %2809 = vmatmul.mubr.f32.gmra.mrb[94].mxu0 %v9012_v39  ;;  %5981 = vmatprep.subr.msk.bf16.mxu1 %vm5980_vm12, %v7581_v3  ;;  %vm3001_vm12 = vcmp.eq.s32.totalorder %v7202_v11, 15 }
 0x1a9   : > { %6040 = vmatpush1.bf16.msra.mxu0 %v9000_v2  ;;  %3540 = vmatprep.mubr.f32.mxu0 %v9018_v49  ;;  %v5474_v49 = vld [vmem:[%s8927_s2 + $0x2c0] sm:$0xff]  ;;  %vm5992_vm0 = vmpackc.low %vm3001_vm12, %vm2999_vm11  ;;  %vm3750_vm11 = vcmp.eq.s32.totalorder %v6451_v38, 17 }
 0x1aa   : > { %6043 = vmatprep.subr.msk.bf16.mxu0 %vm6042_vm15, %v7593_v9  ;;  %3229 = vperm.xlu1 %6175, %v5427_v6   ;;  %vm3400_vm15 = vcmp.eq.s32.totalorder %v7202_v11, 16 }
 0x1ab   : > { %5982 = vmatpush1.bf16.msra.mxu1 %v9000_v2  ;;  %3249 = vperm.xlu0 %6174, %v5431_v42   ;;  %vm6054_vm1 = vmpackc.low %vm3400_vm15, %vm3398_vm14  ;;  %vm3754_vm14 = vcmp.eq.s32.totalorder %v6482_v45, 17 }
 0x1ac   : > { %5985 = vmatprep.subr.msk.bf16.mxu1 %vm5984_vm2, %v7581_v3  ;;  %vm3740_vm2 = vcmp.eq.s32.totalorder %v6417_v22, 17  ;;  %v5514_v22 = vld [vmem:[%s8927_s2 + $0x300] sm:$0xff] }
 0x1ad   : > { %6044 = vmatpush1.bf16.msra.mxu0 %v9000_v2  ;;  %vm6061_vm5 = vmpackc.low %vm3742_vm4, %vm3740_vm2  ;;  %vm3760_vm4 = vcmp.eq.s32.totalorder %v6566_v62, 17 }
 0x1ae   : > { %6047 = vmatprep.subr.msk.bf16.mxu0 %vm6046_vm6, %v7593_v9  ;;  %3628 = vperm.xlu1 %6175, %v5470_v19   ;;  %vm3744_vm6 = vcmp.eq.s32.totalorder %v6433_v32, 17  ;;  %v1235_v32 = vpop.permute.xlu1 %1234 }
 0x1af   : > { %5986 = vmatpush1.bf16.msra.mxu1 %v9000_v2  ;;  %3648 = vperm.xlu0 %6174, %v5474_v49   ;;  %v7675_v49 = vld [vmem:[%s8928_s3 + $0x10] sm:$0x3]  ;;  %vm6065_vm8 = vmpackc.low %vm3746_vm7, %vm3744_vm6  ;;  %vm3764_vm7 = vcmp.eq.s32.totalorder %v6971_v23, 17 }
 0x1b0   : > { %5989 = vmatprep.subr.msk.bf16.mxu1 %vm5988_vm9, %v7581_v3  ;;  %v7682_v6 = vrot.slane %v7675_v49, %v6397_v8  ;;  %v5518_v8 = vld [vmem:[%s8927_s2 + $0x320] sm:$0xff]  ;;  %vm3748_vm9 = vcmp.eq.s32.totalorder %v6448_v37, 17  ;;  %v3808_v23 = vrot.slane %v7675_v49, %v6495_v50  ;;  %v856_v50 = vpop.permute.xlu0 %855 }
 0x1b1   : > { %6048 = vmatpush1.bf16.msra.mxu0 %v9000_v2  ;;  %vm6069_vm12 = vmpackc.low %vm3750_vm11, %vm3748_vm9  ;;  %vm3768_vm11 = vcmp.eq.s32.totalorder %v7339_v26, 17 }
 0x1b2   : > { %6051 = vmatprep.subr.msk.bf16.mxu0 %vm6050_vm13, %v7593_v9  ;;  %4027 = vperm.xlu1 %6175, %v5514_v22   ;;  %vm3752_vm13 = vcmp.eq.s32.totalorder %v6475_v43, 17  ;;  %v9019_v22 = vld [vmem:[#allocation9_spill] sm:$0xff] }
 0x1b3   : > { %5990 = vmatpush1.bf16.msra.mxu1 %v9000_v2  ;;  %4047 = vperm.xlu0 %6174, %v5518_v8   ;;  %vm6073_vm15 = vmpackc.low %vm3754_vm14, %vm3752_vm13  ;;  %vm3773_vm13 = vcmp.eq.s32.totalorder %v6671_v25, 17  ;;  %vm3775_vm14 = vcmp.eq.s32.totalorder %v6682_v29, 17  ;;  %v6094_v29 = vpack.c.bf16 %v8995_v16, %v7682_v6 }
 0x1b4   : > { %5993 = vmatprep.subr.msk.bf16.mxu1 %vm5992_vm0, %v7581_v3  ;;  %v7693_v3 = vpack.c.bf16 %v7682_v6, %v7682_v6  ;;  %vm3756_vm0 = vcmp.eq.s32.totalorder %v6518_v52, 17 }
 0x1b5   : > { %6052 = vmatpush1.bf16.msra.mxu0 %v9000_v2 }
 0x1b6   : > { %6055 = vmatprep.subr.msk.bf16.mxu0 %vm6054_vm1, %v7593_v9  ;;  %vm3758_vm1 = vcmp.eq.s32.totalorder %v6523_v53, 17 }
 0x1b7   : > { %5994 = vmatpush1.bf16.msra.mxu1 %v9000_v2  ;;  %vm6077_vm2 = vmpackc.low %vm3758_vm1, %vm3756_vm0 }
 0x1b8   : > { %6057 = vmatprep.subr.bf16.mxu1 %v9000_v2  ;;  %vm6092_vm0 = vmpackc.low %vm3775_vm14, %vm3773_vm13  ;;  %vm3789_vm13 = vcmp.eq.s32.totalorder %v6788_v60, 17  ;;  %vm3791_vm14 = vcmp.eq.s32.totalorder %v9017_v63, 17 }
 0x1b9   : > { %6056 = vmatpush1.bf16.msra.mxu0 %v9000_v2 }
 0x1ba   : > { %3142 = vmatmul.mubr.f32.vlgmr.msra.gmra.mrb[72].mxu1 %v6887_v41 }
 0x1bb   : > { %3147 = vmatprep.mubr.f32.mxu1 %v6909_v54  ;;  %6058 = vmatpush1.bf16.msra.mxu1 %v9000_v2 }
 0x1bc   : > { %3541 = vmatmul.mubr.f32.vlgmr.msra.gmra.mrb[96].mxu0 %v6887_v41  ;;  %6059 = vmatprep.subr.bf16.mxu1 %v9000_v2 }
 0x1bd   : > { %3546 = vmatprep.mubr.f32.mxu0 %v6909_v54 }
 0x1be   : > { %3148 = vmatmul.mubr.f32.gmra.mrb[74].mxu1 %v6907_v51 }
 0x1bf   : > { %3153 = vmatprep.mubr.f32.mxu1 %v6925_v59  ;;  %6062 = vmatpush1.bf16.msk.msra.mxu1 %vm6061_vm5, %v7693_v3  ;;  %vm3762_vm5 = vcmp.eq.s32.totalorder %v6563_v61, 17 }
 0x1c0   : > { %3547 = vmatmul.mubr.f32.gmra.mrb[98].mxu0 %v6907_v51  ;;  %6063 = vmatprep.subr.bf16.mxu1 %v9000_v2  ;;  %vm6081_vm6 = vmpackc.low %vm3762_vm5, %vm3760_vm4  ;;  %vm3779_vm4 = vcmp.eq.s32.totalorder %v6718_v36, 17 }
 0x1c1   : > { %3552 = vmatprep.mubr.f32.mxu0 %v6925_v59 }
 0x1c2   : > { %3154 = vmatmul.mubr.f32.gmra.mrb[76].mxu1 %v6923_v56 }
 0x1c3   : > { %3159 = vmatprep.mubr.f32.mxu1 %v6941_v12  ;;  %6066 = vmatpush1.bf16.msk.msra.mxu1 %vm6065_vm8, %v7693_v3  ;;  %vm3766_vm8 = vcmp.eq.s32.totalorder %v6975_v21, 17 }
 0x1c4   : > { %3553 = vmatmul.mubr.f32.gmra.mrb[100].mxu0 %v6923_v56  ;;  %6067 = vmatprep.subr.bf16.mxu1 %v9000_v2  ;;  %vm6085_vm9 = vmpackc.low %vm3766_vm8, %vm3764_vm7  ;;  %vm3781_vm7 = vcmp.eq.s32.totalorder %v6751_v47, 17  ;;  %vm3783_vm8 = vcmp.eq.s32.totalorder %v6754_v48, 17 }
 0x1c5   : > { %3558 = vmatprep.mubr.f32.mxu0 %v6941_v12 }
 0x1c6   : > { %3160 = vmatmul.mubr.f32.gmra.mrb[78].mxu1 %v6939_v0 }
 0x1c7   : > { %3165 = vmatprep.mubr.f32.mxu1 %v6957_v14  ;;  %6070 = vmatpush1.bf16.msk.msra.mxu1 %vm6069_vm12, %v7693_v3  ;;  %vm3770_vm12 = vcmp.eq.s32.totalorder %v7553_v15, 17 }
 0x1c8   : > { %3559 = vmatmul.mubr.f32.gmra.mrb[102].mxu0 %v6939_v0  ;;  %6071 = vmatprep.subr.bf16.mxu1 %v9000_v2 }
 0x1c9   : > { %3564 = vmatprep.mubr.f32.mxu0 %v6957_v14 }
 0x1ca   : > { %3166 = vmatmul.mubr.f32.gmra.mrb[80].mxu1 %v6955_v13 }
 0x1cb   : > { %3171 = vmatprep.mubr.f32.mxu1 %v6991_v58  ;;  %6074 = vmatpush1.bf16.msk.msra.mxu1 %vm6073_vm15, %v7693_v3  ;;  %vm6089_vm15 = vmpackc.low %vm3770_vm12, %vm3768_vm11  ;;  %vm3787_vm11 = vcmp.eq.s32.totalorder %v9011_v20, 17  ;;  %v9028_v20 = vld [vmem:[#allocation14_spill] sm:$0xff] }
 0x1cc   : > { %3565 = vmatmul.mubr.f32.gmra.mrb[104].mxu0 %v6955_v13  ;;  %6075 = vmatprep.subr.bf16.mxu1 %v9000_v2 }
 0x1cd   : > { %3570 = vmatprep.mubr.f32.mxu0 %v6991_v58 }
 0x1ce   : > { %3172 = vmatmul.mubr.f32.gmra.mrb[82].mxu1 %v6979_v24 }
 0x1cf   : > { %3177 = vmatprep.mubr.f32.mxu1 %v7033_v1  ;;  %6078 = vmatpush1.bf16.msk.msra.mxu1 %vm6077_vm2, %v7693_v3  ;;  %v750_v33 = vpop.f32.mrb[0].mxu1  ;;  %v1148_v37 = vpop.f32.mrb[24].mxu0  ;;  %vm3777_vm2 = vcmp.eq.s32.totalorder %v6709_v28, 17 }
 0x1d0   : > { %v893_v38 = vmul.f32 %v836_v31, %v750_v33  ;;  %v1292_v43 = vmul.f32 %v1235_v32, %v1148_v37  ;;  %3571 = vmatmul.mubr.f32.gmra.mrb[106].mxu0 %v6979_v24  ;;  %v752_v45 = vpop.f32.mrb[1].mxu1  ;;  %v1150_v52 = vpop.f32.mrb[25].mxu0  ;;  %6079 = vmatprep.subr.bf16.mxu1 %v9000_v2 }
 0x1d1   : > { %v894_v53 = vmul.f32 %v836_v31, %v752_v45  ;;  %v1293_v62 = vmul.f32 %v1235_v32, %v1150_v52  ;;  %3576 = vmatprep.mubr.f32.mxu0 %v7033_v1  ;;  %v516_v31 = vsub.s32 %v9019_v22, %v9007_v55  ;;  %v7781_v55 = vpack.c.bf16 %v3808_v23, %v3808_v23 }
 0x1d2   : > { %v7746_v61 = vadd.f32 %v1292_v43, %v893_v38  ;;  %3178 = vmatmul.mubr.f32.gmra.mrb[84].mxu1 %v7022_v34 }
 0x1d3   : > { %v7749_v9 = vadd.f32 %v1293_v62, %v894_v53  ;;  %3183 = vmatprep.mubr.f32.mxu1 %v7082_v4  ;;  %6082 = vmatpush1.bf16.msk.msra.mxu1 %vm6081_vm6, %v7693_v3  ;;  %v7753_v42 = vpop.f32.mrb[2].mxu1  ;;  %v7755_v19 = vpop.f32.mrb[26].mxu0  ;;  %vm3772_vm1 = vcmp.eq.s32.totalorder %v516_v31, 17  ;;  %vm6098_vm6 = vmpackc.low %vm3779_vm4, %vm3777_vm2  ;;  %vm3797_vm4 = vcmp.eq.s32.totalorder %v7199_v46, 17 }
 0x1d4   : > { %3577 = vmatmul.mubr.f32.gmra.mrb[108].mxu0 %v7022_v34  ;;  %6083 = vmatprep.subr.bf16.mxu1 %v9000_v2  ;;  %v7761_v21 = vpop.f32.mrb[3].mxu1  ;;  %v7763_v8 = vpop.f32.mrb[27].mxu0  ;;  %vm6095_vm5 = vmpackc.low %vm6290_vm3, %vm3772_vm1  ;;  %vm3795_vm1 = vcmp.eq.s32.totalorder %v9015_v18, 17 }
 0x1d5   : > { %3582 = vmatprep.mubr.f32.mxu0 %v7082_v4  ;;  %vm6102_vm3 = vmpackc.low %vm3783_vm8, %vm3781_vm7 }
 0x1d6   : > { %3184 = vmatmul.mubr.f32.gmra.mrb[86].mxu1 %v7070_v5 }
 0x1d7   : > { %3189 = vmatprep.mubr.f32.mxu1 %v7108_v35  ;;  %6086 = vmatpush1.bf16.msk.msra.mxu1 %vm6085_vm9, %v7693_v3  ;;  %v7775_v49 = vpop.f32.mrb[4].mxu1  ;;  %v7777_v32 = vpop.f32.mrb[28].mxu0  ;;  %vm3785_vm9 = vcmp.eq.s32.totalorder %v9010_v57, 17 }
 0x1d8   : > { %9020 = vst [vmem:[#allocation6_spill] sm:$0xff] %v7775_v49  ;;  %9021 = vst [vmem:[#allocation7_spill] sm:$0xff] %v7777_v32  ;;  %3583 = vmatmul.mubr.f32.gmra.mrb[110].mxu0 %v7070_v5  ;;  %6087 = vmatprep.subr.bf16.mxu1 %v9000_v2  ;;  %v7783_v26 = vpop.f32.mrb[5].mxu1  ;;  %v7785_v25 = vpop.f32.mrb[29].mxu0 }
 0x1d9   : > { %9022 = vst [vmem:[#allocation16_spill] sm:$0xff] %v7783_v26  ;;  %9023 = vst [vmem:[#allocation10_spill] sm:$0xff] %v7785_v25  ;;  %3588 = vmatprep.mubr.f32.mxu0 %v7108_v35 }
 0x1da   : > { %3190 = vmatmul.mubr.f32.gmra.mrb[88].mxu1 %v7106_v10  ;;  %vm6106_vm12 = vmpackc.low %vm3787_vm11, %vm3785_vm9  ;;  %vm4246_vm11 = vcmask 64512  }
 0x1db   : > { %3195 = vmatprep.mubr.f32.mxu1 %v7124_v44  ;;  %6090 = vmatpush1.bf16.msk.msra.mxu1 %vm6089_vm15, %v7693_v3  ;;  %v7795_v15 = vpop.f32.mrb[6].mxu1  ;;  %v7797_v33 = vpop.f32.mrb[30].mxu0  ;;  %vm6110_vm15 = vmpackc.low %vm3791_vm14, %vm3789_vm13 }
 0x1dc   : > { %9024 = vst [vmem:[#allocation11_spill] sm:$0xff] %v7795_v15  ;;  %9025 = vst [vmem:[#allocation15_spill] sm:$0xff] %v7797_v33  ;;  %3589 = vmatmul.mubr.f32.gmra.mrb[112].mxu0 %v7106_v10  ;;  %6093 = vmatprep.subr.msk.bf16.mxu1 %vm6092_vm0, %v7781_v55  ;;  %v7802_v28 = vpop.f32.mrb[7].mxu1  ;;  %v7804_v36 = vpop.f32.mrb[31].mxu0  ;;  %vm3793_vm0 = vcmp.eq.s32.totalorder %v6817_v17, 17 }
 0x1dd   : > { %9026 = vst [vmem:[#allocation13_spill] sm:$0xff] %v7802_v28  ;;  %9027 = vst [vmem:[#allocation8_spill] sm:$0xff] %v7804_v36  ;;  %3594 = vmatprep.mubr.f32.mxu0 %v7124_v44  ;;  %v1255_v3 = vpop.permute.xlu0 %1254 }
 0x1de   : > { %3196 = vmatmul.mubr.f32.gmra.mrb[90].mxu1 %v7122_v7  ;;  %vm6114_vm2 = vmpackc.low %vm3795_vm1, %vm3793_vm0 }
 0x1df   : > { %3201 = vmatprep.mubr.f32.mxu1 %v7140_v30  ;;  %6096 = vmatpush1.bf16.msk.msra.mxu1 %vm6095_vm5, %v6094_v29  ;;  %v774_v6 = vpop.f32.mrb[8].mxu1  ;;  %v1172_v37 = vpop.f32.mrb[32].mxu0  ;;  %vm3799_vm5 = vcmp.eq.s32.totalorder %v7202_v11, 17 }
 0x1e0   : > { %3595 = vmatmul.mubr.f32.gmra.mrb[114].mxu0 %v7122_v7  ;;  %6099 = vmatprep.subr.msk.bf16.mxu1 %vm6098_vm6, %v7781_v55  ;;  %v901_v38 = vmul.f32 %v856_v50, %v774_v6  ;;  %v1300_v43 = vmul.f32 %v1255_v3, %v1172_v37  ;;  %v776_v45 = vpop.f32.mrb[9].mxu1  ;;  %v1174_v52 = vpop.f32.mrb[33].mxu0  ;;  %vm6118_vm6 = vmpackc.low %vm3799_vm5, %vm3797_vm4 }
 0x1e1   : > { %3600 = vmatprep.mubr.f32.mxu0 %v7140_v30  ;;  %v902_v53 = vmul.f32 %v856_v50, %v776_v45  ;;  %v1301_v47 = vmul.f32 %v1255_v3, %v1174_v52 }
 0x1e2   : > { %3202 = vmatmul.mubr.f32.gmra.mrb[92].mxu1 %v7138_v27  ;;  %v7817_v48 = vadd.f32 %v1300_v43, %v901_v38 }
 0x1e3   : > { %3207 = vmatprep.mubr.f32.mxu1 %v9009_v40  ;;  %6100 = vmatpush1.bf16.msra.mxu1 %v9000_v2  ;;  %v7821_v62 = vadd.f32 %v1301_v47, %v902_v53  ;;  %v7823_v23 = vpop.f32.mrb[10].mxu1  ;;  %v7825_v22 = vpop.f32.mrb[34].mxu0 }
 0x1e4   : > { %3601 = vmatmul.mubr.f32.gmra.mrb[116].mxu0 %v7138_v27  ;;  %6103 = vmatprep.subr.msk.bf16.mxu1 %vm6102_vm3, %v7781_v55  ;;  %v7829_v31 = vpop.f32.mrb[11].mxu1  ;;  %v7831_v57 = vpop.f32.mrb[35].mxu0 }
 0x1e5   : > { %3606 = vmatprep.mubr.f32.mxu0 %v9009_v40 }
 0x1e6   : > { %3208 = vmatmul.mubr.f32.gmra.mrb[94].mxu1 %v9012_v39 }
 0x1e7   : > { %6104 = vmatpush1.bf16.msra.mxu1 %v9000_v2  ;;  %3939 = vmatprep.mubr.f32.mxu1 %v9028_v20  ;;  %v7839_v50 = vpop.f32.mrb[12].mxu1  ;;  %v7841_v29 = vpop.f32.mrb[36].mxu0 }
 0x1e8   : > { %9029 = vst [vmem:[#allocation12_spill] sm:$0xff] %v7839_v50  ;;  %9030 = vst [vmem:[#allocation9_spill] sm:$0xff] %v7841_v29  ;;  %3607 = vmatmul.mubr.f32.gmra.mrb[118].mxu0 %v9012_v39  ;;  %6107 = vmatprep.subr.msk.bf16.mxu1 %vm6106_vm12, %v7781_v55  ;;  %v7845_v3 = vpop.f32.mrb[13].mxu1  ;;  %v7847_v6 = vpop.f32.mrb[37].mxu0 }
 0x1e9   : > { %9031 = vst [vmem:[#allocation14_spill] sm:$0xff] %v7845_v3  ;;  %9032 = vst [vmem:[#allocation17_spill] sm:$0xff] %v7847_v6 }
 0x1eb   : > { %6108 = vmatpush1.bf16.msra.mxu1 %v9000_v2  ;;  %v7852_v60 = vpop.f32.mrb[14].mxu1  ;;  %v7854_v63 = vpop.f32.mrb[38].mxu0 }
 0x1ec   : > { %9033 = vst [vmem:[#allocation18_spill] sm:$0xff] %v7852_v60  ;;  %9034 = vst [vmem:[#allocation19_spill] sm:$0xff] %v7854_v63  ;;  %6111 = vmatprep.subr.msk.bf16.mxu1 %vm6110_vm15, %v7781_v55  ;;  %v7857_v37 = vpop.f32.mrb[15].mxu1  ;;  %v7859_v38 = vpop.f32.mrb[39].mxu0 }
 0x1ed   : > { %9035 = vst [vmem:[#allocation20_spill] sm:$0xff] %v7857_v37  ;;  %9036 = vst [vmem:[#allocation21_spill] sm:$0xff] %v7859_v38 }
 0x1ef   : > { %6112 = vmatpush1.bf16.msra.mxu1 %v9000_v2  ;;  %v7864_v17 = vpop.f32.mrb[16].mxu1  ;;  %v7866_v18 = vpop.f32.mrb[40].mxu0 }
 0x1f0   : > { %9037 = vst [vmem:[#allocation22_spill] sm:$0xff] %v7864_v17  ;;  %9038 = vst [vmem:[#allocation23_spill] sm:$0xff] %v7866_v18  ;;  %6115 = vmatprep.subr.msk.bf16.mxu1 %vm6114_vm2, %v7781_v55  ;;  %v7869_v43 = vpop.f32.mrb[17].mxu1  ;;  %v7871_v45 = vpop.f32.mrb[41].mxu0 }
 0x1f1   : > { %9039 = vst [vmem:[#allocation24_spill] sm:$0xff] %v7869_v43  ;;  %9040 = vst [vmem:[#allocation25_spill] sm:$0xff] %v7871_v45 }
 0x1f3   : > { %6116 = vmatpush1.bf16.msra.mxu1 %v9000_v2  ;;  %v7874_v52 = vpop.f32.mrb[18].mxu1  ;;  %v7876_v46 = vpop.f32.mrb[42].mxu0 }
 0x1f4   : > { %9041 = vst [vmem:[#allocation26_spill] sm:$0xff] %v7874_v52  ;;  %9042 = vst [vmem:[#allocation27_spill] sm:$0xff] %v7876_v46  ;;  %6119 = vmatprep.subr.msk.bf16.mxu1 %vm6118_vm6, %v7781_v55  ;;  %v7879_v11 = vpop.f32.mrb[19].mxu1  ;;  %v7881_v53 = vpop.f32.mrb[43].mxu0 }
 0x1f5   : > { %9043 = vst [vmem:[#allocation28_spill] sm:$0xff] %v7879_v11  ;;  %9044 = vst [vmem:[#allocation29_spill] sm:$0xff] %v7881_v53 }
 0x1f7   : > { %6120 = vmatpush1.bf16.msra.mxu1 %v9000_v2  ;;  %v7884_v47 = vpop.f32.mrb[20].mxu1  ;;  %v7886_v20 = vpop.f32.mrb[44].mxu0 }
 0x1f8   : > { %9045 = vst [vmem:[#allocation30_spill] sm:$0xff] %v7884_v47  ;;  %9046 = vst [vmem:[#allocation31_spill] sm:$0xff] %v7886_v20  ;;  %v7888_v38 = vpop.f32.mrb[21].mxu1  ;;  %v7890_v63 = vpop.f32.mrb[45].mxu0 }
 0x1f9   : > { %9047 = vst [vmem:[#allocation32_spill] sm:$0xff] %v7888_v38  ;;  %9048 = vst [vmem:[#allocation33_spill] sm:$0xff] %v7890_v63 }
 0x1fa   : > { %3940 = vmatmul.mubr.f32.vlgmr.msra.gmra.mrb[96].mxu1 %v6887_v41  ;;  %v1634_v41 = vpop.permute.xlu1 %1633 }
 0x1fb   : > { %3945 = vmatprep.mubr.f32.mxu1 %v6909_v54  ;;  %v7894_v37 = vpop.f32.mrb[22].mxu1  ;;  %v7896_v55 = vpop.f32.mrb[46].mxu0 }
 0x1fc   : > { %9049 = vst [vmem:[#allocation34_spill] sm:$0xff] %v7894_v37  ;;  %9050 = vst [vmem:[#allocation35_spill] sm:$0xff] %v7896_v55  ;;  %v7898_v60 = vpop.f32.mrb[23].mxu1  ;;  %v7900_v36 = vpop.f32.mrb[47].mxu0 }
 0x1fd   : > { %9051 = vst [vmem:[#allocation36_spill] sm:$0xff] %v7898_v60  ;;  %9052 = vst [vmem:[#allocation37_spill] sm:$0xff] %v7900_v36 }
 0x1fe   : > { %3946 = vmatmul.mubr.f32.gmra.mrb[98].mxu1 %v6907_v51  ;;  %v2033_v2 = vpop.permute.xlu1 %2032 }
 0x1ff   : > { %3951 = vmatprep.mubr.f32.mxu1 %v6925_v59 }
 0x202   : > { %3952 = vmatmul.mubr.f32.gmra.mrb[100].mxu1 %v6923_v56  ;;  %v2432_v33 = vpop.permute.xlu1 %2431 }
 0x203   : > { %3957 = vmatprep.mubr.f32.mxu1 %v6941_v12 }
 0x206   : > { %3958 = vmatmul.mubr.f32.gmra.mrb[102].mxu1 %v6939_v0  ;;  %v2831_v15 = vpop.permute.xlu1 %2830 }
 0x207   : > { %3963 = vmatprep.mubr.f32.mxu1 %v6957_v14 }
 0x20a   : > { %3964 = vmatmul.mubr.f32.gmra.mrb[104].mxu1 %v6955_v13 }
 0x20b   : > { %3969 = vmatprep.mubr.f32.mxu1 %v6991_v58 }
 0x20d   : > { %v1547_v54 = vpop.f32.mrb[24].mxu1 }
 0x20e   : > { %v1691_v36 = vmul.f32 %v1634_v41, %v1547_v54  ;;  %v1549_v55 = vpop.f32.mrb[25].mxu1  ;;  %3970 = vmatmul.mubr.f32.gmra.mrb[106].mxu1 %v6979_v24 }
 0x20f   : > { %v1692_v51 = vmul.f32 %v1634_v41, %v1549_v55  ;;  %v1946_v59 = vpop.f32.mrb[48].mxu0  ;;  %3975 = vmatprep.mubr.f32.mxu1 %v7033_v1  ;;  %v1654_v41 = vpop.permute.xlu0 %1653 }
 0x210   : > { %v1715_v56 = vadd.f32 %v1691_v36, %v7746_v61  ;;  %v2090_v0 = vmul.f32 %v2033_v2, %v1946_v59  ;;  %v1948_v12 = vpop.f32.mrb[49].mxu0 }
 0x211   : > { %v1716_v14 = vadd.f32 %v1692_v51, %v7749_v9  ;;  %v2091_v60 = vmul.f32 %v2033_v2, %v1948_v12  ;;  %v7914_v13 = vpop.f32.mrb[26].mxu1 }
 0x212   : > { %v7916_v58 = vadd.f32 %v2090_v0, %v1715_v56  ;;  %v7918_v37 = vpop.f32.mrb[27].mxu1  ;;  %3976 = vmatmul.mubr.f32.gmra.mrb[108].mxu1 %v7022_v34 }
 0x213   : > { %v7921_v24 = vadd.f32 %v2091_v60, %v1716_v14  ;;  %v7923_v55 = vpop.f32.mrb[50].mxu0  ;;  %3981 = vmatprep.mubr.f32.mxu1 %v7082_v4  ;;  %v2053_v51 = vpop.permute.xlu0 %2052 }
 0x214   : > { %v7926_v1 = vpop.f32.mrb[51].mxu0 }
 0x215   : > { %v7928_v61 = vpop.f32.mrb[28].mxu1 }
 0x216   : > { %9053 = vst [vmem:[#allocation38_spill] sm:$0xff] %v7928_v61  ;;  %v7930_v9 = vpop.f32.mrb[29].mxu1  ;;  %3982 = vmatmul.mubr.f32.gmra.mrb[110].mxu1 %v7070_v5 }
 0x217   : > { %9054 = vst [vmem:[#allocation39_spill] sm:$0xff] %v7930_v9  ;;  %v7933_v36 = vpop.f32.mrb[52].mxu0  ;;  %3987 = vmatprep.mubr.f32.mxu1 %v7108_v35 }
 0x218   : > { %9055 = vst [vmem:[#allocation40_spill] sm:$0xff] %v7933_v36  ;;  %v7936_v34 = vpop.f32.mrb[53].mxu0 }
 0x219   : > { %9056 = vst [vmem:[#allocation41_spill] sm:$0xff] %v7936_v34  ;;  %v7938_v60 = vpop.f32.mrb[30].mxu1 }
 0x21a   : > { %9057 = vst [vmem:[#allocation42_spill] sm:$0xff] %v7938_v60  ;;  %v7940_v54 = vpop.f32.mrb[31].mxu1  ;;  %3988 = vmatmul.mubr.f32.gmra.mrb[112].mxu1 %v7106_v10 }
 0x21b   : > { %9058 = vst [vmem:[#allocation43_spill] sm:$0xff] %v7940_v54  ;;  %v7943_v4 = vpop.f32.mrb[54].mxu0  ;;  %3993 = vmatprep.mubr.f32.mxu1 %v7124_v44 }
 0x21c   : > { %9059 = vst [vmem:[#allocation44_spill] sm:$0xff] %v7943_v4  ;;  %v7946_v2 = vpop.f32.mrb[55].mxu0 }
 0x21d   : > { %9060 = vst [vmem:[#allocation45_spill] sm:$0xff] %v7946_v2  ;;  %v1571_v5 = vpop.f32.mrb[32].mxu1 }
 0x21e   : > { %v1699_v59 = vmul.f32 %v1654_v41, %v1571_v5  ;;  %v1573_v56 = vpop.f32.mrb[33].mxu1  ;;  %3994 = vmatmul.mubr.f32.gmra.mrb[114].mxu1 %v7122_v7 }
 0x21f   : > { %v1700_v35 = vmul.f32 %v1654_v41, %v1573_v56  ;;  %v1970_v0 = vpop.f32.mrb[56].mxu0  ;;  %3999 = vmatprep.mubr.f32.mxu1 %v7140_v30 }
 0x220   : > { %v1723_v12 = vadd.f32 %v1699_v59, %v7817_v48  ;;  %v2098_v14 = vmul.f32 %v2053_v51, %v1970_v0  ;;  %v1972_v10 = vpop.f32.mrb[57].mxu0 }
 0x221   : > { %v1724_v38 = vadd.f32 %v1700_v35, %v7821_v62  ;;  %v2099_v47 = vmul.f32 %v2053_v51, %v1972_v10  ;;  %v7952_v44 = vpop.f32.mrb[34].mxu1 }
 0x222   : > { %v7954_v63 = vadd.f32 %v2098_v14, %v1723_v12  ;;  %v7956_v20 = vpop.f32.mrb[35].mxu1  ;;  %4000 = vmatmul.mubr.f32.gmra.mrb[116].mxu1 %v7138_v27 }
 0x223   : > { %v7959_v7 = vadd.f32 %v2099_v47, %v1724_v38  ;;  %v7961_v41 = vpop.f32.mrb[58].mxu0  ;;  %4005 = vmatprep.mubr.f32.mxu1 %v9009_v40 }
 0x224   : > { %v7964_v30 = vpop.f32.mrb[59].mxu0 }
 0x225   : > { %v7966_v48 = vpop.f32.mrb[36].mxu1 }
 0x226   : > { %9061 = vst [vmem:[#allocation46_spill] sm:$0xff] %v7966_v48  ;;  %v7968_v62 = vpop.f32.mrb[37].mxu1  ;;  %4006 = vmatmul.mubr.f32.gmra.mrb[118].mxu1 %v9012_v39 }
 0x227   : > { %9062 = vst [vmem:[#allocation47_spill] sm:$0xff] %v7968_v62  ;;  %v7971_v5 = vpop.f32.mrb[60].mxu0 }
 0x228   : > { %9063 = vst [vmem:[#allocation48_spill] sm:$0xff] %v7971_v5  ;;  %v7973_v51 = vpop.f32.mrb[61].mxu0 }
 0x229   : > { %9064 = vst [vmem:[#allocation49_spill] sm:$0xff] %v7973_v51  ;;  %v7975_v59 = vpop.f32.mrb[38].mxu1 }
 0x22a   : > { %9065 = vst [vmem:[#allocation50_spill] sm:$0xff] %v7975_v59  ;;  %v7977_v27 = vpop.f32.mrb[39].mxu1 }
 0x22b   : > { %9066 = vst [vmem:[#allocation51_spill] sm:$0xff] %v7977_v27  ;;  %v7979_v38 = vpop.f32.mrb[62].mxu0 }
 0x22c   : > { %9067 = vst [vmem:[#allocation52_spill] sm:$0xff] %v7979_v38  ;;  %v7981_v47 = vpop.f32.mrb[63].mxu0 }
 0x22d   : > { %9068 = vst [vmem:[#allocation53_spill] sm:$0xff] %v7981_v47  ;;  %v7983_v40 = vpop.f32.mrb[40].mxu1 }
 0x22e   : > { %9069 = vst [vmem:[#allocation54_spill] sm:$0xff] %v7983_v40  ;;  %v7985_v56 = vpop.f32.mrb[41].mxu1 }
 0x22f   : > { %9070 = vst [vmem:[#allocation55_spill] sm:$0xff] %v7985_v56  ;;  %v7987_v35 = vpop.f32.mrb[64].mxu0 }
 0x230   : > { %9071 = vst [vmem:[#allocation56_spill] sm:$0xff] %v7987_v35  ;;  %v7989_v0 = vpop.f32.mrb[65].mxu0 }
 0x231   : > { %9072 = vst [vmem:[#allocation57_spill] sm:$0xff] %v7989_v0  ;;  %v7991_v39 = vpop.f32.mrb[42].mxu1 }
 0x232   : > { %9073 = vst [vmem:[#allocation58_spill] sm:$0xff] %v7991_v39  ;;  %v7993_v12 = vpop.f32.mrb[43].mxu1 }
 0x233   : > { %9074 = vst [vmem:[#allocation59_spill] sm:$0xff] %v7993_v12  ;;  %v7995_v14 = vpop.f32.mrb[66].mxu0 }
 0x234   : > { %9075 = vst [vmem:[#allocation60_spill] sm:$0xff] %v7995_v14  ;;  %v7997_v10 = vpop.f32.mrb[67].mxu0 }
 0x235   : > { %9076 = vst [vmem:[#allocation61_spill] sm:$0xff] %v7997_v10  ;;  %v7999_v27 = vpop.f32.mrb[44].mxu1 }
 0x236   : > { %9077 = vst [vmem:[#allocation62_spill] sm:$0xff] %v7999_v27  ;;  %v8001_v38 = vpop.f32.mrb[45].mxu1 }
 0x237   : > { %9078 = vst [vmem:[#allocation63_spill] sm:$0xff] %v8001_v38  ;;  %v8003_v47 = vpop.f32.mrb[68].mxu0 }
 0x238   : > { %9079 = vst [vmem:[#allocation64_spill] sm:$0xff] %v8003_v47  ;;  %v8005_v59 = vpop.f32.mrb[69].mxu0 }
 0x239   : > { %9080 = vst [vmem:[#allocation65_spill] sm:$0xff] %v8005_v59  ;;  %v8007_v2 = vpop.f32.mrb[46].mxu1 }
 0x23a   : > { %9081 = vst [vmem:[#allocation66_spill] sm:$0xff] %v8007_v2  ;;  %v8009_v4 = vpop.f32.mrb[47].mxu1 }
 0x23b   : > { %9082 = vst [vmem:[#allocation67_spill] sm:$0xff] %v8009_v4  ;;  %v8011_v54 = vpop.f32.mrb[70].mxu0 }
 0x23c   : > { %9083 = vst [vmem:[#allocation68_spill] sm:$0xff] %v8011_v54  ;;  %v8013_v60 = vpop.f32.mrb[71].mxu0 }
 0x23d   : > { %9084 = vst [vmem:[#allocation69_spill] sm:$0xff] %v8013_v60 }
 0x24d   : > { %v2345_v28 = vpop.f32.mrb[48].mxu1 }
 0x24e   : > { %v2489_v10 = vmul.f32 %v2432_v33, %v2345_v28  ;;  %v2347_v14 = vpop.f32.mrb[49].mxu1 }
 0x24f   : > { %v2490_v27 = vmul.f32 %v2432_v33, %v2347_v14  ;;  %v2744_v12 = vpop.f32.mrb[72].mxu0 }
 0x250   : > { %v2513_v38 = vadd.f32 %v2489_v10, %v7916_v58  ;;  %v2888_v47 = vmul.f32 %v2831_v15, %v2744_v12  ;;  %v2746_v39 = vpop.f32.mrb[73].mxu0  ;;  %v2452_v12 = vpop.permute.xlu0 %2451 }
 0x251   : > { %v2514_v59 = vadd.f32 %v2490_v27, %v7921_v24  ;;  %v2889_v2 = vmul.f32 %v2831_v15, %v2746_v39  ;;  %v8017_v53 = vpop.f32.mrb[50].mxu1 }
 0x252   : > { %v2912_v4 = vadd.f32 %v2888_v47, %v2513_v38  ;;  %v8019_v54 = vpop.f32.mrb[51].mxu1 }
 0x253   : > { %v8021_v60 = vadd.f32 %v2889_v2, %v2514_v59  ;;  %v8023_v46 = vpop.f32.mrb[74].mxu0 }
 0x254   : > { %v8025_v28 = vpop.f32.mrb[75].mxu0  ;;  %v2851_v47 = vpop.permute.xlu0 %2850 }
 0x255   : > { %v8027_v33 = vpop.f32.mrb[52].mxu1 }
 0x256   : > { %9085 = vst [vmem:[#allocation70_spill] sm:$0xff] %v8027_v33  ;;  %v8029_v14 = vpop.f32.mrb[53].mxu1 }
 0x257   : > { %9086 = vst [vmem:[#allocation71_spill] sm:$0xff] %v8029_v14  ;;  %v8031_v58 = vpop.f32.mrb[76].mxu0 }
 0x258   : > { %9087 = vst [vmem:[#allocation72_spill] sm:$0xff] %v8031_v58  ;;  %v8033_v24 = vpop.f32.mrb[77].mxu0 }
 0x259   : > { %9088 = vst [vmem:[#allocation73_spill] sm:$0xff] %v8033_v24  ;;  %v8035_v15 = vpop.f32.mrb[54].mxu1 }
 0x25a   : > { %9089 = vst [vmem:[#allocation74_spill] sm:$0xff] %v8035_v15  ;;  %v8037_v27 = vpop.f32.mrb[55].mxu1 }
 0x25b   : > { %9090 = vst [vmem:[#allocation75_spill] sm:$0xff] %v8037_v27  ;;  %v8039_v38 = vpop.f32.mrb[78].mxu0 }
 0x25c   : > { %9091 = vst [vmem:[#allocation76_spill] sm:$0xff] %v8039_v38  ;;  %v8041_v2 = vpop.f32.mrb[79].mxu0 }
 0x25d   : > { %9092 = vst [vmem:[#allocation77_spill] sm:$0xff] %v8041_v2  ;;  %v2369_v59 = vpop.f32.mrb[56].mxu1 }
 0x25e   : > { %v2497_v39 = vmul.f32 %v2452_v12, %v2369_v59  ;;  %v2371_v10 = vpop.f32.mrb[57].mxu1 }
 0x25f   : > { %v2498_v11 = vmul.f32 %v2452_v12, %v2371_v10  ;;  %v2768_v52 = vpop.f32.mrb[80].mxu0 }
 0x260   : > { %v2521_v14 = vadd.f32 %v2497_v39, %v7954_v63  ;;  %v2896_v58 = vmul.f32 %v2851_v47, %v2768_v52  ;;  %v2770_v33 = vpop.f32.mrb[81].mxu0 }
 0x261   : > { %v2522_v24 = vadd.f32 %v2498_v11, %v7959_v7  ;;  %v2897_v26 = vmul.f32 %v2851_v47, %v2770_v33  ;;  %v8045_v15 = vpop.f32.mrb[58].mxu1 }
 0x262   : > { %v2920_v27 = vadd.f32 %v2896_v58, %v2521_v14  ;;  %v8047_v49 = vpop.f32.mrb[59].mxu1 }
 0x263   : > { %v8049_v38 = vadd.f32 %v2897_v26, %v2522_v24  ;;  %v8051_v2 = vpop.f32.mrb[82].mxu0 }
 0x264   : > { %v8053_v59 = vpop.f32.mrb[83].mxu0 }
 0x265   : > { %v8055_v12 = vpop.f32.mrb[60].mxu1 }
 0x266   : > { %9093 = vst [vmem:[#allocation78_spill] sm:$0xff] %v8055_v12  ;;  %v8057_v10 = vpop.f32.mrb[61].mxu1 }
 0x267   : > { %9094 = vst [vmem:[#allocation79_spill] sm:$0xff] %v8057_v10  ;;  %v8059_v63 = vpop.f32.mrb[84].mxu0 }
 0x268   : > { %9095 = vst [vmem:[#allocation80_spill] sm:$0xff] %v8059_v63  ;;  %v8061_v52 = vpop.f32.mrb[85].mxu0 }
 0x269   : > { %9096 = vst [vmem:[#allocation81_spill] sm:$0xff] %v8061_v52  ;;  %v8063_v11 = vpop.f32.mrb[62].mxu1 }
 0x26a   : > { %9097 = vst [vmem:[#allocation82_spill] sm:$0xff] %v8063_v11  ;;  %v8065_v7 = vpop.f32.mrb[63].mxu1 }
 0x26b   : > { %9098 = vst [vmem:[#allocation83_spill] sm:$0xff] %v8065_v7  ;;  %v8067_v33 = vpop.f32.mrb[86].mxu0 }
 0x26c   : > { %9099 = vst [vmem:[#allocation84_spill] sm:$0xff] %v8067_v33  ;;  %v8069_v26 = vpop.f32.mrb[87].mxu0 }
 0x26d   : > { %9100 = vst [vmem:[#allocation85_spill] sm:$0xff] %v8069_v26  ;;  %v8071_v14 = vpop.f32.mrb[64].mxu1 }
 0x26e   : > { %9101 = vst [vmem:[#allocation86_spill] sm:$0xff] %v8071_v14  ;;  %v8073_v58 = vpop.f32.mrb[65].mxu1 }
 0x26f   : > { %9102 = vst [vmem:[#allocation87_spill] sm:$0xff] %v8073_v58  ;;  %v8075_v24 = vpop.f32.mrb[88].mxu0 }
 0x270   : > { %9103 = vst [vmem:[#allocation88_spill] sm:$0xff] %v8075_v24  ;;  %v8077_v47 = vpop.f32.mrb[89].mxu0 }
 0x271   : > { %9104 = vst [vmem:[#allocation89_spill] sm:$0xff] %v8077_v47  ;;  %v8079_v39 = vpop.f32.mrb[66].mxu1 }
 0x272   : > { %9105 = vst [vmem:[#allocation90_spill] sm:$0xff] %v8079_v39  ;;  %v8081_v63 = vpop.f32.mrb[67].mxu1 }
 0x273   : > { %9106 = vst [vmem:[#allocation91_spill] sm:$0xff] %v8081_v63  ;;  %v8083_v52 = vpop.f32.mrb[90].mxu0  ;;  %v3230_v63 = vpop.permute.xlu1 %3229 }
 0x274   : > { %9107 = vst [vmem:[#allocation92_spill] sm:$0xff] %v8083_v52  ;;  %v8085_v11 = vpop.f32.mrb[91].mxu0 }
 0x275   : > { %9108 = vst [vmem:[#allocation93_spill] sm:$0xff] %v8085_v11  ;;  %v8087_v7 = vpop.f32.mrb[68].mxu1 }
 0x276   : > { %9109 = vst [vmem:[#allocation94_spill] sm:$0xff] %v8087_v7  ;;  %v8089_v33 = vpop.f32.mrb[69].mxu1 }
 0x277   : > { %9110 = vst [vmem:[#allocation95_spill] sm:$0xff] %v8089_v33  ;;  %v8091_v26 = vpop.f32.mrb[92].mxu0  ;;  %v3629_v51 = vpop.permute.xlu1 %3628 }
 0x278   : > { %9111 = vst [vmem:[#allocation96_spill] sm:$0xff] %v8091_v26  ;;  %v8093_v10 = vpop.f32.mrb[93].mxu0 }
 0x279   : > { %9112 = vst [vmem:[#allocation97_spill] sm:$0xff] %v8093_v10  ;;  %v8095_v12 = vpop.f32.mrb[70].mxu1 }
 0x27a   : > { %9113 = vst [vmem:[#allocation98_spill] sm:$0xff] %v8095_v12  ;;  %v8097_v34 = vpop.f32.mrb[71].mxu1 }
 0x27b   : > { %9114 = vst [vmem:[#allocation99_spill] sm:$0xff] %v8097_v34  ;;  %v8099_v36 = vpop.f32.mrb[94].mxu0 }
 0x27c   : > { %9115 = vst [vmem:[#allocation100_spill] sm:$0xff] %v8099_v36  ;;  %v8101_v39 = vpop.f32.mrb[95].mxu0 }
 0x27d   : > { %9116 = vst [vmem:[#allocation101_spill] sm:$0xff] %v8101_v39 }
 0x28d   : > { %v3143_v52 = vpop.f32.mrb[72].mxu1 }
 0x28e   : > { %v3287_v11 = vmul.f32 %v3230_v63, %v3143_v52  ;;  %v3145_v5 = vpop.f32.mrb[73].mxu1 }
 0x28f   : > { %v3288_v7 = vmul.f32 %v3230_v63, %v3145_v5  ;;  %v3542_v9 = vpop.f32.mrb[96].mxu0 }
 0x290   : > { %v3311_v33 = vadd.f32 %v3287_v11, %v2912_v4  ;;  %v3686_v61 = vmul.f32 %v3629_v51, %v3542_v9  ;;  %v3544_v26 = vpop.f32.mrb[97].mxu0  ;;  %v3250_v9 = vpop.permute.xlu0 %3249 }
 0x291   : > { %v3312_v10 = vadd.f32 %v3288_v7, %v8021_v60  ;;  %v3687_v62 = vmul.f32 %v3629_v51, %v3544_v26  ;;  %v8104_v12 = vpop.f32.mrb[74].mxu1 }
 0x292   : > { %v3710_v34 = vadd.f32 %v3686_v61, %v3311_v33  ;;  %v8106_v48 = vpop.f32.mrb[75].mxu1 }
 0x293   : > { %v3711_v36 = vadd.f32 %v3687_v62, %v3312_v10  ;;  %v8108_v39 = vpop.f32.mrb[98].mxu0 }
 0x294   : > { %v8110_v25 = vpop.f32.mrb[99].mxu0  ;;  %v3649_v11 = vpop.permute.xlu0 %3648 }
 0x295   : > { %v8112_v52 = vpop.f32.mrb[76].mxu1 }
 0x296   : > { %9117 = vst [vmem:[#allocation102_spill] sm:$0xff] %v8112_v52  ;;  %v8114_v5 = vpop.f32.mrb[77].mxu1 }
 0x297   : > { %9118 = vst [vmem:[#allocation103_spill] sm:$0xff] %v8114_v5  ;;  %v8116_v4 = vpop.f32.mrb[100].mxu0 }
 0x298   : > { %9119 = vst [vmem:[#allocation104_spill] sm:$0xff] %v8116_v4  ;;  %v8118_v63 = vpop.f32.mrb[101].mxu0 }
 0x299   : > { %9120 = vst [vmem:[#allocation105_spill] sm:$0xff] %v8118_v63  ;;  %v8120_v60 = vpop.f32.mrb[78].mxu1 }
 0x29a   : > { %9121 = vst [vmem:[#allocation106_spill] sm:$0xff] %v8120_v60  ;;  %v8122_v51 = vpop.f32.mrb[79].mxu1 }
 0x29b   : > { %9122 = vst [vmem:[#allocation107_spill] sm:$0xff] %v8122_v51  ;;  %v8124_v61 = vpop.f32.mrb[102].mxu0 }
 0x29c   : > { %9123 = vst [vmem:[#allocation108_spill] sm:$0xff] %v8124_v61  ;;  %v8126_v62 = vpop.f32.mrb[103].mxu0 }
 0x29d   : > { %9124 = vst [vmem:[#allocation109_spill] sm:$0xff] %v8126_v62  ;;  %v3167_v10 = vpop.f32.mrb[80].mxu1 }
 0x29e   : > { %v3295_v7 = vmul.f32 %v3250_v9, %v3167_v10  ;;  %v3169_v33 = vpop.f32.mrb[81].mxu1 }
 0x29f   : > { %v3296_v26 = vmul.f32 %v3250_v9, %v3169_v33  ;;  %v3566_v52 = vpop.f32.mrb[104].mxu0 }
 0x2a0   : > { %v3319_v5 = vadd.f32 %v3295_v7, %v2920_v27  ;;  %v3694_v32 = vmul.f32 %v3649_v11, %v3566_v52  ;;  %v3568_v4 = vpop.f32.mrb[105].mxu0 }
 0x2a1   : > { %v3320_v6 = vadd.f32 %v3296_v26, %v8049_v38  ;;  %v3695_v63 = vmul.f32 %v3649_v11, %v3568_v4  ;;  %v8129_v29 = vpop.f32.mrb[82].mxu1 }
 0x2a2   : > { %v3718_v60 = vadd.f32 %v3694_v32, %v3319_v5  ;;  %v8131_v51 = vpop.f32.mrb[83].mxu1 }
 0x2a3   : > { %v3719_v61 = vadd.f32 %v3695_v63, %v3320_v6  ;;  %v8133_v3 = vpop.f32.mrb[106].mxu0 }
 0x2a4   : > { %v8135_v62 = vpop.f32.mrb[107].mxu0 }
 0x2a5   : > { %v8137_v10 = vpop.f32.mrb[84].mxu1 }
 0x2a6   : > { %9125 = vst [vmem:[#allocation110_spill] sm:$0xff] %v8137_v10  ;;  %v8139_v9 = vpop.f32.mrb[85].mxu1 }
 0x2a7   : > { %9126 = vst [vmem:[#allocation111_spill] sm:$0xff] %v8139_v9  ;;  %v8141_v27 = vpop.f32.mrb[108].mxu0 }
 0x2a8   : > { %9127 = vst [vmem:[#allocation112_spill] sm:$0xff] %v8141_v27  ;;  %v8143_v52 = vpop.f32.mrb[109].mxu0 }
 0x2a9   : > { %9128 = vst [vmem:[#allocation113_spill] sm:$0xff] %v8143_v52  ;;  %v8145_v38 = vpop.f32.mrb[86].mxu1 }
 0x2aa   : > { %9129 = vst [vmem:[#allocation114_spill] sm:$0xff] %v8145_v38  ;;  %v8147_v4 = vpop.f32.mrb[87].mxu1 }
 0x2ab   : > { %9130 = vst [vmem:[#allocation115_spill] sm:$0xff] %v8147_v4  ;;  %v8149_v32 = vpop.f32.mrb[110].mxu0 }
 0x2ac   : > { %9131 = vst [vmem:[#allocation116_spill] sm:$0xff] %v8149_v32  ;;  %v8151_v5 = vpop.f32.mrb[111].mxu0 }
 0x2ad   : > { %9132 = vst [vmem:[#allocation117_spill] sm:$0xff] %v8151_v5  ;;  %v8153_v6 = vpop.f32.mrb[88].mxu1 }
 0x2ae   : > { %9133 = vst [vmem:[#allocation118_spill] sm:$0xff] %v8153_v6  ;;  %v8155_v63 = vpop.f32.mrb[89].mxu1 }
 0x2af   : > { %9134 = vst [vmem:[#allocation119_spill] sm:$0xff] %v8155_v63  ;;  %v8157_v11 = vpop.f32.mrb[112].mxu0 }
 0x2b0   : > { %9135 = vst [vmem:[#allocation120_spill] sm:$0xff] %v8157_v11  ;;  %v8159_v7 = vpop.f32.mrb[113].mxu0 }
 0x2b1   : > { %9136 = vst [vmem:[#allocation121_spill] sm:$0xff] %v8159_v7  ;;  %v8161_v33 = vpop.f32.mrb[90].mxu1 }
 0x2b2   : > { %9137 = vst [vmem:[#allocation122_spill] sm:$0xff] %v8161_v33  ;;  %v8163_v26 = vpop.f32.mrb[91].mxu1 }
 0x2b3   : > { %9138 = vst [vmem:[#allocation123_spill] sm:$0xff] %v8163_v26  ;;  %v8165_v52 = vpop.f32.mrb[114].mxu0  ;;  %v4028_v26 = vpop.permute.xlu1 %4027 }
 0x2b4   : > { %9139 = vst [vmem:[#allocation124_spill] sm:$0xff] %v8165_v52  ;;  %v8167_v38 = vpop.f32.mrb[115].mxu0 }
 0x2b5   : > { %9140 = vst [vmem:[#allocation125_spill] sm:$0xff] %v8167_v38  ;;  %v8169_v4 = vpop.f32.mrb[92].mxu1 }
 0x2b6   : > { %9141 = vst [vmem:[#allocation126_spill] sm:$0xff] %v8169_v4  ;;  %v8171_v32 = vpop.f32.mrb[93].mxu1 }
 0x2b7   : > { %9142 = vst [vmem:[#allocation127_spill] sm:$0xff] %v8171_v32  ;;  %v8173_v5 = vpop.f32.mrb[116].mxu0 }
 0x2b8   : > { %9143 = vst [vmem:[#allocation128_spill] sm:$0xff] %v8173_v5  ;;  %v8175_v27 = vpop.f32.mrb[117].mxu0 }
 0x2b9   : > { %9144 = vst [vmem:[#allocation129_spill] sm:$0xff] %v8175_v27  ;;  %v8177_v9 = vpop.f32.mrb[94].mxu1 }
 0x2ba   : > { %9145 = vst [vmem:[#allocation130_spill] sm:$0xff] %v8177_v9  ;;  %v8179_v10 = vpop.f32.mrb[95].mxu1 }
 0x2bb   : > { %9146 = vst [vmem:[#allocation131_spill] sm:$0xff] %v8179_v10  ;;  %v8181_v50 = vpop.f32.mrb[118].mxu0 }
 0x2bc   : > { %9147 = vst [vmem:[#allocation132_spill] sm:$0xff] %v8181_v50  ;;  %v8183_v33 = vpop.f32.mrb[119].mxu0 }
 0x2bd   : > { %9148 = vst [vmem:[#allocation133_spill] sm:$0xff] %v8183_v33 }
 0x2cd   : > { %v3941_v52 = vpop.f32.mrb[96].mxu1 }
 0x2ce   : > { %v4085_v7 = vmul.f32 %v4028_v26, %v3941_v52  ;;  %v3943_v38 = vpop.f32.mrb[97].mxu1 }
 0x2cf   : > { %v4086_v11 = vmul.f32 %v4028_v26, %v3943_v38  ;;  %v4048_v38 = vpop.permute.xlu0 %4047 }
 0x2d0   : > { %v8185_v4 = vadd.f32 %v4085_v7, %v3710_v34 }
 0x2d1   : > { %v8187_v32 = vadd.f32 %v4086_v11, %v3711_v36  ;;  %v8189_v5 = vpop.f32.mrb[98].mxu1 }
 0x2d2   : > { %v8191_v27 = vpop.f32.mrb[99].mxu1  ;;  %v4137_v10 = vmul.f32 %v8185_v4, %v8185_v4 }
 0x2d3   : > { %9149 = vst [vmem:[#allocation134_spill] sm:$0xff] %v8191_v27  ;;  %v4138_v50 = vmul.f32 %v8187_v32, %v8187_v32 }
 0x2d5   : > { %v8197_v33 = vpop.f32.mrb[100].mxu1  ;;  %v4139_v9 = vadd.f32 %v4138_v50, %v4137_v10 }
 0x2d6   : > { %9150 = vst [vmem:[#allocation135_spill] sm:$0xff] %v8197_v33  ;;  %v8199_v52 = vpop.f32.mrb[101].mxu1 }
 0x2d7   : > { %9151 = vst [vmem:[#allocation136_spill] sm:$0xff] %v8199_v52  ;;  %4140 = vadd.xlane.f32.xlu1 %v4139_v9 }
 0x2d9   : > { %v8201_v34 = vpop.f32.mrb[102].mxu1 }
 0x2da   : > { %9152 = vst [vmem:[#allocation137_spill] sm:$0xff] %v8201_v34  ;;  %v8203_v36 = vpop.f32.mrb[103].mxu1 }
 0x2db   : > { %9153 = vst [vmem:[#allocation138_spill] sm:$0xff] %v8203_v36 }
 0x2dd   : > { %v3965_v11 = vpop.f32.mrb[104].mxu1 }
 0x2de   : > { %v4093_v7 = vmul.f32 %v4048_v38, %v3965_v11  ;;  %v3967_v26 = vpop.f32.mrb[105].mxu1 }
 0x2df   : > { %v4094_v63 = vmul.f32 %v4048_v38, %v3967_v26  ;;  %v5250_v26 = vld [vmem:[%s8927_s2 + $0xe8] sm:$0xff] }
 0x2e0   : > { %v8205_v6 = vadd.f32 %v4093_v7, %v3718_v60  ;;  %v826_v60 = vld [vmem:[%s8927_s2 + $0x28] sm:$0xff] }
 0x2e1   : > { %v8207_v47 = vadd.f32 %v4094_v63, %v3719_v61  ;;  %v8209_v24 = vpop.f32.mrb[106].mxu1  ;;  %v822_v63 = vld [vmem:[%s8927_s2 + $0x8] sm:$0xff] }
 0x2e2   : > { %v8211_v33 = vpop.f32.mrb[107].mxu1  ;;  %v4153_v50 = vmul.f32 %v8205_v6, %v8205_v6 }
 0x2e3   : > { %v4154_v10 = vmul.f32 %v8207_v47, %v8207_v47 }
 0x2e5   : > { %v8217_v9 = vpop.f32.mrb[108].mxu1  ;;  %v4155_v36 = vadd.f32 %v4154_v10, %v4153_v50  ;;  %v5296_v10 = vld [vmem:[%s8927_s2 + $0x148] sm:$0xff] }
 0x2e6   : > { %9154 = vst [vmem:[#allocation139_spill] sm:$0xff] %v8217_v9  ;;  %v8222_v38 = vpop.f32.mrb[109].mxu1 }
 0x2e7   : > { %9155 = vst [vmem:[#allocation140_spill] sm:$0xff] %v8222_v38  ;;  %4156 = vadd.xlane.f32.xlu0 %v4155_v36 }
 0x2e8   : > { %860 = vperm.xlu1 %6175, %v826_v60  }
 0x2e9   : > { %v8224_v61 = vpop.f32.mrb[110].mxu1 }
 0x2ea   : > { %9156 = vst [vmem:[#allocation141_spill] sm:$0xff] %v8224_v61  ;;  %v8229_v11 = vpop.f32.mrb[111].mxu1 }
 0x2eb   : > { %9157 = vst [vmem:[#allocation142_spill] sm:$0xff] %v8229_v11 }
 0x2ec   : > { %840 = vperm.xlu1 %6175, %v822_v63   ;;  %v5341_v63 = vld [vmem:[%s8927_s2 + $0x1a8] sm:$0xff] }
 0x2ed   : > { %v8231_v7 = vpop.f32.mrb[112].mxu1 }
 0x2ee   : > { %9158 = vst [vmem:[#allocation143_spill] sm:$0xff] %v8231_v7  ;;  %v8236_v50 = vpop.f32.mrb[113].mxu1 }
 0x2ef   : > { %9159 = vst [vmem:[#allocation144_spill] sm:$0xff] %v8236_v50 }
 0x2f0   : > { %1658 = vperm.xlu1 %6175, %v5250_v26   ;;  %v5387_v26 = vld [vmem:[%s8927_s2 + $0x208] sm:$0xff] }
 0x2f1   : > { %v8238_v36 = vpop.f32.mrb[114].mxu1 }
 0x2f2   : > { %9160 = vst [vmem:[#allocation145_spill] sm:$0xff] %v8238_v36  ;;  %v8243_v60 = vpop.f32.mrb[115].mxu1 }
 0x2f3   : > { %9161 = vst [vmem:[#allocation146_spill] sm:$0xff] %v8243_v60 }
 0x2f4   : > { %2057 = vperm.xlu1 %6175, %v5296_v10   ;;  %v4133_v10 = vld [vmem:[%s8930_s5] sm:$0xff] }
 0x2f5   : > { %v8245_v11 = vpop.f32.mrb[116].mxu1 }
 0x2f6   : > { %9162 = vst [vmem:[#allocation147_spill] sm:$0xff] %v8245_v11  ;;  %v8250_v61 = vpop.f32.mrb[117].mxu1  ;;  %v5432_v11 = vld [vmem:[%s8927_s2 + $0x268] sm:$0xff] }
 0x2f7   : > { %9163 = vst [vmem:[#allocation148_spill] sm:$0xff] %v8250_v61 }
 0x2f8   : > { %2456 = vperm.xlu1 %6175, %v5341_v63   ;;  %v5205_v63 = vld [vmem:[%s8927_s2 + $0x88] sm:$0xff] }
 0x2f9   : > { %v8252_v34 = vpop.f32.mrb[118].mxu1 }
 0x2fa   : > { %9164 = vst [vmem:[#allocation149_spill] sm:$0xff] %v8252_v34  ;;  %v8257_v36 = vpop.f32.mrb[119].mxu1  ;;  %v5201_v34 = vld [vmem:[%s8927_s2 + $0x68] sm:$0xff] }
 0x2fb   : > { %9165 = vst [vmem:[#allocation150_spill] sm:$0xff] %v8257_v36  ;;  %v5475_v36 = vld [vmem:[%s8927_s2 + $0x2c8] sm:$0xff] }
 0x2fc   : > { %2855 = vperm.xlu1 %6175, %v5387_v26   ;;  %v5519_v26 = vld [vmem:[%s8927_s2 + $0x328] sm:$0xff] }
 0x2fd   : > { %4171 = vperm.xlu0 %6174, %v4133_v10   ;;  %v5246_v10 = vld [vmem:[%s8927_s2 + $0xc8] sm:$0xff] }
 0x300   : > { %3254 = vperm.xlu1 %6175, %v5432_v11   ;;  %v5292_v11 = vld [vmem:[%s8927_s2 + $0x128] sm:$0xff] }
 0x301   : > { %1259 = vperm.xlu0 %6174, %v5205_v63   ;;  %v5428_v63 = vld [vmem:[%s8927_s2 + $0x248] sm:$0xff] }
 0x304   : > { %3653 = vperm.xlu1 %6175, %v5475_v36   ;;  %v5337_v36 = vld [vmem:[%s8927_s2 + $0x188] sm:$0xff] }
 0x305   : > { %1239 = vperm.xlu0 %6174, %v5201_v34   ;;  %v5383_v34 = vld [vmem:[%s8927_s2 + $0x1e8] sm:$0xff] }
 0x308   : > { %4052 = vperm.xlu1 %6175, %v5519_v26   ;;  %v5471_v26 = vld [vmem:[%s8927_s2 + $0x2a8] sm:$0xff] }
 0x309   : > { %1638 = vperm.xlu0 %6174, %v5246_v10   ;;  %v5515_v10 = vld [vmem:[%s8927_s2 + $0x308] sm:$0xff] }
 0x30d   : > { %2037 = vperm.xlu0 %6174, %v5292_v11  }
 0x311   : > { %2436 = vperm.xlu0 %6174, %v5337_v36  }
 0x315   : > { %2835 = vperm.xlu0 %6174, %v5383_v34  }
 0x319   : > { %3234 = vperm.xlu0 %6174, %v5428_v63  }
 0x31d   : > { %3633 = vperm.xlu0 %6174, %v5471_v26  }
 0x321   : > { %4032 = vperm.xlu0 %6174, %v5515_v10  }
 0x364   : > { %v4141_v11 = vpop.xlane.xlu1 %4140 }
 0x365   : > { %6176 = vrsqrt.f32 %v4141_v11  ;;  %vm4144_vm7 = vcmp.eq.f32.partialorder %v4141_v11, inf  ;;  %v4147_v38 = vand.u32 2147483648, %v4141_v11  ;;  %vm4146_vm8 = vcmp.eq.f32.partialorder %v4141_v11, 0.0 }
 0x368   : > { %v861_v36 = vpop.permute.xlu1 %860 }
 0x369   : > { %v903_v56 = vmul.f32 %v861_v36, %v7823_v23  ;;  %v904_v43 = vmul.f32 %v861_v36, %v7829_v31 }
 0x36c   : > { %v841_v61 = vpop.permute.xlu1 %840 }
 0x36d   : > { %v895_v17 = vmul.f32 %v841_v61, %v7753_v42 }
 0x36f   : > { %v6177_v34 = vpop.eup %6176 }
 0x370   : > { %v4143_v60 = vmul.f32 %v6177_v34, %v4141_v11  ;;  %v1659_v52 = vpop.permute.xlu1 %1658 }
 0x371   : > { %v1701_v45 = vmul.f32 %v1659_v52, %v7952_v44  ;;  %v1702_v31 = vmul.f32 %v1659_v52, %v7956_v20 }
 0x372   : > { %v4145_v63 = vsel %vm4144_vm7, %v4141_v11, %v4143_v60 }
 0x373   : > { %v4148_v9 = vsel %vm4146_vm8, %v4147_v38, %v4145_v63 }
 0x374   : > { %v2058_v50 = vpop.permute.xlu1 %2057  ;;  %v4157_v7 = vpop.xlane.xlu0 %4156  ;;  %v4149_v26 = vmax.f32 %v4148_v9, 1e-12 }
 0x375   : > { %6178 = vrsqrt.f32 %v4157_v7  ;;  %vm4160_vm3 = vcmp.eq.f32.partialorder %v4157_v7, inf  ;;  %v4163_v60 = vand.u32 2147483648, %v4157_v7  ;;  %vm4162_vm9 = vcmp.eq.f32.partialorder %v4157_v7, 0.0 }
 0x376   : > { %6180 = vrcp.f32 %v4149_v26  ;;  %v2101_v42 = vmul.f32 %v2058_v50, %v7964_v30 }
 0x378   : > { %v2457_v58 = vpop.permute.xlu1 %2456 }
 0x37c   : > { %v2856_v14 = vpop.permute.xlu1 %2855  ;;  %v8298_v10 = vpop.permute.xlu0 %4171 }
 0x37d   : > { %v2899_v30 = vmul.f32 %v2856_v14, %v8053_v59 }
 0x37f   : > { %v6179_v0 = vpop.eup %6178 }
 0x380   : > { %v6181_v35 = vpop.eup %6180  ;;  %v4159_v34 = vmul.f32 %v6179_v0, %v4157_v7  ;;  %v1260_v40 = vpop.permute.xlu0 %1259 }
 0x381   : > { %v4152_v38 = vmul.f32 %v6181_v35, %v8187_v32  ;;  %v3255_v11 = vpop.permute.xlu1 %3254  ;;  %v1302_v63 = vmul.f32 %v1260_v40, %v7825_v22  ;;  %v1303_v26 = vmul.f32 %v1260_v40, %v7831_v57 }
 0x382   : > { %v4161_v9 = vsel %vm4160_vm3, %v4157_v7, %v4159_v34  ;;  %v896_v34 = vmul.f32 %v841_v61, %v7761_v21  ;;  %v2100_v7 = vmul.f32 %v2058_v50, %v7961_v41  ;;  %v3297_v50 = vmul.f32 %v3255_v11, %v8129_v29 }
 0x383   : > { %v4164_v23 = vsel %vm4162_vm9, %v4163_v60, %v4161_v9  ;;  %v4175_v0 = vmul.f32 %v8298_v10, %v4152_v38  ;;  %v1326_v18 = vadd.f32 %v1302_v63, %v903_v56  ;;  %v1327_v27 = vadd.f32 %v1303_v26, %v904_v43 }
 0x384   : > { %v4165_v36 = vmax.f32 %v4164_v23, 1e-12  ;;  %v1240_v32 = vpop.permute.xlu0 %1239  ;;  %v2499_v43 = vmul.f32 %v2457_v58, %v8045_v15  ;;  %v2500_v56 = vmul.f32 %v2457_v58, %v8047_v49  ;;  %v2898_v38 = vmul.f32 %v2856_v14, %v8051_v2 }
 0x385   : > { %v1294_v22 = vmul.f32 %v1240_v32, %v7755_v19  ;;  %v1295_v57 = vmul.f32 %v1240_v32, %v7763_v8  ;;  %4240 = vmatprep.mubr.f32.mxu0 %v4175_v0  ;;  %v1725_v44 = vadd.f32 %v1701_v45, %v1326_v18  ;;  %v1726_v40 = vadd.f32 %v1702_v31, %v1327_v27  ;;  %v3654_v60 = vpop.permute.xlu1 %3653 }
 0x386   : > { %6182 = vrcp.f32 %v4165_v36  ;;  %v3298_v15 = vmul.f32 %v3255_v11, %v8131_v51  ;;  %v3696_v59 = vmul.f32 %v3654_v60, %v8133_v3  ;;  %v3697_v14 = vmul.f32 %v3654_v60, %v8135_v62 }
 0x387   : > { %v1318_v20 = vadd.f32 %v1294_v22, %v895_v17  ;;  %v1319_v52 = vadd.f32 %v1295_v57, %v896_v34  ;;  %v2124_v21 = vadd.f32 %v2100_v7, %v1725_v44  ;;  %v2125_v61 = vadd.f32 %v2101_v42, %v1726_v40 }
 0x388   : > { %v1639_v41 = vpop.permute.xlu0 %1638  ;;  %v4151_v23 = vmul.f32 %v6181_v35, %v8185_v4 }
 0x389   : > { %v1693_v19 = vmul.f32 %v1639_v41, %v7914_v13  ;;  %v1694_v8 = vmul.f32 %v1639_v41, %v7918_v37  ;;  %v2523_v18 = vadd.f32 %v2499_v43, %v2124_v21  ;;  %v2524_v45 = vadd.f32 %v2500_v56, %v2125_v61  ;;  %v4053_v63 = vpop.permute.xlu1 %4052 }
 0x38a   : > { %v4095_v36 = vmul.f32 %v4053_v63, %v8209_v24  ;;  %v4096_v32 = vmul.f32 %v4053_v63, %v8211_v33  ;;  %v5522_v63 = vld [vmem:[%s8927_s2 + $0x340] sm:$0xff] }
 0x38b   : > { %v1717_v27 = vadd.f32 %v1693_v19, %v1318_v20  ;;  %v1718_v17 = vadd.f32 %v1694_v8, %v1319_v52  ;;  %v2922_v49 = vadd.f32 %v2898_v38, %v2523_v18  ;;  %v2923_v58 = vadd.f32 %v2899_v30, %v2524_v45  ;;  %v9166_v19 = vld [vmem:[#allocation134_spill] sm:$0xff] }
 0x38c   : > { %v2038_v9 = vpop.permute.xlu0 %2037 }
 0x38d   : > { %v2092_v13 = vmul.f32 %v2038_v9, %v7923_v55  ;;  %v2093_v37 = vmul.f32 %v2038_v9, %v7926_v1  ;;  %v3321_v26 = vadd.f32 %v3297_v50, %v2922_v49  ;;  %v3322_v2 = vadd.f32 %v3298_v15, %v2923_v58  ;;  %v5299_v50 = vld [vmem:[%s8927_s2 + $0x160] sm:$0xff] }
 0x38e   : > { %v5344_v15 = vld [vmem:[%s8927_s2 + $0x1c0] sm:$0xff] }
 0x38f   : > { %v2116_v0 = vadd.f32 %v2092_v13, %v1717_v27  ;;  %v2117_v29 = vadd.f32 %v2093_v37, %v1718_v17  ;;  %v3720_v51 = vadd.f32 %v3696_v59, %v3321_v26  ;;  %v3721_v11 = vadd.f32 %v3697_v14, %v3322_v2  ;;  %v829_v27 = vld [vmem:[%s8927_s2 + $0x40] sm:$0xff]  ;;  %v4134_v13 = vld [vmem:[%s8930_s5 + $0x8] sm:$0xff]  ;;  %v827_v37 = vld [vmem:[%s8927_s2 + $0x30] sm:$0xff] }
 0x390   : > { %v6183_v31 = vpop.eup %6182  ;;  %v2437_v55 = vpop.permute.xlu0 %2436  ;;  %v5253_v17 = vld [vmem:[%s8927_s2 + $0x100] sm:$0xff]  ;;  %v5206_v26 = vld [vmem:[%s8927_s2 + $0x90] sm:$0xff] }
 0x391   : > { %v2491_v1 = vmul.f32 %v2437_v55, %v8017_v53  ;;  %v2492_v34 = vmul.f32 %v2437_v55, %v8019_v54  ;;  %v4168_v3 = vmul.f32 %v6183_v31, %v8207_v47  ;;  %v4167_v62 = vmul.f32 %v6183_v31, %v8205_v6  ;;  %v5390_v49 = vld [vmem:[%s8927_s2 + $0x220] sm:$0xff]  ;;  %v5202_v2 = vld [vmem:[%s8927_s2 + $0x70] sm:$0xff] }
 0x392   : > { %v8333_v7 = vadd.f32 %v4095_v36, %v3720_v51  ;;  %v8335_v35 = vadd.f32 %v4096_v32, %v3721_v11  ;;  %v4174_v54 = vmul.f32 %v8298_v10, %v4151_v23  ;;  %v5435_v58 = vld [vmem:[%s8927_s2 + $0x280] sm:$0xff]  ;;  %v5251_v59 = vld [vmem:[%s8927_s2 + $0xf0] sm:$0xff] }
 0x393   : > { %v2515_v4 = vadd.f32 %v2491_v1, %v2116_v0  ;;  %v2516_v22 = vadd.f32 %v2492_v34, %v2117_v29  ;;  %4176 = vmatprep.subr.mxu0 %v4168_v3  ;;  %v5478_v9 = vld [vmem:[%s8927_s2 + $0x2e0] sm:$0xff]  ;;  %v5247_v14 = vld [vmem:[%s8927_s2 + $0xd0] sm:$0xff] }
 0x394   : > { %4177 = vmatpush1.xpose.msra.mxu0 %v4167_v62  ;;  %v2836_v24 = vpop.permute.xlu0 %2835  ;;  %v4350_v33 = vmul.f32 %v8333_v7, %v8333_v7  ;;  %v4351_v53 = vmul.f32 %v8335_v35, %v8335_v35  ;;  %v5297_v23 = vld [vmem:[%s8927_s2 + $0x150] sm:$0xff] }
 0x395   : > { %v2890_v47 = vmul.f32 %v2836_v24, %v8023_v46  ;;  %v2891_v6 = vmul.f32 %v2836_v24, %v8025_v28  ;;  %v5293_v0 = vld [vmem:[%s8927_s2 + $0x130] sm:$0xff] }
 0x396   : > { %v4352_v57 = vadd.f32 %v4351_v53, %v4350_v33  ;;  %v5342_v29 = vld [vmem:[%s8927_s2 + $0x1b0] sm:$0xff]  ;;  %v9168_v53 = vld [vmem:[#allocation25_spill] sm:$0xff] }
 0x397   : > { %v2914_v42 = vadd.f32 %v2890_v47, %v2515_v4  ;;  %v2915_v44 = vadd.f32 %v2891_v6, %v2516_v22  ;;  %4241 = vmatmul.mubr.f32.vlgmr.msra.gmra.mrb[120].mxu0 %v4174_v54  ;;  %v5388_v31 = vld [vmem:[%s8927_s2 + $0x210] sm:$0xff]  ;;  %v9167_v4 = vld [vmem:[#allocation23_spill] sm:$0xff]  ;;  %v9169_v47 = vld [vmem:[#allocation22_spill] sm:$0xff] }
 0x398   : > { %4353 = vadd.xlane.f32.xlu0 %v4352_v57  ;;  %v3235_v40 = vpop.permute.xlu0 %3234  ;;  %4325 = vmatprep.mubr.f32.mxu0 %v8995_v16  ;;  %v5433_v51 = vld [vmem:[%s8927_s2 + $0x270] sm:$0xff] }
 0x399   : > { %v3289_v60 = vmul.f32 %v3235_v40, %v8104_v12  ;;  %v3290_v20 = vmul.f32 %v3235_v40, %v8106_v48  ;;  %v5476_v11 = vld [vmem:[%s8927_s2 + $0x2d0] sm:$0xff] }
 0x39a   : > { %v5520_v36 = vld [vmem:[%s8927_s2 + $0x330] sm:$0xff] }
 0x39b   : > { %v3313_v52 = vadd.f32 %v3289_v60, %v2914_v42  ;;  %v3314_v43 = vadd.f32 %v3290_v20, %v2915_v44  ;;  %v9170_v57 = vld [vmem:[#allocation24_spill] sm:$0xff] }
 0x39c   : > { %v3634_v56 = vpop.permute.xlu0 %3633 }
 0x39d   : > { %v3688_v10 = vmul.f32 %v3634_v56, %v8108_v39  ;;  %v3689_v46 = vmul.f32 %v3634_v56, %v8110_v25  ;;  %v5208_v25 = vld [vmem:[%s8927_s2 + $0xa0] sm:$0xff] }
 0x39f   : > { %v3712_v28 = vadd.f32 %v3688_v10, %v3313_v52  ;;  %v3713_v21 = vadd.f32 %v3689_v46, %v3314_v43  ;;  %v9171_v43 = vld [vmem:[#allocation54_spill] sm:$0xff]  ;;  %v9172_v10 = vld [vmem:[#allocation55_spill] sm:$0xff] }
 0x3a0   : > { %v4033_v61 = vpop.permute.xlu0 %4032 }
 0x3a1   : > { %v4087_v41 = vmul.f32 %v4033_v61, %v8189_v5  ;;  %v4088_v8 = vmul.f32 %v4033_v61, %v9166_v19 }
 0x3a3   : > { %v8351_v38 = vadd.f32 %v4087_v41, %v3712_v28  ;;  %v8353_v30 = vadd.f32 %v4088_v8, %v3713_v21 }
 0x3a5   : > { %v4334_v48 = vmul.f32 %v8351_v38, %v8351_v38  ;;  %v4335_v12 = vmul.f32 %v8353_v30, %v8353_v30 }
 0x3a7   : > { %v4336_v39 = vadd.f32 %v4335_v12, %v4334_v48  ;;  %v9173_v48 = vld [vmem:[#allocation56_spill] sm:$0xff] }
 0x3a9   : > { %4337 = vadd.xlane.f32.xlu0 %v4336_v39  ;;  %v9174_v39 = vld [vmem:[#allocation57_spill] sm:$0xff] }
 0x3bf   : > { %1274 = vperm.xlu0 %6174, %v5208_v25  }
 0x425   : > { %v4354_v32 = vpop.xlane.xlu0 %4353 }
 0x426   : > { %vm4357_vm13 = vcmp.eq.f32.partialorder %v4354_v32, inf  ;;  %vm4359_vm15 = vcmp.eq.f32.partialorder %v4354_v32, 0.0 }
 0x436   : > { %v4338_v55 = vpop.xlane.xlu0 %4337 }
 0x437   : > { %6184 = vrsqrt.f32 %v4338_v55  ;;  %vm4341_vm12 = vcmp.eq.f32.partialorder %v4338_v55, inf  ;;  %v4344_v8 = vand.u32 2147483648, %v4338_v55  ;;  %vm4343_vm14 = vcmp.eq.f32.partialorder %v4338_v55, 0.0 }
 0x438   : > { %6186 = vrsqrt.f32 %v4354_v32 }
 0x43e   : > { %v1275_v34 = vpop.permute.xlu0 %1274 }
 0x43f   : > { %v1308_v22 = vmul.f32 %v1275_v34, %v9167_v4  ;;  %v1309_v54 = vmul.f32 %v1275_v34, %v9168_v53  ;;  %v9180_v34 = vld [vmem:[#allocation119_spill] sm:$0xff]  ;;  %v9182_v53 = vld [vmem:[#allocation121_spill] sm:$0xff] }
 0x441   : > { %v6185_v33 = vpop.eup %6184 }
 0x442   : > { %v6187_v44 = vpop.eup %6186  ;;  %v4340_v20 = vmul.f32 %v6185_v33, %v4338_v55 }
 0x443   : > { %v4356_v28 = vmul.f32 %v6187_v44, %v4354_v32  ;;  %v9183_v44 = vld [vmem:[#allocation143_spill] sm:$0xff] }
 0x444   : > { %v4342_v41 = vsel %vm4341_vm12, %v4338_v55, %v4340_v20  ;;  %v9179_v55 = vld [vmem:[#allocation118_spill] sm:$0xff] }
 0x46a   : > { %v4242_v5 = vpop.f32.mrb[120].mxu0 }
 0x46b   : > { %v4244_v18 = vpop.f32.mrb[121].mxu0  ;;  %v4247_v45 = vsel %vm4246_vm11, %v4242_v5, -inf }
 0x46c   : > { %4248 = vmax.xlane.f32.xlu1 %v4247_v45  ;;  %v4360_v45 = vand.u32 2147483648, %v4354_v32 }
 0x47d   : > { %875 = vperm.xlu1 %6175, %v829_v27   ;;  %v4345_v27 = vsel %vm4343_vm14, %v4344_v8, %v4342_v41 }
 0x481   : > { %1673 = vperm.xlu1 %6175, %v5253_v17  }
 0x485   : > { %2072 = vperm.xlu1 %6175, %v5299_v50  }
 0x489   : > { %2471 = vperm.xlu1 %6175, %v5344_v15  }
 0x48d   : > { %2870 = vperm.xlu1 %6175, %v5390_v49  }
 0x491   : > { %3269 = vperm.xlu1 %6175, %v5435_v58  }
 0x495   : > { %3668 = vperm.xlu1 %6175, %v5478_v9   ;;  %v9175_v9 = vld [vmem:[#allocation86_spill] sm:$0xff] }
 0x499   : > { %4067 = vperm.xlu1 %6175, %v5522_v63  }
 0x49d   : > { %4368 = vperm.xlu1 %6175, %v4134_v13   ;;  %v9176_v13 = vld [vmem:[#allocation87_spill] sm:$0xff] }
 0x4a1   : > { %865 = vperm.xlu1 %6175, %v827_v37  }
 0x4a5   : > { %1264 = vperm.xlu1 %6175, %v5206_v26   ;;  %v4346_v26 = vmax.f32 %v4345_v27, 1e-12  ;;  %v9188_v27 = vld [vmem:[#allocation17_spill] sm:$0xff] }
 0x4a9   : > { %1244 = vperm.xlu1 %6175, %v5202_v2  }
 0x4ad   : > { %1663 = vperm.xlu1 %6175, %v5251_v59  }
 0x4b1   : > { %1643 = vperm.xlu1 %6175, %v5247_v14  }
 0x4b5   : > { %2062 = vperm.xlu1 %6175, %v5297_v23  }
 0x4b9   : > { %2042 = vperm.xlu1 %6175, %v5293_v0   ;;  %v9177_v0 = vld [vmem:[#allocation88_spill] sm:$0xff] }
 0x4bd   : > { %2461 = vperm.xlu1 %6175, %v5342_v29  }
 0x4c1   : > { %2860 = vperm.xlu1 %6175, %v5388_v31   ;;  %v9178_v31 = vld [vmem:[#allocation89_spill] sm:$0xff] }
 0x4c5   : > { %3259 = vperm.xlu1 %6175, %v5433_v51  }
 0x4c9   : > { %3658 = vperm.xlu1 %6175, %v5476_v11  }
 0x4cd   : > { %4057 = vperm.xlu1 %6175, %v5520_v36  }
 0x4f9   : > { %v4249_v1 = vpop.xlane.xlu1 %4248 }
 0x4fa   : > { %v4250_v3 = vsub.f32 %v4242_v5, %v4249_v1  ;;  %v4358_v5 = vsel %vm4357_vm13, %v4354_v32, %v4356_v28 }
 0x4fb   : > { %v4361_v58 = vsel %vm4359_vm15, %v4360_v45, %v4358_v5  ;;  %v9187_v45 = vld [vmem:[#allocation9_spill] sm:$0xff] }
 0x4fc   : > { %v4251_v62 = vmul.f32 1.442695, %v4250_v3  ;;  %v4362_v14 = vmax.f32 %v4361_v58, 1e-12  ;;  %v5429_v58 = vld [vmem:[%s8927_s2 + $0x250] sm:$0xff] }
 0x4fd   : > { %v876_v24 = vpop.permute.xlu1 %875 }
 0x4fe   : > { %6188 = vpow2.f32 %v4251_v62  ;;  %v909_v6 = vmul.f32 %v876_v24, %v9169_v47  ;;  %v910_v42 = vmul.f32 %v876_v24, %v9170_v57  ;;  %v9181_v24 = vld [vmem:[#allocation120_spill] sm:$0xff] }
 0x4ff   : > { %6190 = vrcp.f32 %v4346_v26 }
 0x500   : > { %v1332_v40 = vadd.f32 %v1308_v22, %v909_v6  ;;  %v1333_v60 = vadd.f32 %v1309_v54, %v910_v42  ;;  %6192 = vrcp.f32 %v4362_v14 }
 0x501   : > { %v1674_v52 = vpop.permute.xlu1 %1673 }
 0x502   : > { %v1707_v56 = vmul.f32 %v1674_v52, %v9171_v43  ;;  %v1708_v46 = vmul.f32 %v1674_v52, %v9172_v10 }
 0x504   : > { %v1731_v21 = vadd.f32 %v1707_v56, %v1332_v40  ;;  %v1732_v61 = vadd.f32 %v1708_v46, %v1333_v60  ;;  %v9184_v60 = vld [vmem:[#allocation144_spill] sm:$0xff] }
 0x505   : > { %v2073_v19 = vpop.permute.xlu1 %2072 }
 0x506   : > { %v2106_v12 = vmul.f32 %v2073_v19, %v9173_v48  ;;  %v2107_v25 = vmul.f32 %v2073_v19, %v9174_v39  ;;  %v5384_v48 = vld [vmem:[%s8927_s2 + $0x1f0] sm:$0xff] }
 0x508   : > { %v8434_v18 = vpop.eup %6188  ;;  %v2130_v17 = vadd.f32 %v2106_v12, %v1731_v21  ;;  %v2131_v50 = vadd.f32 %v2107_v25, %v1732_v61  ;;  %v823_v21 = vld [vmem:[%s8927_s2 + $0x10] sm:$0xff]  ;;  %v9186_v25 = vld [vmem:[#allocation14_spill] sm:$0xff] }
 0x509   : > { %v2472_v15 = vpop.permute.xlu1 %2471  ;;  %v4253_v49 = vsel %vm4246_vm11, %v8434_v18, 0.0  ;;  %v6191_v57 = vpop.eup %6190  ;;  %v9185_v12 = vld [vmem:[#allocation12_spill] sm:$0xff] }
 0x50a   : > { %v2505_v63 = vmul.f32 %v2472_v15, %v9175_v9  ;;  %v2506_v37 = vmul.f32 %v2472_v15, %v9176_v13  ;;  %4254 = vadd.xlane.f32.xlu0 %v4253_v49  ;;  %v8448_v52 = vpop.eup %6192  ;;  %v4348_v10 = vmul.f32 %v6191_v57, %v8351_v38  ;;  %v4349_v46 = vmul.f32 %v6191_v57, %v8353_v30  ;;  %v5338_v38 = vld [vmem:[%s8927_s2 + $0x190] sm:$0xff]  ;;  %v9189_v9 = vld [vmem:[#allocation7_spill] sm:$0xff]  ;;  %v9190_v13 = vld [vmem:[#allocation10_spill] sm:$0xff] }
 0x50b   : > { %v4365_v19 = vmul.f32 %v8448_v52, %v8335_v35 }
 0x50c   : > { %v2529_v2 = vadd.f32 %v2505_v63, %v2130_v17  ;;  %v2530_v59 = vadd.f32 %v2506_v37, %v2131_v50 }
 0x50d   : > { %v2871_v23 = vpop.permute.xlu1 %2870 }
 0x50e   : > { %v2904_v29 = vmul.f32 %v2871_v23, %v9177_v0  ;;  %v2905_v51 = vmul.f32 %v2871_v23, %v9178_v31  ;;  %v9192_v23 = vld [vmem:[#allocation47_spill] sm:$0xff] }
 0x510   : > { %v2928_v11 = vadd.f32 %v2904_v29, %v2529_v2  ;;  %v2929_v36 = vadd.f32 %v2905_v51, %v2530_v59  ;;  %v5472_v2 = vld [vmem:[%s8927_s2 + $0x2b0] sm:$0xff]  ;;  %v9191_v59 = vld [vmem:[#allocation46_spill] sm:$0xff] }
 0x511   : > { %v3270_v32 = vpop.permute.xlu1 %3269 }
 0x512   : > { %v3303_v1 = vmul.f32 %v3270_v32, %v9179_v55  ;;  %v3304_v3 = vmul.f32 %v3270_v32, %v9180_v34  ;;  %v9194_v55 = vld [vmem:[#allocation39_spill] sm:$0xff] }
 0x514   : > { %v3327_v62 = vadd.f32 %v3303_v1, %v2928_v11  ;;  %v3328_v4 = vadd.f32 %v3304_v3, %v2929_v36  ;;  %v5516_v11 = vld [vmem:[%s8927_s2 + $0x310] sm:$0xff]  ;;  %v9193_v36 = vld [vmem:[#allocation38_spill] sm:$0xff] }
 0x515   : > { %v3669_v22 = vpop.permute.xlu1 %3668  ;;  %v9195_v3 = vld [vmem:[#allocation48_spill] sm:$0xff] }
 0x516   : > { %v3702_v33 = vmul.f32 %v3669_v22, %v9181_v24  ;;  %v3703_v54 = vmul.f32 %v3669_v22, %v9182_v53 }
 0x518   : > { %v3726_v47 = vadd.f32 %v3702_v33, %v3327_v62  ;;  %v3727_v6 = vadd.f32 %v3703_v54, %v3328_v4  ;;  %v9196_v4 = vld [vmem:[#allocation49_spill] sm:$0xff]  ;;  %v9197_v54 = vld [vmem:[#allocation40_spill] sm:$0xff] }
 0x519   : > { %v4068_v42 = vpop.permute.xlu1 %4067 }
 0x51a   : > { %v4101_v40 = vmul.f32 %v4068_v42, %v9183_v44  ;;  %v4102_v20 = vmul.f32 %v4068_v42, %v9184_v60  ;;  %v9199_v44 = vld [vmem:[#allocation78_spill] sm:$0xff]  ;;  %v9200_v60 = vld [vmem:[#allocation79_spill] sm:$0xff] }
 0x51c   : > { %v4125_v43 = vadd.f32 %v4101_v40, %v3726_v47  ;;  %v4126_v56 = vadd.f32 %v4102_v20, %v3727_v6  ;;  %v9198_v6 = vld [vmem:[#allocation41_spill] sm:$0xff] }
 0x51d   : > { %v4369_v28 = vpop.permute.xlu1 %4368 }
 0x51e   : > { %v8455_v61 = vmul.f32 %v4369_v28, %v4348_v10  ;;  %v8457_v41 = vmul.f32 %v4369_v28, %v4349_v46  ;;  %4261 = vmatprep.subr.mxu0 %v4126_v56  ;;  %v9201_v46 = vld [vmem:[#allocation80_spill] sm:$0xff] }
 0x51f   : > { %4262 = vmatpush1.msra.mxu0 %v4125_v43 }
 0x520   : > { %845 = vperm.xlu0 %6174, %v823_v21   ;;  %4373 = vmatprep.subr.mxu0 %v4365_v19  ;;  %v9202_v21 = vld [vmem:[#allocation81_spill] sm:$0xff] }
 0x521   : > { %v866_v8 = vpop.permute.xlu1 %865 }
 0x522   : > { %v905_v39 = vmul.f32 %v866_v8, %v9185_v12  ;;  %v906_v5 = vmul.f32 %v866_v8, %v9186_v25 }
 0x524   : > { %2441 = vperm.xlu0 %6174, %v5338_v38  }
 0x525   : > { %v1265_v30 = vpop.permute.xlu1 %1264 }
 0x526   : > { %v1304_v35 = vmul.f32 %v1265_v30, %v9187_v45  ;;  %v1305_v17 = vmul.f32 %v1265_v30, %v9188_v27  ;;  %v9205_v27 = vld [vmem:[#allocation112_spill] sm:$0xff] }
 0x528   : > { %v1328_v50 = vadd.f32 %v1304_v35, %v905_v39  ;;  %v1329_v15 = vadd.f32 %v1305_v17, %v906_v5  ;;  %2840 = vperm.xlu0 %6174, %v5384_v48   ;;  %v9203_v48 = vld [vmem:[#allocation110_spill] sm:$0xff]  ;;  %v9204_v39 = vld [vmem:[#allocation111_spill] sm:$0xff] }
 0x529   : > { %v1245_v49 = vpop.permute.xlu1 %1244 }
 0x52a   : > { %v1296_v63 = vmul.f32 %v1245_v49, %v9189_v9  ;;  %v1297_v37 = vmul.f32 %v1245_v49, %v9190_v13  ;;  %v9207_v13 = vld [vmem:[#allocation139_spill] sm:$0xff] }
 0x52c   : > { %3239 = vperm.xlu0 %6174, %v5429_v58  }
 0x52d   : > { %v1664_v26 = vpop.permute.xlu1 %1663 }
 0x52e   : > { %v1703_v14 = vmul.f32 %v1664_v26, %v9191_v59  ;;  %v1704_v0 = vmul.f32 %v1664_v26, %v9192_v23 }
 0x530   : > { %v1727_v29 = vadd.f32 %v1703_v14, %v1328_v50  ;;  %v1728_v31 = vadd.f32 %v1704_v0, %v1329_v15  ;;  %3638 = vperm.xlu0 %6174, %v5472_v2   ;;  %v9206_v50 = vld [vmem:[#allocation113_spill] sm:$0xff]  ;;  %v9208_v2 = vld [vmem:[#allocation140_spill] sm:$0xff] }
 0x531   : > { %v1644_v51 = vpop.permute.xlu1 %1643 }
 0x532   : > { %v1695_v32 = vmul.f32 %v1644_v51, %v9193_v36  ;;  %v1696_v1 = vmul.f32 %v1644_v51, %v9194_v55  ;;  %v9209_v36 = vld [vmem:[#allocation6_spill] sm:$0xff] }
 0x534   : > { %4037 = vperm.xlu0 %6174, %v5516_v11  }
 0x535   : > { %v2063_v34 = vpop.permute.xlu1 %2062 }
 0x536   : > { %v2102_v62 = vmul.f32 %v2063_v34, %v9195_v3  ;;  %v2103_v22 = vmul.f32 %v2063_v34, %v9196_v4  ;;  %v9210_v34 = vld [vmem:[#allocation16_spill] sm:$0xff] }
 0x538   : > { %v2126_v24 = vadd.f32 %v2102_v62, %v1727_v29  ;;  %v2127_v33 = vadd.f32 %v2103_v22, %v1728_v31 }
 0x539   : > { %v2043_v53 = vpop.permute.xlu1 %2042 }
 0x53a   : > { %v2094_v47 = vmul.f32 %v2043_v53, %v9197_v54  ;;  %v2095_v57 = vmul.f32 %v2043_v53, %v9198_v6  ;;  %v4364_v6 = vmul.f32 %v8448_v52, %v8333_v7 }
 0x53d   : > { %v2462_v42 = vpop.permute.xlu1 %2461 }
 0x53e   : > { %v2501_v40 = vmul.f32 %v2462_v42, %v9199_v44  ;;  %v2502_v20 = vmul.f32 %v2462_v42, %v9200_v60  ;;  %v9211_v42 = vld [vmem:[#allocation70_spill] sm:$0xff] }
 0x540   : > { %v2525_v43 = vadd.f32 %v2501_v40, %v2126_v24  ;;  %v2526_v56 = vadd.f32 %v2502_v20, %v2127_v33  ;;  %v9212_v20 = vld [vmem:[#allocation71_spill] sm:$0xff] }
 0x541   : > { %v2861_v10 = vpop.permute.xlu1 %2860 }
 0x542   : > { %v2900_v28 = vmul.f32 %v2861_v10, %v9201_v46  ;;  %v2901_v19 = vmul.f32 %v2861_v10, %v9202_v21 }
 0x544   : > { %v2924_v8 = vadd.f32 %v2900_v28, %v2525_v43  ;;  %v2925_v38 = vadd.f32 %v2901_v19, %v2526_v56  ;;  %v9213_v56 = vld [vmem:[#allocation72_spill] sm:$0xff]  ;;  %v9216_v28 = vld [vmem:[#allocation103_spill] sm:$0xff] }
 0x545   : > { %v3260_v30 = vpop.permute.xlu1 %3259 }
 0x546   : > { %v3299_v12 = vmul.f32 %v3260_v30, %v9203_v48  ;;  %v3300_v25 = vmul.f32 %v3260_v30, %v9204_v39  ;;  %v9218_v48 = vld [vmem:[#allocation105_spill] sm:$0xff] }
 0x548   : > { %v3323_v5 = vadd.f32 %v3299_v12, %v2924_v8  ;;  %v3324_v45 = vadd.f32 %v3300_v25, %v2925_v38  ;;  %v9217_v38 = vld [vmem:[#allocation104_spill] sm:$0xff] }
 0x549   : > { %v3659_v35 = vpop.permute.xlu1 %3658 }
 0x54a   : > { %v3698_v17 = vmul.f32 %v3659_v35, %v9205_v27  ;;  %v3699_v15 = vmul.f32 %v3659_v35, %v9206_v50  ;;  %v9220_v35 = vld [vmem:[#allocation136_spill] sm:$0xff] }
 0x54c   : > { %v3722_v49 = vadd.f32 %v3698_v17, %v3323_v5  ;;  %v3723_v58 = vadd.f32 %v3699_v15, %v3324_v45 }
 0x54d   : > { %v4058_v9 = vpop.permute.xlu1 %4057 }
 0x54e   : > { %v4097_v26 = vmul.f32 %v4058_v9, %v9207_v13  ;;  %v4098_v59 = vmul.f32 %v4058_v9, %v9208_v2  ;;  %v830_v9 = vld [vmem:[%s8927_s2 + $0x48] sm:$0xff] }
 0x550   : > { %v8500_v14 = vadd.f32 %v4097_v26, %v3722_v49  ;;  %v8502_v23 = vadd.f32 %v4098_v59, %v3723_v58 }
 0x552   : > { %v4546_v0 = vmul.f32 %v8500_v14, %v8500_v14  ;;  %v4547_v29 = vmul.f32 %v8502_v23, %v8502_v23 }
 0x554   : > { %v4548_v31 = vadd.f32 %v4547_v29, %v4546_v0  ;;  %v5209_v29 = vld [vmem:[%s8927_s2 + $0xa8] sm:$0xff] }
 0x556   : > { %4549 = vadd.xlane.f32.xlu0 %v4548_v31  ;;  %v5254_v31 = vld [vmem:[%s8927_s2 + $0x108] sm:$0xff] }
 0x597   : > { %v4255_v51 = vpop.xlane.xlu0 %4254 }
 0x598   : > { %6194 = vrcp.f32 %v4255_v51  ;;  %v5300_v51 = vld [vmem:[%s8927_s2 + $0x168] sm:$0xff] }
 0x59f   : > { %v846_v11 = vpop.permute.xlu0 %845 }
 0x5a0   : > { %v897_v55 = vmul.f32 %v846_v11, %v9209_v36  ;;  %v898_v3 = vmul.f32 %v846_v11, %v9210_v34  ;;  %v5345_v11 = vld [vmem:[%s8927_s2 + $0x1c8] sm:$0xff] }
 0x5a1   : > { %v5391_v36 = vld [vmem:[%s8927_s2 + $0x228] sm:$0xff] }
 0x5a2   : > { %v6195_v62 = vpop.eup %6194  ;;  %v1320_v4 = vadd.f32 %v1296_v63, %v897_v55  ;;  %v1321_v22 = vadd.f32 %v1297_v37, %v898_v3  ;;  %v5436_v55 = vld [vmem:[%s8927_s2 + $0x288] sm:$0xff] }
 0x5a3   : > { %v4257_v24 = vmul.f32 %v6195_v62, %v8434_v18  ;;  %v2442_v33 = vpop.permute.xlu0 %2441  ;;  %v5479_v34 = vld [vmem:[%s8927_s2 + $0x2e8] sm:$0xff]  ;;  %v4135_v62 = vld [vmem:[%s8930_s5 + $0x10] sm:$0xff] }
 0x5a4   : > { %v1719_v53 = vadd.f32 %v1695_v32, %v1320_v4  ;;  %v1720_v54 = vadd.f32 %v1696_v1, %v1321_v22  ;;  %v2493_v44 = vmul.f32 %v2442_v33, %v9211_v42  ;;  %v2494_v43 = vmul.f32 %v2442_v33, %v9212_v20  ;;  %v9214_v1 = vld [vmem:[#allocation73_spill] sm:$0xff]  ;;  %v5523_v3 = vld [vmem:[%s8927_s2 + $0x348] sm:$0xff] }
 0x5a5   : > { %5526 = vmatmul.mubr.msk.f32.vlgmr.msra.gmra.mrb[122].mxu0 %vm4246_vm11, %v4257_v24  ;;  %v828_v4 = vld [vmem:[%s8927_s2 + $0x38] sm:$0xff] }
 0x5a6   : > { %v2118_v40 = vadd.f32 %v2094_v47, %v1719_v53  ;;  %v2119_v60 = vadd.f32 %v2095_v57, %v1720_v54  ;;  %4374 = vmatpush1.xpose.msra.mxu0 %v4364_v6  ;;  %4437 = vmatprep.mubr.f32.mxu0 %v8457_v41  ;;  %v9215_v57 = vld [vmem:[#allocation102_spill] sm:$0xff]  ;;  %v824_v22 = vld [vmem:[%s8927_s2 + $0x18] sm:$0xff] }
 0x5a7   : > { %v2841_v63 = vpop.permute.xlu0 %2840  ;;  %v5203_v24 = vld [vmem:[%s8927_s2 + $0x78] sm:$0xff] }
 0x5a8   : > { %v2517_v37 = vadd.f32 %v2493_v44, %v2118_v40  ;;  %v2518_v18 = vadd.f32 %v2494_v43, %v2119_v60  ;;  %v2892_v32 = vmul.f32 %v2841_v63, %v9213_v56  ;;  %v2893_v10 = vmul.f32 %v2841_v63, %v9214_v1  ;;  %v5252_v33 = vld [vmem:[%s8927_s2 + $0xf8] sm:$0xff]  ;;  %v9221_v1 = vld [vmem:[#allocation26_spill] sm:$0xff] }
 0x5a9   : > { %4438 = vmatmul.mubr.f32.vlgmr.msra.gmra.mrb[124].mxu0 %v8455_v61  ;;  %v9219_v61 = vld [vmem:[#allocation135_spill] sm:$0xff]  ;;  %v5248_v53 = vld [vmem:[%s8927_s2 + $0xd8] sm:$0xff] }
 0x5aa   : > { %v2916_v7 = vadd.f32 %v2892_v32, %v2517_v37  ;;  %v2917_v52 = vadd.f32 %v2893_v10, %v2518_v18  ;;  %4521 = vmatprep.mubr.f32.mxu0 %v8995_v16  ;;  %v5298_v54 = vld [vmem:[%s8927_s2 + $0x158] sm:$0xff] }
 0x5ab   : > { %v3240_v47 = vpop.permute.xlu0 %3239  ;;  %v5294_v6 = vld [vmem:[%s8927_s2 + $0x138] sm:$0xff] }
 0x5ac   : > { %v3291_v46 = vmul.f32 %v3240_v47, %v9215_v57  ;;  %v3292_v21 = vmul.f32 %v3240_v47, %v9216_v28  ;;  %v5339_v42 = vld [vmem:[%s8927_s2 + $0x198] sm:$0xff]  ;;  %v9223_v57 = vld [vmem:[#allocation27_spill] sm:$0xff] }
 0x5ad   : > { %v5385_v44 = vld [vmem:[%s8927_s2 + $0x1f8] sm:$0xff] }
 0x5ae   : > { %v3315_v19 = vadd.f32 %v3291_v46, %v2916_v7  ;;  %v3316_v41 = vadd.f32 %v3292_v21, %v2917_v52  ;;  %v5430_v40 = vld [vmem:[%s8927_s2 + $0x258] sm:$0xff]  ;;  %v9222_v52 = vld [vmem:[#allocation28_spill] sm:$0xff] }
 0x5af   : > { %v3639_v8 = vpop.permute.xlu0 %3638  ;;  %v5473_v60 = vld [vmem:[%s8927_s2 + $0x2b8] sm:$0xff] }
 0x5b0   : > { %v3690_v30 = vmul.f32 %v3639_v8, %v9217_v38  ;;  %v3691_v12 = vmul.f32 %v3639_v8, %v9218_v48  ;;  %v5517_v20 = vld [vmem:[%s8927_s2 + $0x318] sm:$0xff] }
 0x5b1   : > { %v9224_v28 = vld [vmem:[#allocation29_spill] sm:$0xff] }
 0x5b2   : > { %v3714_v39 = vadd.f32 %v3690_v30, %v3315_v19  ;;  %v3715_v25 = vadd.f32 %v3691_v12, %v3316_v41  ;;  %v9225_v30 = vld [vmem:[#allocation58_spill] sm:$0xff]  ;;  %v9226_v12 = vld [vmem:[#allocation59_spill] sm:$0xff] }
 0x5b3   : > { %v4038_v5 = vpop.permute.xlu0 %4037 }
 0x5b4   : > { %v4089_v45 = vmul.f32 %v4038_v5, %v9219_v61  ;;  %v4090_v27 = vmul.f32 %v4038_v5, %v9220_v35  ;;  %v9227_v35 = vld [vmem:[#allocation60_spill] sm:$0xff] }
 0x5b6   : > { %v8527_v17 = vadd.f32 %v4089_v45, %v3714_v39  ;;  %v8529_v50 = vadd.f32 %v4090_v27, %v3715_v25 }
 0x5b8   : > { %v4530_v15 = vmul.f32 %v8527_v17, %v8527_v17  ;;  %v4531_v49 = vmul.f32 %v8529_v50, %v8529_v50 }
 0x5ba   : > { %v4532_v58 = vadd.f32 %v4531_v49, %v4530_v15  ;;  %v9228_v15 = vld [vmem:[#allocation61_spill] sm:$0xff] }
 0x5bc   : > { %4533 = vadd.xlane.f32.xlu0 %v4532_v58 }
 0x5d2   : > { %880 = vperm.xlu0 %6174, %v830_v9  }
 0x5e3   : > { %v4550_v43 = vpop.xlane.xlu0 %4549 }
 0x5e4   : > { %6196 = vrsqrt.f32 %v4550_v43  ;;  %vm4553_vm0 = vcmp.eq.f32.partialorder %v4550_v43, inf  ;;  %vm4555_vm1 = vcmp.eq.f32.partialorder %v4550_v43, 0.0 }
 0x5ee   : > { %v6197_v19 = vpop.eup %6196 }
 0x5ef   : > { %v4552_v25 = vmul.f32 %v6197_v19, %v4550_v43 }
 0x5f1   : > { %v4554_v58 = vsel %vm4553_vm0, %v4550_v43, %v4552_v25  ;;  %v5343_v25 = vld [vmem:[%s8927_s2 + $0x1b8] sm:$0xff] }
 0x649   : > { %v8606_v63 = vpop.xlane.xlu0 %4533 }
 0x64a   : > { %vm4537_vm2 = vcmp.eq.f32.partialorder %v8606_v63, inf  ;;  %vm4539_vm4 = vcmp.eq.f32.partialorder %v8606_v63, 0.0 }
 0x651   : > { %v881_v18 = vpop.permute.xlu0 %880 }
 0x652   : > { %v911_v10 = vmul.f32 %v881_v18, %v9221_v1  ;;  %v912_v47 = vmul.f32 %v881_v18, %v9222_v52 }
 0x678   : > { %v8538_v13 = vpop.f32.mrb[122].mxu0 }
 0x679   : > { %v8540_v26 = vpop.f32.mrb[123].mxu0 }
 0x67c   : > { %v4439_v2 = vpop.f32.mrb[124].mxu0 }
 0x67d   : > { %v4441_v59 = vpop.f32.mrb[125].mxu0  ;;  %v4443_v0 = vsel %vm4246_vm11, %v4439_v2, -inf }
 0x67e   : > { %4444 = vmax.xlane.f32.xlu1 %v4443_v0 }
 0x68f   : > { %1279 = vperm.xlu1 %6175, %v5209_v29  }
 0x693   : > { %1678 = vperm.xlu1 %6175, %v5254_v31  }
 0x697   : > { %2077 = vperm.xlu1 %6175, %v5300_v51  }
 0x69b   : > { %2476 = vperm.xlu1 %6175, %v5345_v11   ;;  %v9229_v11 = vld [vmem:[#allocation90_spill] sm:$0xff] }
 0x69f   : > { %2875 = vperm.xlu1 %6175, %v5391_v36  }
 0x6a3   : > { %3274 = vperm.xlu1 %6175, %v5436_v55   ;;  %v9230_v55 = vld [vmem:[#allocation91_spill] sm:$0xff] }
 0x6a7   : > { %3673 = vperm.xlu1 %6175, %v5479_v34  }
 0x6ab   : > { %4072 = vperm.xlu1 %6175, %v5523_v3  }
 0x6af   : > { %4564 = vperm.xlu1 %6175, %v4135_v62  }
 0x6b3   : > { %870 = vperm.xlu1 %6175, %v828_v4  }
 0x6b7   : > { %850 = vperm.xlu1 %6175, %v824_v22  }
 0x6bb   : > { %1249 = vperm.xlu1 %6175, %v5203_v24   ;;  %v9231_v24 = vld [vmem:[#allocation92_spill] sm:$0xff] }
 0x6bf   : > { %1668 = vperm.xlu1 %6175, %v5252_v33  }
 0x6c3   : > { %1648 = vperm.xlu1 %6175, %v5248_v53   ;;  %v9232_v53 = vld [vmem:[#allocation93_spill] sm:$0xff] }
 0x6c7   : > { %2067 = vperm.xlu1 %6175, %v5298_v54  }
 0x6cb   : > { %2047 = vperm.xlu1 %6175, %v5294_v6  }
 0x6cf   : > { %2446 = vperm.xlu1 %6175, %v5339_v42  }
 0x6d3   : > { %2845 = vperm.xlu1 %6175, %v5385_v44  }
 0x6d7   : > { %3244 = vperm.xlu1 %6175, %v5430_v40   ;;  %v9233_v40 = vld [vmem:[#allocation122_spill] sm:$0xff] }
 0x6db   : > { %3643 = vperm.xlu1 %6175, %v5473_v60  }
 0x6df   : > { %4042 = vperm.xlu1 %6175, %v5517_v20   ;;  %v9234_v20 = vld [vmem:[#allocation123_spill] sm:$0xff] }
 0x70b   : > { %v4445_v37 = vpop.xlane.xlu1 %4444 }
 0x70c   : > { %v4446_v56 = vsub.f32 %v4439_v2, %v4445_v37  ;;  %v4556_v2 = vand.u32 2147483648, %v4550_v43 }
 0x70e   : > { %v4447_v32 = vmul.f32 1.442695, %v4446_v56  ;;  %v4557_v51 = vsel %vm4555_vm1, %v4556_v2, %v4554_v58  ;;  %v9241_v58 = vld [vmem:[#allocation15_spill] sm:$0xff] }
 0x70f   : > { %v1280_v7 = vpop.permute.xlu1 %1279  ;;  %v4558_v4 = vmax.f32 %v4557_v51, 1e-12 }
 0x710   : > { %6198 = vpow2.f32 %v4447_v32  ;;  %v1310_v46 = vmul.f32 %v1280_v7, %v9223_v57  ;;  %v1311_v21 = vmul.f32 %v1280_v7, %v9224_v28  ;;  %v9235_v32 = vld [vmem:[#allocation124_spill] sm:$0xff] }
 0x711   : > { %6200 = vrcp.f32 %v4558_v4 }
 0x712   : > { %v1334_v41 = vadd.f32 %v1310_v46, %v911_v10  ;;  %v1335_v8 = vadd.f32 %v1311_v21, %v912_v47  ;;  %v9236_v10 = vld [vmem:[#allocation125_spill] sm:$0xff]  ;;  %v9238_v21 = vld [vmem:[#allocation146_spill] sm:$0xff]  ;;  %6202 = vrsqrt.f32 %v8606_v63 }
 0x713   : > { %v1679_v38 = vpop.permute.xlu1 %1678  ;;  %v9237_v46 = vld [vmem:[#allocation145_spill] sm:$0xff] }
 0x714   : > { %v1709_v48 = vmul.f32 %v1679_v38, %v9225_v30  ;;  %v1710_v39 = vmul.f32 %v1679_v38, %v9226_v12 }
 0x716   : > { %v1733_v5 = vadd.f32 %v1709_v48, %v1334_v41  ;;  %v1734_v61 = vadd.f32 %v1710_v39, %v1335_v8  ;;  %v5207_v48 = vld [vmem:[%s8927_s2 + $0x98] sm:$0xff] }
 0x717   : > { %v2078_v45 = vpop.permute.xlu1 %2077 }
 0x718   : > { %v2108_v27 = vmul.f32 %v2078_v45, %v9227_v35  ;;  %v2109_v49 = vmul.f32 %v2078_v45, %v9228_v15  ;;  %v9239_v45 = vld [vmem:[#allocation11_spill] sm:$0xff] }
 0x71a   : > { %v8616_v9 = vpop.eup %6198  ;;  %v2132_v59 = vadd.f32 %v2108_v27, %v1733_v5  ;;  %v2133_v0 = vadd.f32 %v2109_v49, %v1734_v61  ;;  %v5389_v61 = vld [vmem:[%s8927_s2 + $0x218] sm:$0xff] }
 0x71b   : > { %v2477_v29 = vpop.permute.xlu1 %2476  ;;  %v4449_v31 = vsel %vm4246_vm11, %v8616_v9, 0.0  ;;  %v8630_v41 = vpop.eup %6200  ;;  %v9240_v27 = vld [vmem:[#allocation13_spill] sm:$0xff] }
 0x71c   : > { %v2507_v36 = vmul.f32 %v2477_v29, %v9229_v11  ;;  %v2508_v34 = vmul.f32 %v2477_v29, %v9230_v55  ;;  %4450 = vadd.xlane.f32.xlu0 %v4449_v31  ;;  %v4561_v12 = vmul.f32 %v8630_v41, %v8502_v23  ;;  %v5434_v49 = vld [vmem:[%s8927_s2 + $0x278] sm:$0xff] }
 0x71d   : > { %v5477_v11 = vld [vmem:[%s8927_s2 + $0x2d8] sm:$0xff] }
 0x71e   : > { %v2531_v3 = vadd.f32 %v2507_v36, %v2132_v59  ;;  %v2532_v62 = vadd.f32 %v2508_v34, %v2133_v0  ;;  %v9242_v59 = vld [vmem:[#allocation8_spill] sm:$0xff]  ;;  %v5521_v55 = vld [vmem:[%s8927_s2 + $0x338] sm:$0xff]  ;;  %v9243_v34 = vld [vmem:[#allocation42_spill] sm:$0xff] }
 0x71f   : > { %v2876_v22 = vpop.permute.xlu1 %2875 }
 0x720   : > { %v2906_v33 = vmul.f32 %v2876_v22, %v9231_v24  ;;  %v2907_v54 = vmul.f32 %v2876_v22, %v9232_v53 }
 0x722   : > { %v2930_v6 = vadd.f32 %v2906_v33, %v2531_v3  ;;  %v2931_v42 = vadd.f32 %v2907_v54, %v2532_v62  ;;  %v9244_v62 = vld [vmem:[#allocation43_spill] sm:$0xff]  ;;  %v9245_v54 = vld [vmem:[#allocation44_spill] sm:$0xff] }
 0x723   : > { %v3275_v44 = vpop.permute.xlu1 %3274 }
 0x724   : > { %v3305_v60 = vmul.f32 %v3275_v44, %v9233_v40  ;;  %v3306_v43 = vmul.f32 %v3275_v44, %v9234_v20 }
 0x726   : > { %v3329_v37 = vadd.f32 %v3305_v60, %v2930_v6  ;;  %v3330_v18 = vadd.f32 %v3306_v43, %v2931_v42  ;;  %v9246_v42 = vld [vmem:[#allocation45_spill] sm:$0xff]  ;;  %v9247_v43 = vld [vmem:[#allocation74_spill] sm:$0xff] }
 0x727   : > { %v3674_v56 = vpop.permute.xlu1 %3673 }
 0x728   : > { %v3704_v1 = vmul.f32 %v3674_v56, %v9235_v32  ;;  %v3705_v7 = vmul.f32 %v3674_v56, %v9236_v10 }
 0x72a   : > { %v3728_v52 = vadd.f32 %v3704_v1, %v3329_v37  ;;  %v3729_v47 = vadd.f32 %v3705_v7, %v3330_v18  ;;  %v9248_v18 = vld [vmem:[#allocation75_spill] sm:$0xff]  ;;  %v9249_v7 = vld [vmem:[#allocation76_spill] sm:$0xff] }
 0x72b   : > { %v4073_v57 = vpop.permute.xlu1 %4072 }
 0x72c   : > { %v4103_v28 = vmul.f32 %v4073_v57, %v9237_v46  ;;  %v4104_v19 = vmul.f32 %v4073_v57, %v9238_v21 }
 0x72e   : > { %v4127_v8 = vadd.f32 %v4103_v28, %v3728_v52  ;;  %v4128_v38 = vadd.f32 %v4104_v19, %v3729_v47  ;;  %v9250_v47 = vld [vmem:[#allocation77_spill] sm:$0xff]  ;;  %v9251_v19 = vld [vmem:[#allocation106_spill] sm:$0xff] }
 0x72f   : > { %v8632_v30 = vpop.permute.xlu1 %4564 }
 0x730   : > { %4457 = vmatprep.subr.mxu0 %v4128_v38  ;;  %v9252_v38 = vld [vmem:[#allocation107_spill] sm:$0xff] }
 0x731   : > { %4458 = vmatpush1.msra.mxu0 %v4127_v8 }
 0x732   : > { %1269 = vperm.xlu0 %6174, %v5207_v48   ;;  %4569 = vmatprep.subr.mxu0 %v4561_v12 }
 0x733   : > { %v8639_v39 = vpop.permute.xlu1 %870 }
 0x736   : > { %2466 = vperm.xlu0 %6174, %v5343_v25  }
 0x737   : > { %v851_v5 = vpop.permute.xlu1 %850 }
 0x738   : > { %v899_v35 = vmul.f32 %v851_v5, %v9239_v45  ;;  %v900_v15 = vmul.f32 %v851_v5, %v9240_v27 }
 0x73a   : > { %2865 = vperm.xlu0 %6174, %v5389_v61   ;;  %v9253_v61 = vld [vmem:[#allocation108_spill] sm:$0xff] }
 0x73b   : > { %v1250_v23 = vpop.permute.xlu1 %1249 }
 0x73c   : > { %v1298_v2 = vmul.f32 %v1250_v23, %v9241_v58  ;;  %v1299_v0 = vmul.f32 %v1250_v23, %v9242_v59  ;;  %v9255_v58 = vld [vmem:[#allocation137_spill] sm:$0xff]  ;;  %v9256_v59 = vld [vmem:[#allocation138_spill] sm:$0xff] }
 0x73e   : > { %v1322_v29 = vadd.f32 %v1298_v2, %v899_v35  ;;  %v1323_v31 = vadd.f32 %v1299_v0, %v900_v15  ;;  %3264 = vperm.xlu0 %6174, %v5434_v49   ;;  %v9254_v35 = vld [vmem:[#allocation109_spill] sm:$0xff] }
 0x73f   : > { %v1669_v51 = vpop.permute.xlu1 %1668 }
 0x742   : > { %3663 = vperm.xlu0 %6174, %v5477_v11   ;;  %v6203_v11 = vpop.eup %6202 }
 0x743   : > { %v1649_v36 = vpop.permute.xlu1 %1648 }
 0x744   : > { %v1697_v3 = vmul.f32 %v1649_v36, %v9243_v34  ;;  %v1698_v4 = vmul.f32 %v1649_v36, %v9244_v62  ;;  %v4536_v36 = vmul.f32 %v6203_v11, %v8606_v63  ;;  %v4540_v34 = vand.u32 2147483648, %v8606_v63 }
 0x746   : > { %v1721_v22 = vadd.f32 %v1697_v3, %v1322_v29  ;;  %v1722_v24 = vadd.f32 %v1698_v4, %v1323_v31  ;;  %4062 = vperm.xlu0 %6174, %v5521_v55   ;;  %v4538_v55 = vsel %vm4537_vm2, %v8606_v63, %v4536_v36  ;;  %v9271_v36 = vld [vmem:[#allocation116_spill] sm:$0xff] }
 0x747   : > { %v2068_v33 = vpop.permute.xlu1 %2067  ;;  %v4541_v3 = vsel %vm4539_vm4, %v4540_v34, %v4538_v55  ;;  %v9272_v34 = vld [vmem:[#allocation117_spill] sm:$0xff] }
 0x748   : > { %v4542_v62 = vmax.f32 %v4541_v3, 1e-12 }
 0x74a   : > { %6204 = vrcp.f32 %v4542_v62 }
 0x74b   : > { %v2048_v53 = vpop.permute.xlu1 %2047 }
 0x74c   : > { %v2096_v6 = vmul.f32 %v2048_v53, %v9245_v54  ;;  %v2097_v44 = vmul.f32 %v2048_v53, %v9246_v42  ;;  %v9257_v53 = vld [vmem:[#allocation18_spill] sm:$0xff] }
 0x74d   : > { %v907_v54 = vmul.f32 %v8639_v39, %v9257_v53 }
 0x74e   : > { %v2120_v40 = vadd.f32 %v2096_v6, %v1721_v22  ;;  %v2121_v60 = vadd.f32 %v2097_v44, %v1722_v24  ;;  %v9258_v6 = vld [vmem:[#allocation20_spill] sm:$0xff]  ;;  %v9259_v44 = vld [vmem:[#allocation19_spill] sm:$0xff] }
 0x74f   : > { %v2447_v20 = vpop.permute.xlu1 %2446  ;;  %v908_v42 = vmul.f32 %v8639_v39, %v9258_v6  ;;  %v4560_v39 = vmul.f32 %v8630_v41, %v8500_v14 }
 0x750   : > { %v2495_v37 = vmul.f32 %v2447_v20, %v9247_v43  ;;  %v2496_v56 = vmul.f32 %v2447_v20, %v9248_v18 }
 0x752   : > { %v2519_v32 = vadd.f32 %v2495_v37, %v2120_v40  ;;  %v2520_v1 = vadd.f32 %v2496_v56, %v2121_v60  ;;  %v9260_v60 = vld [vmem:[#allocation21_spill] sm:$0xff]  ;;  %v9261_v37 = vld [vmem:[#allocation50_spill] sm:$0xff]  ;;  %v9262_v56 = vld [vmem:[#allocation51_spill] sm:$0xff] }
 0x753   : > { %v2846_v10 = vpop.permute.xlu1 %2845  ;;  %v1705_v18 = vmul.f32 %v1669_v51, %v9261_v37 }
 0x754   : > { %v2894_v52 = vmul.f32 %v2846_v10, %v9249_v7  ;;  %v2895_v57 = vmul.f32 %v2846_v10, %v9250_v47  ;;  %v6205_v22 = vpop.eup %6204 }
 0x755   : > { %v4545_v43 = vmul.f32 %v6205_v22, %v8529_v50 }
 0x756   : > { %v2918_v46 = vadd.f32 %v2894_v52, %v2519_v32  ;;  %v2919_v28 = vadd.f32 %v2895_v57, %v2520_v1  ;;  %v1706_v32 = vmul.f32 %v1669_v51, %v9262_v56  ;;  %v9263_v57 = vld [vmem:[#allocation52_spill] sm:$0xff] }
 0x757   : > { %v3245_v21 = vpop.permute.xlu1 %3244  ;;  %v4568_v7 = vmul.f32 %v8632_v30, %v4545_v43  ;;  %v5210_v43 = vld [vmem:[%s8927_s2 + $0xb0] sm:$0xff] }
 0x758   : > { %v3293_v8 = vmul.f32 %v3245_v21, %v9251_v19  ;;  %v3294_v48 = vmul.f32 %v3245_v21, %v9252_v38  ;;  %v9265_v38 = vld [vmem:[#allocation82_spill] sm:$0xff] }
 0x75a   : > { %v3317_v12 = vadd.f32 %v3293_v8, %v2918_v46  ;;  %v3318_v25 = vadd.f32 %v3294_v48, %v2919_v28  ;;  %v2104_v46 = vmul.f32 %v2068_v33, %v9263_v57  ;;  %v9264_v28 = vld [vmem:[#allocation53_spill] sm:$0xff]  ;;  %v4544_v8 = vmul.f32 %v6205_v22, %v8527_v17  ;;  %v831_v57 = vld [vmem:[%s8927_s2 + $0x50] sm:$0xff] }
 0x75b   : > { %v3644_v5 = vpop.permute.xlu1 %3643  ;;  %v2105_v21 = vmul.f32 %v2068_v33, %v9264_v28  ;;  %v9267_v33 = vld [vmem:[#allocation84_spill] sm:$0xff] }
 0x75c   : > { %v3692_v45 = vmul.f32 %v3644_v5, %v9253_v61  ;;  %v3693_v27 = vmul.f32 %v3644_v5, %v9254_v35  ;;  %v4567_v14 = vmul.f32 %v8632_v30, %v4544_v8  ;;  %v9268_v35 = vld [vmem:[#allocation85_spill] sm:$0xff]  ;;  %v5346_v28 = vld [vmem:[%s8927_s2 + $0x1d0] sm:$0xff] }
 0x75d   : > { %v5524_v8 = vld [vmem:[%s8927_s2 + $0x350] sm:$0xff] }
 0x75e   : > { %v3716_v15 = vadd.f32 %v3692_v45, %v3317_v12  ;;  %v3717_v23 = vadd.f32 %v3693_v27, %v3318_v25  ;;  %v9266_v25 = vld [vmem:[#allocation83_spill] sm:$0xff] }
 0x75f   : > { %v4043_v49 = vpop.permute.xlu1 %4042 }
 0x760   : > { %v4091_v2 = vmul.f32 %v4043_v49, %v9255_v58  ;;  %v4092_v0 = vmul.f32 %v4043_v49, %v9256_v59  ;;  %v9269_v49 = vld [vmem:[#allocation114_spill] sm:$0xff] }
 0x762   : > { %v8674_v29 = vadd.f32 %v4091_v2, %v3716_v15  ;;  %v8676_v31 = vadd.f32 %v4092_v0, %v3717_v23  ;;  %v9270_v2 = vld [vmem:[#allocation115_spill] sm:$0xff] }
 0x7a9   : > { %v4451_v4 = vpop.xlane.xlu0 %4450 }
 0x7aa   : > { %6206 = vrcp.f32 %v4451_v4 }
 0x7b1   : > { %v1270_v24 = vpop.permute.xlu0 %1269 }
 0x7b2   : > { %v1306_v40 = vmul.f32 %v1270_v24, %v9259_v44  ;;  %v1307_v20 = vmul.f32 %v1270_v24, %v9260_v60  ;;  %v9273_v24 = vld [vmem:[#allocation141_spill] sm:$0xff] }
 0x7b4   : > { %v6207_v63 = vpop.eup %6206  ;;  %v1330_v1 = vadd.f32 %v1306_v40, %v907_v54  ;;  %v1331_v10 = vadd.f32 %v1307_v20, %v908_v42  ;;  %v9274_v54 = vld [vmem:[#allocation142_spill] sm:$0xff] }
 0x7b5   : > { %v4453_v52 = vmul.f32 %v6207_v63, %v8616_v9  ;;  %v2467_v47 = vpop.permute.xlu0 %2466  ;;  %v5255_v63 = vld [vmem:[%s8927_s2 + $0x110] sm:$0xff] }
 0x7b6   : > { %v1729_v50 = vadd.f32 %v1705_v18, %v1330_v1  ;;  %v1730_v19 = vadd.f32 %v1706_v32, %v1331_v10  ;;  %v2503_v51 = vmul.f32 %v2467_v47, %v9265_v38  ;;  %v2504_v9 = vmul.f32 %v2467_v47, %v9266_v25  ;;  %v4136_v38 = vld [vmem:[%s8930_s5 + $0x18] sm:$0xff] }
 0x7b7   : > { %5527 = vmatmul.mubr.msk.f32.vlgmr.msra.gmra.mrb[126].mxu0 %vm4246_vm11, %v4453_v52  ;;  %v4726_v10 = vmul.f32 %v8674_v29, %v8674_v29 }
 0x7b8   : > { %v2128_v48 = vadd.f32 %v2104_v46, %v1729_v50  ;;  %v2129_v12 = vadd.f32 %v2105_v21, %v1730_v19  ;;  %4570 = vmatpush1.xpose.msra.mxu0 %v4560_v39  ;;  %4633 = vmatprep.mubr.f32.mxu0 %v4568_v7  ;;  %v4727_v7 = vmul.f32 %v8676_v31, %v8676_v31  ;;  %v5301_v46 = vld [vmem:[%s8927_s2 + $0x170] sm:$0xff] }
 0x7b9   : > { %v2866_v41 = vpop.permute.xlu0 %2865  ;;  %v5392_v21 = vld [vmem:[%s8927_s2 + $0x230] sm:$0xff] }
 0x7ba   : > { %v2527_v5 = vadd.f32 %v2503_v51, %v2128_v48  ;;  %v2528_v61 = vadd.f32 %v2504_v9, %v2129_v12  ;;  %v2902_v45 = vmul.f32 %v2866_v41, %v9267_v33  ;;  %v2903_v27 = vmul.f32 %v2866_v41, %v9268_v35  ;;  %v5437_v50 = vld [vmem:[%s8927_s2 + $0x290] sm:$0xff]  ;;  %v9275_v33 = vld [vmem:[#allocation31_spill] sm:$0xff]  ;;  %v9276_v35 = vld [vmem:[#allocation33_spill] sm:$0xff] }
 0x7bb   : > { %4634 = vmatmul.mubr.f32.vlgmr.msra.gmra.mrb[128].mxu0 %v4567_v14  ;;  %v4728_v39 = vadd.f32 %v4727_v7, %v4726_v10  ;;  %v5480_v19 = vld [vmem:[%s8927_s2 + $0x2f0] sm:$0xff]  ;;  %v9284_v7 = vld [vmem:[#allocation95_spill] sm:$0xff] }
 0x7bc   : > { %v2926_v17 = vadd.f32 %v2902_v45, %v2527_v5  ;;  %v2927_v15 = vadd.f32 %v2903_v27, %v2528_v61  ;;  %4717 = vmatprep.mubr.f32.mxu0 %v8995_v16 }
 0x7bd   : > { %v3265_v23 = vpop.permute.xlu0 %3264 }
 0x7be   : > { %v3301_v58 = vmul.f32 %v3265_v23, %v9269_v49  ;;  %v3302_v59 = vmul.f32 %v3265_v23, %v9270_v2  ;;  %v9278_v23 = vld [vmem:[#allocation32_spill] sm:$0xff] }
 0x7c0   : > { %v3325_v0 = vadd.f32 %v3301_v58, %v2926_v17  ;;  %v3326_v11 = vadd.f32 %v3302_v59, %v2927_v15  ;;  %v9277_v17 = vld [vmem:[#allocation30_spill] sm:$0xff] }
 0x7c1   : > { %v3664_v30 = vpop.permute.xlu0 %3663  ;;  %v9279_v59 = vld [vmem:[#allocation62_spill] sm:$0xff] }
 0x7c2   : > { %v3700_v55 = vmul.f32 %v3664_v30, %v9271_v36  ;;  %v3701_v3 = vmul.f32 %v3664_v30, %v9272_v34 }
 0x7c4   : > { %v3724_v62 = vadd.f32 %v3700_v55, %v3325_v0  ;;  %v3725_v4 = vadd.f32 %v3701_v3, %v3326_v11  ;;  %v9280_v11 = vld [vmem:[#allocation63_spill] sm:$0xff] }
 0x7c5   : > { %v4063_v22 = vpop.permute.xlu0 %4062 }
 0x7c6   : > { %v4099_v53 = vmul.f32 %v4063_v22, %v9273_v24  ;;  %v4100_v6 = vmul.f32 %v4063_v22, %v9274_v54  ;;  %v9281_v22 = vld [vmem:[#allocation64_spill] sm:$0xff]  ;;  %v9282_v54 = vld [vmem:[#allocation65_spill] sm:$0xff] }
 0x7c8   : > { %v8713_v42 = vadd.f32 %v4099_v53, %v3724_v62  ;;  %v8715_v44 = vadd.f32 %v4100_v6, %v3725_v4 }
 0x7ca   : > { %v4742_v40 = vmul.f32 %v8713_v42, %v8713_v42  ;;  %v4743_v60 = vmul.f32 %v8715_v44, %v8715_v44 }
 0x7cc   : > { %v4744_v20 = vadd.f32 %v4743_v60, %v4742_v40 }
 0x7ce   : > { %4745 = vadd.xlane.f32.xlu1 %v4744_v20 }
 0x7df   : > { %1284 = vperm.xlu1 %6175, %v5210_v43  }
 0x7e3   : > { %1683 = vperm.xlu1 %6175, %v5255_v63  }
 0x85b   : > { %v4746_v51 = vpop.xlane.xlu1 %4745 }
 0x85c   : > { %6208 = vrsqrt.f32 %v4746_v51  ;;  %vm4749_vm5 = vcmp.eq.f32.partialorder %v4746_v51, inf  ;;  %v4752_v40 = vand.u32 2147483648, %v4746_v51  ;;  %vm4751_vm6 = vcmp.eq.f32.partialorder %v4746_v51, 0.0 }
 0x85f   : > { %v1285_v9 = vpop.permute.xlu1 %1284 }
 0x860   : > { %v1312_v45 = vmul.f32 %v1285_v9, %v9275_v33  ;;  %v1313_v27 = vmul.f32 %v1285_v9, %v9276_v35 }
 0x863   : > { %v1684_v5 = vpop.permute.xlu1 %1683 }
 0x864   : > { %v1711_v0 = vmul.f32 %v1684_v5, %v9279_v59  ;;  %v1712_v30 = vmul.f32 %v1684_v5, %v9280_v11  ;;  %v9291_v59 = vld [vmem:[#allocation147_spill] sm:$0xff]  ;;  %v9292_v11 = vld [vmem:[#allocation148_spill] sm:$0xff] }
 0x866   : > { %v6209_v41 = vpop.eup %6208 }
 0x867   : > { %v4748_v58 = vmul.f32 %v6209_v41, %v4746_v51 }
 0x869   : > { %v4750_v53 = vsel %vm4749_vm5, %v4746_v51, %v4748_v58  ;;  %v9287_v51 = vld [vmem:[#allocation126_spill] sm:$0xff] }
 0x86a   : > { %v4753_v63 = vsel %vm4751_vm6, %v4752_v40, %v4750_v53  ;;  %v5525_v53 = vld [vmem:[%s8927_s2 + $0x358] sm:$0xff] }
 0x88a   : > { %v8727_v37 = vpop.f32.mrb[126].mxu0 }
 0x88b   : > { %v6123_v18 = vpack.c.bf16 %v8727_v37, %v8538_v13  ;;  %v8731_v56 = vpop.f32.mrb[127].mxu0  ;;  %v4923_v13 = vld [vmem:[%s8929_s4 + $0x8] sm:$0xff]  ;;  %v4925_v37 = vld [vmem:[%s8929_s4 + $0x18] sm:$0xff] }
 0x88c   : > { %v6121_v32 = vpack.c.bf16 %v8731_v56, %v8540_v26  ;;  %v4924_v26 = vld [vmem:[%s8929_s4 + $0x10] sm:$0xff] }
 0x88e   : > { %v4635_v1 = vpop.f32.mrb[128].mxu0 }
 0x88f   : > { %v4637_v52 = vpop.f32.mrb[129].mxu0  ;;  %v4639_v47 = vsel %vm4246_vm11, %v4635_v1, -inf }
 0x890   : > { %4640 = vmax.xlane.f32.xlu0 %v4639_v47 }
 0x894   : > { %4729 = vadd.xlane.f32.xlu0 %v4728_v39 }
 0x8aa   : > { %885 = vperm.xlu0 %6174, %v831_v57   ;;  %v4754_v57 = vmax.f32 %v4753_v63, 1e-12 }
 0x8ae   : > { %2082 = vperm.xlu0 %6174, %v5301_v46  }
 0x8b2   : > { %2481 = vperm.xlu0 %6174, %v5346_v28   ;;  %v9285_v28 = vld [vmem:[#allocation96_spill] sm:$0xff] }
 0x8b6   : > { %2880 = vperm.xlu0 %6174, %v5392_v21  }
 0x8ba   : > { %3279 = vperm.xlu0 %6174, %v5437_v50   ;;  %v9286_v50 = vld [vmem:[#allocation97_spill] sm:$0xff] }
 0x8be   : > { %3678 = vperm.xlu0 %6174, %v5480_v19  }
 0x8c2   : > { %4077 = vperm.xlu0 %6174, %v5524_v8  }
 0x8c6   : > { %4760 = vperm.xlu0 %6174, %v4136_v38  }
 0x91d   : > { %v4641_v48 = vpop.xlane.xlu0 %4640 }
 0x91e   : > { %v4642_v12 = vsub.f32 %v4635_v1, %v4641_v48  ;;  %v9283_v1 = vld [vmem:[#allocation94_spill] sm:$0xff] }
 0x920   : > { %v4643_v25 = vmul.f32 1.442695, %v4642_v12 }
 0x921   : > { %v8764_v14 = vpop.xlane.xlu0 %4729 }
 0x922   : > { %6210 = vpow2.f32 %v4643_v25  ;;  %v9288_v25 = vld [vmem:[#allocation127_spill] sm:$0xff]  ;;  %vm4733_vm7 = vcmp.eq.f32.partialorder %v8764_v14, inf  ;;  %vm4735_vm8 = vcmp.eq.f32.partialorder %v8764_v14, 0.0 }
 0x923   : > { %6212 = vrcp.f32 %v4754_v57 }
 0x924   : > { %6214 = vrsqrt.f32 %v8764_v14 }
 0x929   : > { %v886_v61 = vpop.permute.xlu0 %885 }
 0x92a   : > { %v913_v15 = vmul.f32 %v886_v61, %v9277_v17  ;;  %v914_v49 = vmul.f32 %v886_v61, %v9278_v23  ;;  %v832_v61 = vld [vmem:[%s8927_s2 + $0x58] sm:$0xff] }
 0x92c   : > { %v8770_v2 = vpop.eup %6210  ;;  %v1336_v36 = vadd.f32 %v1312_v45, %v913_v15  ;;  %v1337_v55 = vadd.f32 %v1313_v27, %v914_v49  ;;  %v9289_v45 = vld [vmem:[#allocation128_spill] sm:$0xff]  ;;  %v9290_v27 = vld [vmem:[#allocation129_spill] sm:$0xff] }
 0x92d   : > { %v2083_v34 = vpop.permute.xlu0 %2082  ;;  %v4645_v3 = vsel %vm4246_vm11, %v8770_v2, 0.0  ;;  %v5211_v49 = vld [vmem:[%s8927_s2 + $0xb8] sm:$0xff] }
 0x92e   : > { %v1735_v62 = vadd.f32 %v1711_v0, %v1336_v36  ;;  %v1736_v4 = vadd.f32 %v1712_v30, %v1337_v55  ;;  %v2110_v24 = vmul.f32 %v2083_v34, %v9281_v22  ;;  %4646 = vadd.xlane.f32.xlu1 %v4645_v3  ;;  %v2111_v6 = vmul.f32 %v2083_v34, %v9282_v54  ;;  %v6213_v36 = vpop.eup %6212  ;;  %v5256_v3 = vld [vmem:[%s8927_s2 + $0x118] sm:$0xff] }
 0x92f   : > { %v5393_v22 = vld [vmem:[%s8927_s2 + $0x238] sm:$0xff]  ;;  %v6215_v54 = vpop.eup %6214 }
 0x930   : > { %v2134_v60 = vadd.f32 %v2110_v24, %v1735_v62  ;;  %v2135_v20 = vadd.f32 %v2111_v6, %v1736_v4  ;;  %v4757_v62 = vmul.f32 %v6213_v36, %v8715_v44  ;;  %v5347_v4 = vld [vmem:[%s8927_s2 + $0x1d8] sm:$0xff]  ;;  %v4732_v6 = vmul.f32 %v6215_v54, %v8764_v14 }
 0x931   : > { %v2482_v43 = vpop.permute.xlu0 %2481  ;;  %v5438_v24 = vld [vmem:[%s8927_s2 + $0x298] sm:$0xff] }
 0x932   : > { %v2509_v10 = vmul.f32 %v2482_v43, %v9283_v1  ;;  %v2510_v52 = vmul.f32 %v2482_v43, %v9284_v7  ;;  %v5481_v44 = vld [vmem:[%s8927_s2 + $0x2f8] sm:$0xff]  ;;  %v4734_v40 = vsel %vm4733_vm7, %v8764_v14, %v4732_v6  ;;  %v9302_v6 = vld [vmem:[#allocation99_spill] sm:$0xff] }
 0x934   : > { %v2533_v47 = vadd.f32 %v2509_v10, %v2134_v60  ;;  %v2534_v39 = vadd.f32 %v2510_v52, %v2135_v20  ;;  %v4736_v60 = vand.u32 2147483648, %v8764_v14  ;;  %v9293_v52 = vld [vmem:[#allocation34_spill] sm:$0xff] }
 0x935   : > { %v2881_v46 = vpop.permute.xlu0 %2880 }
 0x936   : > { %v2908_v21 = vmul.f32 %v2881_v46, %v9285_v28  ;;  %v2909_v19 = vmul.f32 %v2881_v46, %v9286_v50  ;;  %v4737_v20 = vsel %vm4735_vm8, %v4736_v60, %v4734_v40  ;;  %v9295_v46 = vld [vmem:[#allocation35_spill] sm:$0xff] }
 0x937   : > { %v4738_v43 = vmax.f32 %v4737_v20, 1e-12 }
 0x938   : > { %v2932_v8 = vadd.f32 %v2908_v21, %v2533_v47  ;;  %v2933_v38 = vadd.f32 %v2909_v19, %v2534_v39  ;;  %v9294_v39 = vld [vmem:[#allocation36_spill] sm:$0xff]  ;;  %v9296_v21 = vld [vmem:[#allocation37_spill] sm:$0xff] }
 0x939   : > { %v3280_v48 = vpop.permute.xlu0 %3279  ;;  %6216 = vrcp.f32 %v4738_v43  ;;  %v9303_v43 = vld [vmem:[#allocation100_spill] sm:$0xff] }
 0x93a   : > { %v3307_v12 = vmul.f32 %v3280_v48, %v9287_v51  ;;  %v3308_v9 = vmul.f32 %v3280_v48, %v9288_v25 }
 0x93c   : > { %v3331_v41 = vadd.f32 %v3307_v12, %v2932_v8  ;;  %v3332_v5 = vadd.f32 %v3308_v9, %v2933_v38  ;;  %v9297_v9 = vld [vmem:[#allocation66_spill] sm:$0xff] }
 0x93d   : > { %v3679_v33 = vpop.permute.xlu0 %3678 }
 0x93e   : > { %v3706_v35 = vmul.f32 %v3679_v33, %v9289_v45  ;;  %v3707_v17 = vmul.f32 %v3679_v33, %v9290_v27  ;;  %v4756_v33 = vmul.f32 %v6213_v36, %v8713_v42 }
 0x93f   : > { %890 = vperm.xlu1 %6175, %v832_v61  }
 0x940   : > { %v3730_v15 = vadd.f32 %v3706_v35, %v3331_v41  ;;  %v3731_v23 = vadd.f32 %v3707_v17, %v3332_v5  ;;  %v9298_v5 = vld [vmem:[#allocation67_spill] sm:$0xff] }
 0x941   : > { %v4078_v58 = vpop.permute.xlu0 %4077 }
 0x942   : > { %v4105_v0 = vmul.f32 %v4078_v58, %v9291_v59  ;;  %v4106_v30 = vmul.f32 %v4078_v58, %v9292_v11  ;;  %v5302_v11 = vld [vmem:[%s8927_s2 + $0x178] sm:$0xff] }
 0x943   : > { %1289 = vperm.xlu1 %6175, %v5211_v49   ;;  %v6217_v10 = vpop.eup %6216 }
 0x944   : > { %v4129_v55 = vadd.f32 %v4105_v0, %v3730_v15  ;;  %v4130_v34 = vadd.f32 %v4106_v30, %v3731_v23  ;;  %v4741_v14 = vmul.f32 %v6217_v10, %v8676_v31  ;;  %v4740_v45 = vmul.f32 %v6217_v10, %v8674_v29 }
 0x945   : > { %v4761_v19 = vpop.permute.xlu0 %4760 }
 0x946   : > { %4653 = vmatprep.subr.mxu0 %v4130_v34  ;;  %v4764_v25 = vmul.f32 %v4761_v19, %v4741_v14  ;;  %v4763_v31 = vmul.f32 %v4761_v19, %v4740_v45  ;;  %v9307_v19 = vld [vmem:[#allocation132_spill] sm:$0xff]  ;;  %v9308_v14 = vld [vmem:[#allocation133_spill] sm:$0xff] }
 0x947   : > { %1688 = vperm.xlu1 %6175, %v5256_v3   ;;  %4654 = vmatpush1.msra.mxu0 %v4129_v55 }
 0x948   : > { %4765 = vmatprep.subr.mxu0 %v4757_v62  ;;  %v9299_v62 = vld [vmem:[#allocation68_spill] sm:$0xff] }
 0x94b   : > { %2486 = vperm.xlu1 %6175, %v5347_v4  }
 0x94f   : > { %2885 = vperm.xlu1 %6175, %v5393_v22   ;;  %v9300_v22 = vld [vmem:[#allocation69_spill] sm:$0xff] }
 0x953   : > { %3284 = vperm.xlu1 %6175, %v5438_v24  }
 0x957   : > { %3683 = vperm.xlu1 %6175, %v5481_v44  }
 0x95b   : > { %4082 = vperm.xlu1 %6175, %v5525_v53   ;;  %v9301_v53 = vld [vmem:[#allocation98_spill] sm:$0xff] }
 0x9bb   : > { %v4647_v63 = vpop.xlane.xlu1 %4646 }
 0x9bc   : > { %6218 = vrcp.f32 %v4647_v63 }
 0x9bf   : > { %v891_v1 = vpop.permute.xlu1 %890 }
 0x9c0   : > { %v915_v47 = vmul.f32 %v891_v1, %v9293_v52  ;;  %v916_v57 = vmul.f32 %v891_v1, %v9294_v39  ;;  %v9304_v1 = vld [vmem:[#allocation101_spill] sm:$0xff] }
 0x9c3   : > { %v1290_v7 = vpop.permute.xlu1 %1289 }
 0x9c4   : > { %v1314_v28 = vmul.f32 %v1290_v7, %v9295_v46  ;;  %v1315_v50 = vmul.f32 %v1290_v7, %v9296_v21 }
 0x9c6   : > { %v6219_v8 = vpop.eup %6218  ;;  %v1338_v38 = vadd.f32 %v1314_v28, %v915_v47  ;;  %v1339_v48 = vadd.f32 %v1315_v50, %v916_v57  ;;  %v9305_v47 = vld [vmem:[#allocation130_spill] sm:$0xff]  ;;  %v9306_v57 = vld [vmem:[#allocation131_spill] sm:$0xff] }
 0x9c7   : > { %v4649_v51 = vmul.f32 %v6219_v8, %v8770_v2  ;;  %v1689_v12 = vpop.permute.xlu1 %1688 }
 0x9c8   : > { %v1713_v41 = vmul.f32 %v1689_v12, %v9297_v9  ;;  %v1714_v61 = vmul.f32 %v1689_v12, %v9298_v5  ;;  %v9309_v12 = vld [vmem:[#allocation149_spill] sm:$0xff]  ;;  %v9310_v9 = vld [vmem:[#allocation150_spill] sm:$0xff] }
 0x9c9   : > { %5528 = vmatmul.mubr.msk.f32.vlgmr.msra.gmra.mrb[130].mxu0 %vm4246_vm11, %v4649_v51 }
 0x9ca   : > { %v1737_v35 = vadd.f32 %v1713_v41, %v1338_v38  ;;  %v1738_v27 = vadd.f32 %v1714_v61, %v1339_v48  ;;  %4766 = vmatpush1.xpose.msra.mxu0 %v4756_v33  ;;  %4829 = vmatprep.mubr.f32.mxu0 %v4764_v25 }
 0x9cb   : > { %v2487_v30 = vpop.permute.xlu1 %2486 }
 0x9cc   : > { %v2511_v54 = vmul.f32 %v2487_v30, %v9301_v53  ;;  %v2512_v40 = vmul.f32 %v2487_v30, %v9302_v6 }
 0x9cd   : > { %4830 = vmatmul.mubr.f32.vlgmr.msra.gmra.mrb[132].mxu0 %v4763_v31 }
 0x9ce   : > { %4913 = vmatprep.mubr.f32.mxu0 %v8995_v16 }
 0x9cf   : > { %v2886_v36 = vpop.permute.xlu1 %2885 }
 0x9d0   : > { %v2910_v63 = vmul.f32 %v2886_v36, %v9303_v43  ;;  %v2911_v10 = vmul.f32 %v2886_v36, %v9304_v1 }
 0x9d3   : > { %v3285_v55 = vpop.permute.xlu1 %3284 }
 0x9d4   : > { %v3309_v39 = vmul.f32 %v3285_v55, %v9305_v47  ;;  %v3310_v46 = vmul.f32 %v3285_v55, %v9306_v57 }
 0x9d7   : > { %v3684_v44 = vpop.permute.xlu1 %3683 }
 0x9d8   : > { %v3708_v8 = vmul.f32 %v3684_v44, %v9307_v19  ;;  %v3709_v38 = vmul.f32 %v3684_v44, %v9308_v14 }
 0x9db   : > { %v4083_v50 = vpop.permute.xlu1 %4082 }
 0x9dc   : > { %v4107_v25 = vmul.f32 %v4083_v50, %v9309_v12  ;;  %v4108_v41 = vmul.f32 %v4083_v50, %v9310_v9 }
 0xa9c   : > { %v4719_v2 = vpop.f32.mrb[130].mxu0 }
 0xa9d   : > { %v4721_v17 = vpop.f32.mrb[131].mxu0 }
 0xaa0   : > { %v4831_v15 = vpop.f32.mrb[132].mxu0 }
 0xaa1   : > { %v4833_v23 = vpop.f32.mrb[133].mxu0  ;;  %v4835_v49 = vsel %vm4246_vm11, %v4831_v15, -inf }
 0xaa2   : > { %4836 = vmax.xlane.f32.xlu0 %v4835_v49 }
 0xb2f   : > { %v4837_v42 = vpop.xlane.xlu0 %4836 }
 0xb30   : > { %v4838_v58 = vsub.f32 %v4831_v15, %v4837_v42  ;;  %v4922_v42 = vld [vmem:[%s8929_s4] sm:$0xff] }
 0xb32   : > { %v4839_v29 = vmul.f32 1.442695, %v4838_v58 }
 0xb34   : > { %6220 = vpow2.f32 %v4839_v29 }
 0xb3e   : > { %v6221_v59 = vpop.eup %6220 }
 0xb3f   : > { %v4841_v0 = vsel %vm4246_vm11, %v6221_v59, 0.0 }
 0xb40   : > { %4842 = vadd.xlane.f32.xlu0 %v4841_v0 }
 0xb56   : > { %2087 = vperm.xlu0 %6174, %v5302_v11  }
 0xbcd   : > { %v4843_v34 = vpop.xlane.xlu0 %4842 }
 0xbce   : > { %6222 = vrcp.f32 %v4843_v34 }
 0xbd5   : > { %v2088_v3 = vpop.permute.xlu0 %2087 }
 0xbd6   : > { %v2112_v4 = vmul.f32 %v2088_v3, %v9299_v62  ;;  %v2113_v24 = vmul.f32 %v2088_v3, %v9300_v22 }
 0xbd8   : > { %v2136_v60 = vadd.f32 %v2112_v4, %v1737_v35  ;;  %v2137_v20 = vadd.f32 %v2113_v24, %v1738_v27  ;;  %v6223_v33 = vpop.eup %6222 }
 0xbd9   : > { %v4845_v27 = vmul.f32 %v6223_v33, %v6221_v59 }
 0xbda   : > { %v2535_v7 = vadd.f32 %v2511_v54, %v2136_v60  ;;  %v2536_v52 = vadd.f32 %v2512_v40, %v2137_v20 }
 0xbdc   : > { %v2934_v28 = vadd.f32 %v2910_v63, %v2535_v7  ;;  %v2935_v21 = vadd.f32 %v2911_v10, %v2536_v52 }
 0xbde   : > { %v3333_v48 = vadd.f32 %v3309_v39, %v2934_v28  ;;  %v3334_v51 = vadd.f32 %v3310_v46, %v2935_v21 }
 0xbe0   : > { %v3733_v5 = vadd.f32 %v3709_v38, %v3334_v51  ;;  %v3732_v61 = vadd.f32 %v3708_v8, %v3333_v48 }
 0xbe2   : > { %v4132_v45 = vadd.f32 %v4108_v41, %v3733_v5  ;;  %v4131_v35 = vadd.f32 %v4107_v25, %v3732_v61 }
 0xbe4   : > { %4849 = vmatprep.subr.mxu0 %v4132_v45 }
 0xbe5   : > { %4850 = vmatpush1.msra.mxu0 %v4131_v35 }
 0xbe6   : > { %5529 = vmatmul.mubr.msk.f32.vlgmr.msra.gmra.mrb[134].mxu0 %vm4246_vm11, %v4845_v27  ;;  %6122 = vmatprep.subr.bf16.mxu0 %v6121_v32 }
 0xbe7   : > { %6124 = vmatpush1.bf16.msra.mxu0 %v6123_v18  ;;  %5010 = vmatprep.mubr.f32.mxu0 %v8995_v16 }
 0xcb9   : > { %v4915_v31 = vpop.f32.mrb[134].mxu0 }
 0xcba   : > { %v6127_v15 = vpack.c.bf16 %v4915_v31, %v4719_v2  ;;  %v4917_v23 = vpop.f32.mrb[135].mxu0 }
 0xcbb   : > { %v6125_v49 = vpack.c.bf16 %v4917_v23, %v4721_v17 }
 0xcbd   : > { %6126 = vmatprep.subr.bf16.mxu0 %v6125_v49 }
 0xcbe   : > { %6128 = vmatpush1.bf16.msra.mxu0 %v6127_v15 }
 0xcc1   : > { %5530 = vmatmul.mubr.msk.f32.vlgmr.msra.gmra.mrb[136].mxu0 %vm270_vm10, %v4922_v42 }
 0xcc2   : > { %5016 = vmatprep.mubr.f32.mxu0 %v8995_v16 }
 0xcc5   : > { %5531 = vmatmul.mubr.msk.f32.gmra.mrb[138].mxu0 %vm270_vm10, %v4923_v13 }
 0xcc6   : > { %5022 = vmatprep.mubr.f32.mxu0 %v8995_v16 }
 0xcc9   : > { %5532 = vmatmul.mubr.msk.f32.gmra.mrb[140].mxu0 %vm270_vm10, %v4924_v26 }
 0xcca   : > { %5028 = vmatprep.mubr.f32.mxu0 %v8995_v16 }
 0xccd   : > { %5533 = vmatmul.mubr.msk.f32.gmra.mrb[142].mxu0 %vm270_vm10, %v4925_v37 }
 0xd94   : > { %v5012_v18 = vpop.f32.mrb[136].mxu0 }
 0xd95   : > { %5035 = vst [vmem:[%s244_s20] sm:$0xff] %v5012_v18  ;;  %v5014_v56 = vpop.f32.mrb[137].mxu0 }
 0xd96   : > { %5036 = vst [vmem:[%s244_s20 + $0x8] sm:$0xff] %v5014_v56 }
 0xd98   : > { %v5018_v32 = vpop.f32.mrb[138].mxu0 }
 0xd99   : > { %5037 = vst [vmem:[%s244_s20 + $0x10] sm:$0xff] %v5018_v32  ;;  %v5020_v2 = vpop.f32.mrb[139].mxu0 }
 0xd9a   : > { %5038 = vst [vmem:[%s244_s20 + $0x18] sm:$0xff] %v5020_v2 }
 0xd9c   : > { %v5024_v16 = vpop.f32.mrb[140].mxu0 }
 0xd9d   : > { %5039 = vst [vmem:[%s244_s20 + $0x20] sm:$0xff] %v5024_v16  ;;  %v5026_v17 = vpop.f32.mrb[141].mxu0 }
 0xd9e   : > { %5040 = vst [vmem:[%s244_s20 + $0x28] sm:$0xff] %v5026_v17 }
 0xda0   : > { %v5030_v58 = vpop.f32.mrb[142].mxu0 }
 0xda1   : > { %5041 = vst [vmem:[%s244_s20 + $0x30] sm:$0xff] %v5030_v58  ;;  %v5032_v29 = vpop.f32.mrb[143].mxu0 }
 0xda2   : > { %5042 = vst [vmem:[%s244_s20 + $0x38] sm:$0xff] %v5032_v29 }
 0xda3   : > { %6237 = shalt.err (!%p6234_p3)
}
 0xda4   : > { %s6238_s15 = scalar_lea.hbm %s8882_s10, 1024  ;;  %s6242_s18 = scalar_lea.hbm %s8931_s6, 2048 }
 0xda5   : > { %p6239_p4 = scmp.ne.s32.totalorder %s8882_s10, %s6238_s15  ;;  %p6243_p9 = scmp.lt.u32.totalorder %s8882_s10, %s8931_s6 }
 0xda6   : > { %p6244_p10 = scmp.lt.u32.totalorder %s6242_s18, %s6238_s15  ;;  %p6246_p12 = scmp.lt.u32.totalorder %s6238_s15, %s8882_s10 }
 0xda7   : > { %p6240_p7 = pnand %p6239_p4, %p6368_p5 }
 0xda8   : > { %p6245_p11 = por %p6244_p10, %p6243_p9 }
 0xda9   : > { %p6241_p8 = pneg %p6240_p7 }
 0xdaa   : > { %p6247_p13 = por %p6246_p12, %p6245_p11 }
 0xdac   : > { %p6248_p0 = pnand %p6247_p13, %p6241_p8 }
 0xdae   : > { %6251 = shalt.err (!%p6248_p0)
}
 0xdaf   : > { %s6293_s28 = smov 256   ;;  %s6294_s29 = smov 16  }
 0xdb0   : > { %6129 = dma.vmem_to_hbm [thread:$0]  (%p6368_p5), %s8877_s26, 1024, %s8882_s10, %s8884_s11, %s6293_s28, %s6293_s28, %s6294_s29  }
 0xdb1 PF: > { %p6135_p1 = scmp.ge.s32.totalorder %s6286_s24, 2  ;;  %s5072_s9 = sand.u32 1, %s6274_s21  }
 0xdb2   : > { %s5073_s12 = scalar_lea.sflag [#allocation4], %s5072_s9 }
 0xdb3   : > { %p6132_p2 = pnand %p6135_p1, %p6372_p6 }
 0xdb5   : > { %6269 = dma.done.wait (!%p6132_p2), %s5073_s12, 1024  }
 0xdb6   : > { %6271 = vsyncadd (!%p6132_p2), %s5073_s12, 4294966272  ;;  %p16_p3 = scmp.ge.s32.totalorder %s6355_s27, 4   ;;  %s9311_s21 = smov %s6278_s22 }
 0xdb7   : > { %s9312_s22 = smov %s6282_s23  ;;  %s9313_s23 = smov %s6366_s30 }
 0xdb8   : > { %s9314_s24 = smov %s6355_s27  ;;  %18 = sbr.rel (!%p16_p3) target bundleno = 3 (0x3), region = 95 }
 0xdbf   :  { %5078 = vsyncpa [#allocation4], 1 }
 0xdc0   :  { %5080 = vsyncpa [#allocation4 + $0x1], 1 }

</bundles_post_ra>
